<compile_context>
chip_gen: v5e
topology: v5e:2x2
jax: 0.10.0
libtpu: 0.0.40
codegen_flags: <defaults>
</compile_context>

<pallas_src>
import functools

import numpy as np
import jax
import jax.numpy as jnp
from jax import lax
from jax.experimental import pallas as pl
from jax.experimental.pallas import tpu as pltpu


# ----------------------------------------------------------------------------
# Deterministic parameter construction.
# ----------------------------------------------------------------------------
def make_hist_conv_weight(n_bins, downscale):
    # Conv2d(n_bins, n_bins, k=downscale, stride=downscale, bias=False) weight:
    # identity over channels, average pooling over the kxk window.
    w = np.zeros((n_bins, n_bins, downscale, downscale), np.float32)
    for i in range(n_bins):
        w[i, i, :, :] = 1.0 / float(downscale * downscale)
    return w


def make_gaussian_1d(win, sigma):
    # kornia's 2-D window is outer(g, g) of this normalized 1-D gaussian, so the
    # separable two-pass filter in kernel 2 is mathematically identical.
    x = np.arange(win, dtype=np.float64) - (win - 1) / 2.0
    g = np.exp(-(x ** 2) / (2.0 * sigma ** 2))
    return (g / g.sum()).astype(np.float32)


# ----------------------------------------------------------------------------
# Kernel 1: per-channel histogram + strided hist_conv (block-average pooling)
# ----------------------------------------------------------------------------
def _hist_shrink_kernel(img_ref, out_ref, *, n_bins, ds, tb, inv_area):
    # img_ref: (TB, H, W)        channel images, f32 in [0, 1]
    # out_ref: (TB, nb*dh, dw)   f32 per-bin block averages (bin-major rows)
    _, H, W = img_ref.shape
    dh, dw = H // ds, W // ds

    # Column (lane) pool matrix built in-kernel (0/1, exact in bf16).
    wi = lax.broadcasted_iota(jnp.int32, (W, dw), 0)
    cj = lax.broadcasted_iota(jnp.int32, (W, dw), 1) * ds
    pct = jnp.logical_and(wi >= cj, wi < cj + ds).astype(jnp.bfloat16)

    use_matmul_rowpool = (ds % 8) != 0
    if use_matmul_rowpool:
        # Shared (dh, H) row-pool matrix for sub-sublane-tile downscales.
        hi = lax.broadcasted_iota(jnp.int32, (dh, H), 1)
        rj = lax.broadcasted_iota(jnp.int32, (dh, H), 0) * ds
        pr = jnp.logical_and(hi >= rj, hi < rj + ds).astype(jnp.bfloat16)

    for t in range(tb):
        img = img_ref[t]
        # Bin index computed once; each mask is a single equality test.
        idx = jnp.clip(jnp.floor(img * float(n_bins)), 0.0, float(n_bins - 1))
        masks = jnp.concatenate(
            [(idx == float(i)).astype(jnp.bfloat16) for i in range(n_bins)],
            axis=0)                                              # (nb*H, W)

        # Column pool for all bins in one big-M MXU matmul: (nb*H, W) @ (W, dw).
        colp = jnp.dot(masks, pct, preferred_element_type=jnp.float32)

        if use_matmul_rowpool:
            # Counts <= ds are exact in bf16; nb tiny matmuls, no block-diagonal.
            pooled = jnp.concatenate(
                [jnp.dot(pr, colp[b * H:(b + 1) * H].astype(jnp.bfloat16),
                         preferred_element_type=jnp.float32)
                 for b in range(n_bins)], axis=0)                # (nb*dh, dw)
        else:
            # Layout-preserving sublane-group reduce on the VPU/XLU (MXU stays
            # free for the big column-pool matmul).
            pooled = colp.reshape(n_bins * dh, ds, dw).sum(axis=1)

        # hist_conv channel mix is identity / ds^2 -> fold into one f32 scale.
        out_ref[t] = pooled * inv_area


def hist_shrink_fused(imgs_nchw, n_bins, downscale):
    """get_hist + pack_tensor + hist_conv, returns (batch, c, n_bins, dh, dw)."""
    b_in, c, H, W = imgs_nchw.shape
    dh, dw = H // downscale, W // downscale
    bc = b_in * c
    x = imgs_nchw.reshape(bc, H, W).astype(jnp.float32)

    # Per-grid-step batching: amortize the ~0.35us step overhead, sized against
    # VMEM (masks + double-buffered image + pooled counts per image).
    per_img = n_bins * H * W * 2 + 3 * H * W * 4 + n_bins * H * dw * 4
    tb = 1
    for d in range(1, min(8, bc) + 1):
        if bc % d == 0 and d * per_img <= (20 << 20):
            tb = d

    kernel = functools.partial(
        _hist_shrink_kernel, n_bins=n_bins, ds=downscale, tb=tb,
        inv_area=1.0 / float(downscale * downscale))
    out = pl.pallas_call(
        kernel,
        out_shape=jax.ShapeDtypeStruct((bc, n_bins * dh, dw), jnp.float32),
        grid=(bc // tb,),
        in_specs=[pl.BlockSpec((tb, H, W), lambda i: (i, 0, 0))],
        out_specs=pl.BlockSpec((tb, n_bins * dh, dw), lambda i: (i, 0, 0)),
        compiler_params=pltpu.CompilerParams(
            dimension_semantics=("parallel",),
            vmem_limit_bytes=48 * 1024 * 1024),
    )(x)
    return out.reshape(b_in, c, n_bins, dh, dw)


# ----------------------------------------------------------------------------
# Kernel 2: kornia-style SSIM loss for both over/under problems, image index on
# lanes, over/under masking and the final reduction fused in-kernel.
# ----------------------------------------------------------------------------
def _ssim_pair_kernel(g_ref, d_ref, b_ref, m_ref, out_ref, *,
                      win, gw, dh, dw, tn, n_valid):
    # g/d/b/m_ref: (ph, pw, TN)  reflect-padded, lane axis = image index
    # out_ref    : (1, 1, 1)     partial sum of both problems' clamped loss maps
    r = win // 2
    gt = g_ref[...]
    m = m_ref[...]
    um = 1.0 - m

    def gfilt(f):
        # Separable gaussian, symmetric taps folded: g0*(f0+f4)+g1*(f1+f3)+g2*f2.
        v = gw[r] * f[r:r + dh]
        for t in range(r):
            v = v + gw[t] * (f[t:t + dh] + f[win - 1 - t:win - 1 - t + dh])
        h = gw[r] * v[:, r:r + dw]
        for t in range(r):
            h = h + gw[t] * (v[:, t:t + dw] + v[:, win - 1 - t:win - 1 - t + dw])
        return h

    def loss_map(a, b):
        mu1 = gfilt(a)
        mu2 = gfilt(b)
        m11 = gfilt(a * a)          # products built just before their pass
        m22 = gfilt(b * b)
        m12 = gfilt(a * b)
        mu1_sq = mu1 * mu1
        mu2_sq = mu2 * mu2
        mu12 = mu1 * mu2
        s1 = m11 - mu1_sq
        s2 = m22 - mu2_sq
        s12 = m12 - mu12
        c1 = (0.01 * 1.0) ** 2
        c2 = (0.03 * 1.0) ** 2
        num = (2.0 * mu12 + c1) * (2.0 * s12 + c2)
        den = (mu1_sq + mu2_sq + c1) * (s1 + s2 + c2)     # >= c1*c2 > 0
        ssim = num * pl.reciprocal(den, approx=True)      # EUP slot
        return jnp.clip(0.5 * (1.0 - ssim), 0.0, 1.0)

    lm = (loss_map(gt * m, d_ref[...] * m)
          + loss_map(gt * um, b_ref[...] * um))

    # Zero out the zero-padded lanes (approx reciprocal noise would otherwise
    # leak ~1e-4 per padded pixel into the sum).
    lane = lax.broadcasted_iota(jnp.int32, (dh, dw, tn), 2) + pl.program_id(0) * tn
    lm = jnp.where(lane < n_valid, lm, 0.0)

    out_ref[...] = jnp.sum(lm).reshape(1, 1, 1)


def ssim_pair_loss_mean(gt_h, dark_h, bright_h, over_m, win, gw):
    """0.5*ssim_loss(gt*over, dark*over) + 0.5*ssim_loss(gt*under, bright*under).

    Inputs are (N, dh, dw) single-channel image stacks; over_m is the 0/1 mask.
    """
    n, dh, dw = gt_h.shape
    r = win // 2
    # TODO(synk): jnp.pad mode='reflect' (kornia padding) requires dh, dw > win//2.
    ph, pw = dh + 2 * r, dw + 2 * r

    # Lane tile: big enough to amortize step overhead, >=2 steps when possible
    # (v7x megacore), sized against VMEM.
    per_lane = (4 * 2 * ph * pw + 3 * ph * pw + 16 * dh * dw) * 4
    tn = 256 if (n > 256 and per_lane * 256 <= (36 << 20)) else 128
    n_pad = ((n + tn - 1) // tn) * tn
    n_steps = n_pad // tn

    def prep(z):
        zp = jnp.pad(z, ((0, 0), (r, r), (r, r)), mode="reflect")
        zp = jnp.pad(zp, ((0, n_pad - n), (0, 0), (0, 0)))     # zero lanes
        return jnp.transpose(zp, (1, 2, 0))                    # (ph, pw, Np)

    ins = [prep(gt_h), prep(dark_h), prep(bright_h), prep(over_m)]

    kernel = functools.partial(_ssim_pair_kernel, win=win, gw=gw,
                               dh=dh, dw=dw, tn=tn, n_valid=n)
    partial_sums = pl.pallas_call(
        kernel,
        out_shape=jax.ShapeDtypeStruct((n_steps, 1, 1), jnp.float32),
        grid=(n_steps,),
        in_specs=[pl.BlockSpec((ph, pw, tn), lambda i: (0, 0, i))
                  for _ in range(4)],
        out_specs=pl.BlockSpec((1, 1, 1), lambda i: (i, 0, 0)),
        compiler_params=pltpu.CompilerParams(
            dimension_semantics=("parallel",),
            vmem_limit_bytes=48 * 1024 * 1024),
    )(*ins)

    # 0.5*mean(over map) + 0.5*mean(under map); each map has n*dh*dw elements.
    return 0.5 * jnp.sum(partial_sums) / float(n * dh * dw)


# ----------------------------------------------------------------------------
# IntermediateHistogramLoss forward
# ----------------------------------------------------------------------------
class IntermediateHistogramLossPallas:
    def __init__(self, n_bins=8, downscale=16, window_size=5):
        self.n_bins = n_bins
        self.downscale = downscale
        self.exposure_threshold = 0.5
        self.window_size = window_size
        # get_hist_conv weight is identity-channel averaging (1/ds^2) by
        # construction -> the channel mix is folded into the pooling scale.
        w_full = make_hist_conv_weight(n_bins, downscale)
        expected = (np.eye(n_bins, dtype=np.float32)[:, :, None, None]
                    / float(downscale ** 2))
        assert np.allclose(w_full, expected)
        self.g1d = tuple(float(v) for v in make_gaussian_1d(window_size, 1.5))

    def __call__(self, img, gt, brighten, darken):
        bs, c, H, W = gt.shape
        ds = self.downscale
        nb = self.n_bins
        dh, dw = H // ds, W // ds
        n = bs * c * nb

        # One fused pallas_call for the three histogram shrinks.
        stacked = jnp.concatenate([gt, darken, brighten], axis=0)  # (3bs, c, H, W)
        shrink = hist_shrink_fused(stacked, nb, ds)                # (3bs, c, nb, dh, dw)
        gt_h = shrink[:bs].reshape(n, dh, dw)
        dark_h = shrink[bs:2 * bs].reshape(n, dh, dw)
        bright_h = shrink[2 * bs:].reshape(n, dh, dw)

        # F.interpolate(img, size=(dh, dw)) default 'nearest' == strided pick.
        down_x = img[:, :, ::ds, ::ds]
        over = (down_x > self.exposure_threshold).astype(jnp.float32)
        over_b = jnp.broadcast_to(over[:, :, None],
                                  (bs, c, nb, dh, dw)).reshape(n, dh, dw)

        # Masking (over / under = 1 - over) happens inside the SSIM kernel.
        return ssim_pair_loss_mean(gt_h, dark_h, bright_h, over_b,
                                   self.window_size, self.g1d)


if __name__ == "__main__":
    # small shapes: batch=2, channels=3, spatial=32, n_bins=8, downscale=4 -> down 8x8
    bs, c, H, W = 2, 3, 32, 32
    n_bins, downscale = 8, 4

    key = jax.random.PRNGKey(0)
    k1, k2, k3, k4 = jax.random.split(key, 4)
    img = jax.random.uniform(k1, (bs, c, H, W), jnp.float32)
    gt = jax.random.uniform(k2, (bs, c, H, W), jnp.float32)
    brighten = jax.random.uniform(k3, (bs, c, H, W), jnp.float32)
    darken = jax.random.uniform(k4, (bs, c, H, W), jnp.float32)

    loss_fn = IntermediateHistogramLossPallas(n_bins=n_bins, downscale=downscale)
    loss = jax.block_until_ready(loss_fn(img, gt, brighten, darken))
    assert jnp.isfinite(loss), loss
    print("KERNEL_OK")
</pallas_src>

<mosaic_0001>
module attributes {stable_mosaic.version = 11 : i64} {
  func.func @_hist_shrink_kernel(%arg0: i32, %arg1: memref<6x32x32xf32, #tpu.memory_space<vmem>>, %arg2: memref<6x64x8xf32, #tpu.memory_space<vmem>>) attributes {dimension_semantics = [#tpu.dimension_semantics<parallel>], iteration_bounds = array<i64: 3>, scalar_prefetch = 0 : i64, scratch_operands = 0 : i64, tpu.core_type = #tpu.core_type<tc>, window_params = [{transform_indices = @transform_0, window_bounds = array<i64: 6, 32, 32>}, {transform_indices = @transform_1, window_bounds = array<i64: 6, 64, 8>}]} {
    %0 = tpu.iota {dimensions = array<i32: 0>} : vector<32x8xi32>
    %1 = tpu.iota {dimensions = array<i32: 1>} : vector<32x8xi32>
    %c4_i32 = arith.constant 4 : i32
    %2 = vector.broadcast %c4_i32 : i32 to vector<32x8xi32>
    %3 = arith.muli %1, %2 : vector<32x8xi32>
    %4 = arith.cmpi sge, %0, %3 : vector<32x8xi32>
    %c4_i32_0 = arith.constant 4 : i32
    %5 = vector.broadcast %c4_i32_0 : i32 to vector<32x8xi32>
    %6 = arith.addi %3, %5 : vector<32x8xi32>
    %7 = arith.cmpi slt, %0, %6 : vector<32x8xi32>
    %8 = arith.andi %4, %7 : vector<32x8xi1>
    %9 = arith.extui %8 : vector<32x8xi1> to vector<32x8xi32>
    %10 = arith.sitofp %9 : vector<32x8xi32> to vector<32x8xf32>
    %11 = arith.truncf %10 : vector<32x8xf32> to vector<32x8xbf16>
    %12 = tpu.iota {dimensions = array<i32: 1>} : vector<8x32xi32>
    %13 = tpu.iota {dimensions = array<i32: 0>} : vector<8x32xi32>
    %c4_i32_1 = arith.constant 4 : i32
    %14 = vector.broadcast %c4_i32_1 : i32 to vector<8x32xi32>
    %15 = arith.muli %13, %14 : vector<8x32xi32>
    %16 = arith.cmpi sge, %12, %15 : vector<8x32xi32>
    %c4_i32_2 = arith.constant 4 : i32
    %17 = vector.broadcast %c4_i32_2 : i32 to vector<8x32xi32>
    %18 = arith.addi %15, %17 : vector<8x32xi32>
    %19 = arith.cmpi slt, %12, %18 : vector<8x32xi32>
    %20 = arith.andi %16, %19 : vector<8x32xi1>
    %21 = arith.extui %20 : vector<8x32xi1> to vector<8x32xi32>
    %22 = arith.sitofp %21 : vector<8x32xi32> to vector<8x32xf32>
    %23 = arith.truncf %22 : vector<8x32xf32> to vector<8x32xbf16>
    %c0 = arith.constant 0 : index
    %c0_3 = arith.constant 0 : index
    %c0_4 = arith.constant 0 : index
    %24 = vector.load %arg1[%c0, %c0_3, %c0_4] : memref<6x32x32xf32, #tpu.memory_space<vmem>>, vector<1x32x32xf32>
    %25 = vector.shape_cast %24 : vector<1x32x32xf32> to vector<32x32xf32>
    %cst = arith.constant 8.000000e+00 : f32
    %26 = vector.broadcast %cst : f32 to vector<32x32xf32>
    %27 = arith.mulf %25, %26 : vector<32x32xf32>
    %28 = math.floor %27 : vector<32x32xf32>
    %cst_5 = arith.constant 0.000000e+00 : f32
    %cst_6 = arith.constant 7.000000e+00 : f32
    %29 = vector.broadcast %cst_5 : f32 to vector<32x32xf32>
    %30 = arith.maximumf %29, %28 : vector<32x32xf32>
    %31 = vector.broadcast %cst_6 : f32 to vector<32x32xf32>
    %32 = arith.minimumf %31, %30 : vector<32x32xf32>
    %cst_7 = arith.constant 0.000000e+00 : f32
    %33 = vector.broadcast %cst_7 : f32 to vector<32x32xf32>
    %34 = arith.cmpf oeq, %32, %33 : vector<32x32xf32>
    %35 = arith.extui %34 : vector<32x32xi1> to vector<32x32xi32>
    %36 = arith.sitofp %35 : vector<32x32xi32> to vector<32x32xf32>
    %37 = arith.truncf %36 : vector<32x32xf32> to vector<32x32xbf16>
    %cst_8 = arith.constant 1.000000e+00 : f32
    %38 = vector.broadcast %cst_8 : f32 to vector<32x32xf32>
    %39 = arith.cmpf oeq, %32, %38 : vector<32x32xf32>
    %40 = arith.extui %39 : vector<32x32xi1> to vector<32x32xi32>
    %41 = arith.sitofp %40 : vector<32x32xi32> to vector<32x32xf32>
    %42 = arith.truncf %41 : vector<32x32xf32> to vector<32x32xbf16>
    %cst_9 = arith.constant 2.000000e+00 : f32
    %43 = vector.broadcast %cst_9 : f32 to vector<32x32xf32>
    %44 = arith.cmpf oeq, %32, %43 : vector<32x32xf32>
    %45 = arith.extui %44 : vector<32x32xi1> to vector<32x32xi32>
    %46 = arith.sitofp %45 : vector<32x32xi32> to vector<32x32xf32>
    %47 = arith.truncf %46 : vector<32x32xf32> to vector<32x32xbf16>
    %cst_10 = arith.constant 3.000000e+00 : f32
    %48 = vector.broadcast %cst_10 : f32 to vector<32x32xf32>
    %49 = arith.cmpf oeq, %32, %48 : vector<32x32xf32>
    %50 = arith.extui %49 : vector<32x32xi1> to vector<32x32xi32>
    %51 = arith.sitofp %50 : vector<32x32xi32> to vector<32x32xf32>
    %52 = arith.truncf %51 : vector<32x32xf32> to vector<32x32xbf16>
    %cst_11 = arith.constant 4.000000e+00 : f32
    %53 = vector.broadcast %cst_11 : f32 to vector<32x32xf32>
    %54 = arith.cmpf oeq, %32, %53 : vector<32x32xf32>
    %55 = arith.extui %54 : vector<32x32xi1> to vector<32x32xi32>
    %56 = arith.sitofp %55 : vector<32x32xi32> to vector<32x32xf32>
    %57 = arith.truncf %56 : vector<32x32xf32> to vector<32x32xbf16>
    %cst_12 = arith.constant 5.000000e+00 : f32
    %58 = vector.broadcast %cst_12 : f32 to vector<32x32xf32>
    %59 = arith.cmpf oeq, %32, %58 : vector<32x32xf32>
    %60 = arith.extui %59 : vector<32x32xi1> to vector<32x32xi32>
    %61 = arith.sitofp %60 : vector<32x32xi32> to vector<32x32xf32>
    %62 = arith.truncf %61 : vector<32x32xf32> to vector<32x32xbf16>
    %cst_13 = arith.constant 6.000000e+00 : f32
    %63 = vector.broadcast %cst_13 : f32 to vector<32x32xf32>
    %64 = arith.cmpf oeq, %32, %63 : vector<32x32xf32>
    %65 = arith.extui %64 : vector<32x32xi1> to vector<32x32xi32>
    %66 = arith.sitofp %65 : vector<32x32xi32> to vector<32x32xf32>
    %67 = arith.truncf %66 : vector<32x32xf32> to vector<32x32xbf16>
    %cst_14 = arith.constant 7.000000e+00 : f32
    %68 = vector.broadcast %cst_14 : f32 to vector<32x32xf32>
    %69 = arith.cmpf oeq, %32, %68 : vector<32x32xf32>
    %70 = arith.extui %69 : vector<32x32xi1> to vector<32x32xi32>
    %71 = arith.sitofp %70 : vector<32x32xi32> to vector<32x32xf32>
    %72 = arith.truncf %71 : vector<32x32xf32> to vector<32x32xbf16>
    %73 = tpu.concatenate %37, %42, %47, %52, %57, %62, %67, %72 in 0 : vector<32x32xbf16>, vector<32x32xbf16>, vector<32x32xbf16>, vector<32x32xbf16>, vector<32x32xbf16>, vector<32x32xbf16>, vector<32x32xbf16>, vector<32x32xbf16> -> vector<256x32xbf16>
    %cst_15 = arith.constant dense<0.000000e+00> : vector<256x8xf32>
    %74 = tpu.matmul %73, %11, %cst_15 {dimension_numbers = #tpu.dot_dimension_numbers<[1], [0], [0], [1], [0, 0, 1, 1], [], []>} : vector<256x32xbf16>, vector<32x8xbf16>, vector<256x8xf32> -> vector<256x8xf32>
    %75 = vector.extract_strided_slice %74 {offsets = [0, 0], sizes = [32, 8], strides = [1, 1]} : vector<256x8xf32> to vector<32x8xf32>
    %76 = arith.truncf %75 : vector<32x8xf32> to vector<32x8xbf16>
    %cst_16 = arith.constant dense<0.000000e+00> : vector<8x8xf32>
    %77 = tpu.matmul %23, %76, %cst_16 {dimension_numbers = #tpu.dot_dimension_numbers<[1], [0], [0], [1], [0, 0, 1, 1], [], []>} : vector<8x32xbf16>, vector<32x8xbf16>, vector<8x8xf32> -> vector<8x8xf32>
    %78 = vector.extract_strided_slice %74 {offsets = [32, 0], sizes = [32, 8], strides = [1, 1]} : vector<256x8xf32> to vector<32x8xf32>
    %79 = arith.truncf %78 : vector<32x8xf32> to vector<32x8xbf16>
    %cst_17 = arith.constant dense<0.000000e+00> : vector<8x8xf32>
    %80 = tpu.matmul %23, %79, %cst_17 {dimension_numbers = #tpu.dot_dimension_numbers<[1], [0], [0], [1], [0, 0, 1, 1], [], []>} : vector<8x32xbf16>, vector<32x8xbf16>, vector<8x8xf32> -> vector<8x8xf32>
    %81 = vector.extract_strided_slice %74 {offsets = [64, 0], sizes = [32, 8], strides = [1, 1]} : vector<256x8xf32> to vector<32x8xf32>
    %82 = arith.truncf %81 : vector<32x8xf32> to vector<32x8xbf16>
    %cst_18 = arith.constant dense<0.000000e+00> : vector<8x8xf32>
    %83 = tpu.matmul %23, %82, %cst_18 {dimension_numbers = #tpu.dot_dimension_numbers<[1], [0], [0], [1], [0, 0, 1, 1], [], []>} : vector<8x32xbf16>, vector<32x8xbf16>, vector<8x8xf32> -> vector<8x8xf32>
    %84 = vector.extract_strided_slice %74 {offsets = [96, 0], sizes = [32, 8], strides = [1, 1]} : vector<256x8xf32> to vector<32x8xf32>
    %85 = arith.truncf %84 : vector<32x8xf32> to vector<32x8xbf16>
    %cst_19 = arith.constant dense<0.000000e+00> : vector<8x8xf32>
    %86 = tpu.matmul %23, %85, %cst_19 {dimension_numbers = #tpu.dot_dimension_numbers<[1], [0], [0], [1], [0, 0, 1, 1], [], []>} : vector<8x32xbf16>, vector<32x8xbf16>, vector<8x8xf32> -> vector<8x8xf32>
    %87 = vector.extract_strided_slice %74 {offsets = [128, 0], sizes = [32, 8], strides = [1, 1]} : vector<256x8xf32> to vector<32x8xf32>
    %88 = arith.truncf %87 : vector<32x8xf32> to vector<32x8xbf16>
    %cst_20 = arith.constant dense<0.000000e+00> : vector<8x8xf32>
    %89 = tpu.matmul %23, %88, %cst_20 {dimension_numbers = #tpu.dot_dimension_numbers<[1], [0], [0], [1], [0, 0, 1, 1], [], []>} : vector<8x32xbf16>, vector<32x8xbf16>, vector<8x8xf32> -> vector<8x8xf32>
    %90 = vector.extract_strided_slice %74 {offsets = [160, 0], sizes = [32, 8], strides = [1, 1]} : vector<256x8xf32> to vector<32x8xf32>
    %91 = arith.truncf %90 : vector<32x8xf32> to vector<32x8xbf16>
    %cst_21 = arith.constant dense<0.000000e+00> : vector<8x8xf32>
    %92 = tpu.matmul %23, %91, %cst_21 {dimension_numbers = #tpu.dot_dimension_numbers<[1], [0], [0], [1], [0, 0, 1, 1], [], []>} : vector<8x32xbf16>, vector<32x8xbf16>, vector<8x8xf32> -> vector<8x8xf32>
    %93 = vector.extract_strided_slice %74 {offsets = [192, 0], sizes = [32, 8], strides = [1, 1]} : vector<256x8xf32> to vector<32x8xf32>
    %94 = arith.truncf %93 : vector<32x8xf32> to vector<32x8xbf16>
    %cst_22 = arith.constant dense<0.000000e+00> : vector<8x8xf32>
    %95 = tpu.matmul %23, %94, %cst_22 {dimension_numbers = #tpu.dot_dimension_numbers<[1], [0], [0], [1], [0, 0, 1, 1], [], []>} : vector<8x32xbf16>, vector<32x8xbf16>, vector<8x8xf32> -> vector<8x8xf32>
    %96 = vector.extract_strided_slice %74 {offsets = [224, 0], sizes = [32, 8], strides = [1, 1]} : vector<256x8xf32> to vector<32x8xf32>
    %97 = arith.truncf %96 : vector<32x8xf32> to vector<32x8xbf16>
    %cst_23 = arith.constant dense<0.000000e+00> : vector<8x8xf32>
    %98 = tpu.matmul %23, %97, %cst_23 {dimension_numbers = #tpu.dot_dimension_numbers<[1], [0], [0], [1], [0, 0, 1, 1], [], []>} : vector<8x32xbf16>, vector<32x8xbf16>, vector<8x8xf32> -> vector<8x8xf32>
    %99 = tpu.concatenate %77, %80, %83, %86, %89, %92, %95, %98 in 0 : vector<8x8xf32>, vector<8x8xf32>, vector<8x8xf32>, vector<8x8xf32>, vector<8x8xf32>, vector<8x8xf32>, vector<8x8xf32>, vector<8x8xf32> -> vector<64x8xf32>
    %cst_24 = arith.constant 6.250000e-02 : f32
    %100 = vector.broadcast %cst_24 : f32 to vector<64x8xf32>
    %101 = arith.mulf %99, %100 : vector<64x8xf32>
    %c0_25 = arith.constant 0 : index
    %c0_26 = arith.constant 0 : index
    %c0_27 = arith.constant 0 : index
    %102 = vector.load %arg2[%c0_25, %c0_26, %c0_27] : memref<6x64x8xf32, #tpu.memory_space<vmem>>, vector<1x64x8xf32>
    %103 = vector.shape_cast %102 : vector<1x64x8xf32> to vector<64x8xf32>
    %104 = vector.shape_cast %101 : vector<64x8xf32> to vector<1x64x8xf32>
    tpu.vector_store %arg2[%c0_25, %c0_26, %c0_27], %104 {strides = array<i32>} : memref<6x64x8xf32, #tpu.memory_space<vmem>>, vector<1x64x8xf32>,
    %c1 = arith.constant 1 : index
    %c0_28 = arith.constant 0 : index
    %c0_29 = arith.constant 0 : index
    %105 = vector.load %arg1[%c1, %c0_28, %c0_29] : memref<6x32x32xf32, #tpu.memory_space<vmem>>, vector<1x32x32xf32>
    %106 = vector.shape_cast %105 : vector<1x32x32xf32> to vector<32x32xf32>
    %cst_30 = arith.constant 8.000000e+00 : f32
    %107 = vector.broadcast %cst_30 : f32 to vector<32x32xf32>
    %108 = arith.mulf %106, %107 : vector<32x32xf32>
    %109 = math.floor %108 : vector<32x32xf32>
    %cst_31 = arith.constant 0.000000e+00 : f32
    %cst_32 = arith.constant 7.000000e+00 : f32
    %110 = vector.broadcast %cst_31 : f32 to vector<32x32xf32>
    %111 = arith.maximumf %110, %109 : vector<32x32xf32>
    %112 = vector.broadcast %cst_32 : f32 to vector<32x32xf32>
    %113 = arith.minimumf %112, %111 : vector<32x32xf32>
    %cst_33 = arith.constant 0.000000e+00 : f32
    %114 = vector.broadcast %cst_33 : f32 to vector<32x32xf32>
    %115 = arith.cmpf oeq, %113, %114 : vector<32x32xf32>
    %116 = arith.extui %115 : vector<32x32xi1> to vector<32x32xi32>
    %117 = arith.sitofp %116 : vector<32x32xi32> to vector<32x32xf32>
    %118 = arith.truncf %117 : vector<32x32xf32> to vector<32x32xbf16>
    %cst_34 = arith.constant 1.000000e+00 : f32
    %119 = vector.broadcast %cst_34 : f32 to vector<32x32xf32>
    %120 = arith.cmpf oeq, %113, %119 : vector<32x32xf32>
    %121 = arith.extui %120 : vector<32x32xi1> to vector<32x32xi32>
    %122 = arith.sitofp %121 : vector<32x32xi32> to vector<32x32xf32>
    %123 = arith.truncf %122 : vector<32x32xf32> to vector<32x32xbf16>
    %cst_35 = arith.constant 2.000000e+00 : f32
    %124 = vector.broadcast %cst_35 : f32 to vector<32x32xf32>
    %125 = arith.cmpf oeq, %113, %124 : vector<32x32xf32>
    %126 = arith.extui %125 : vector<32x32xi1> to vector<32x32xi32>
    %127 = arith.sitofp %126 : vector<32x32xi32> to vector<32x32xf32>
    %128 = arith.truncf %127 : vector<32x32xf32> to vector<32x32xbf16>
    %cst_36 = arith.constant 3.000000e+00 : f32
    %129 = vector.broadcast %cst_36 : f32 to vector<32x32xf32>
    %130 = arith.cmpf oeq, %113, %129 : vector<32x32xf32>
    %131 = arith.extui %130 : vector<32x32xi1> to vector<32x32xi32>
    %132 = arith.sitofp %131 : vector<32x32xi32> to vector<32x32xf32>
    %133 = arith.truncf %132 : vector<32x32xf32> to vector<32x32xbf16>
    %cst_37 = arith.constant 4.000000e+00 : f32
    %134 = vector.broadcast %cst_37 : f32 to vector<32x32xf32>
    %135 = arith.cmpf oeq, %113, %134 : vector<32x32xf32>
    %136 = arith.extui %135 : vector<32x32xi1> to vector<32x32xi32>
    %137 = arith.sitofp %136 : vector<32x32xi32> to vector<32x32xf32>
    %138 = arith.truncf %137 : vector<32x32xf32> to vector<32x32xbf16>
    %cst_38 = arith.constant 5.000000e+00 : f32
    %139 = vector.broadcast %cst_38 : f32 to vector<32x32xf32>
    %140 = arith.cmpf oeq, %113, %139 : vector<32x32xf32>
    %141 = arith.extui %140 : vector<32x32xi1> to vector<32x32xi32>
    %142 = arith.sitofp %141 : vector<32x32xi32> to vector<32x32xf32>
    %143 = arith.truncf %142 : vector<32x32xf32> to vector<32x32xbf16>
    %cst_39 = arith.constant 6.000000e+00 : f32
    %144 = vector.broadcast %cst_39 : f32 to vector<32x32xf32>
    %145 = arith.cmpf oeq, %113, %144 : vector<32x32xf32>
    %146 = arith.extui %145 : vector<32x32xi1> to vector<32x32xi32>
    %147 = arith.sitofp %146 : vector<32x32xi32> to vector<32x32xf32>
    %148 = arith.truncf %147 : vector<32x32xf32> to vector<32x32xbf16>
    %cst_40 = arith.constant 7.000000e+00 : f32
    %149 = vector.broadcast %cst_40 : f32 to vector<32x32xf32>
    %150 = arith.cmpf oeq, %113, %149 : vector<32x32xf32>
    %151 = arith.extui %150 : vector<32x32xi1> to vector<32x32xi32>
    %152 = arith.sitofp %151 : vector<32x32xi32> to vector<32x32xf32>
    %153 = arith.truncf %152 : vector<32x32xf32> to vector<32x32xbf16>
    %154 = tpu.concatenate %118, %123, %128, %133, %138, %143, %148, %153 in 0 : vector<32x32xbf16>, vector<32x32xbf16>, vector<32x32xbf16>, vector<32x32xbf16>, vector<32x32xbf16>, vector<32x32xbf16>, vector<32x32xbf16>, vector<32x32xbf16> -> vector<256x32xbf16>
    %cst_41 = arith.constant dense<0.000000e+00> : vector<256x8xf32>
    %155 = tpu.matmul %154, %11, %cst_41 {dimension_numbers = #tpu.dot_dimension_numbers<[1], [0], [0], [1], [0, 0, 1, 1], [], []>} : vector<256x32xbf16>, vector<32x8xbf16>, vector<256x8xf32> -> vector<256x8xf32>
    %156 = vector.extract_strided_slice %155 {offsets = [0, 0], sizes = [32, 8], strides = [1, 1]} : vector<256x8xf32> to vector<32x8xf32>
    %157 = arith.truncf %156 : vector<32x8xf32> to vector<32x8xbf16>
    %cst_42 = arith.constant dense<0.000000e+00> : vector<8x8xf32>
    %158 = tpu.matmul %23, %157, %cst_42 {dimension_numbers = #tpu.dot_dimension_numbers<[1], [0], [0], [1], [0, 0, 1, 1], [], []>} : vector<8x32xbf16>, vector<32x8xbf16>, vector<8x8xf32> -> vector<8x8xf32>
    %159 = vector.extract_strided_slice %155 {offsets = [32, 0], sizes = [32, 8], strides = [1, 1]} : vector<256x8xf32> to vector<32x8xf32>
    %160 = arith.truncf %159 : vector<32x8xf32> to vector<32x8xbf16>
    %cst_43 = arith.constant dense<0.000000e+00> : vector<8x8xf32>
    %161 = tpu.matmul %23, %160, %cst_43 {dimension_numbers = #tpu.dot_dimension_numbers<[1], [0], [0], [1], [0, 0, 1, 1], [], []>} : vector<8x32xbf16>, vector<32x8xbf16>, vector<8x8xf32> -> vector<8x8xf32>
    %162 = vector.extract_strided_slice %155 {offsets = [64, 0], sizes = [32, 8], strides = [1, 1]} : vector<256x8xf32> to vector<32x8xf32>
    %163 = arith.truncf %162 : vector<32x8xf32> to vector<32x8xbf16>
    %cst_44 = arith.constant dense<0.000000e+00> : vector<8x8xf32>
    %164 = tpu.matmul %23, %163, %cst_44 {dimension_numbers = #tpu.dot_dimension_numbers<[1], [0], [0], [1], [0, 0, 1, 1], [], []>} : vector<8x32xbf16>, vector<32x8xbf16>, vector<8x8xf32> -> vector<8x8xf32>
    %165 = vector.extract_strided_slice %155 {offsets = [96, 0], sizes = [32, 8], strides = [1, 1]} : vector<256x8xf32> to vector<32x8xf32>
    %166 = arith.truncf %165 : vector<32x8xf32> to vector<32x8xbf16>
    %cst_45 = arith.constant dense<0.000000e+00> : vector<8x8xf32>
    %167 = tpu.matmul %23, %166, %cst_45 {dimension_numbers = #tpu.dot_dimension_numbers<[1], [0], [0], [1], [0, 0, 1, 1], [], []>} : vector<8x32xbf16>, vector<32x8xbf16>, vector<8x8xf32> -> vector<8x8xf32>
    %168 = vector.extract_strided_slice %155 {offsets = [128, 0], sizes = [32, 8], strides = [1, 1]} : vector<256x8xf32> to vector<32x8xf32>
    %169 = arith.truncf %168 : vector<32x8xf32> to vector<32x8xbf16>
    %cst_46 = arith.constant dense<0.000000e+00> : vector<8x8xf32>
    %170 = tpu.matmul %23, %169, %cst_46 {dimension_numbers = #tpu.dot_dimension_numbers<[1], [0], [0], [1], [0, 0, 1, 1], [], []>} : vector<8x32xbf16>, vector<32x8xbf16>, vector<8x8xf32> -> vector<8x8xf32>
    %171 = vector.extract_strided_slice %155 {offsets = [160, 0], sizes = [32, 8], strides = [1, 1]} : vector<256x8xf32> to vector<32x8xf32>
    %172 = arith.truncf %171 : vector<32x8xf32> to vector<32x8xbf16>
    %cst_47 = arith.constant dense<0.000000e+00> : vector<8x8xf32>
    %173 = tpu.matmul %23, %172, %cst_47 {dimension_numbers = #tpu.dot_dimension_numbers<[1], [0], [0], [1], [0, 0, 1, 1], [], []>} : vector<8x32xbf16>, vector<32x8xbf16>, vector<8x8xf32> -> vector<8x8xf32>
    %174 = vector.extract_strided_slice %155 {offsets = [192, 0], sizes = [32, 8], strides = [1, 1]} : vector<256x8xf32> to vector<32x8xf32>
    %175 = arith.truncf %174 : vector<32x8xf32> to vector<32x8xbf16>
    %cst_48 = arith.constant dense<0.000000e+00> : vector<8x8xf32>
    %176 = tpu.matmul %23, %175, %cst_48 {dimension_numbers = #tpu.dot_dimension_numbers<[1], [0], [0], [1], [0, 0, 1, 1], [], []>} : vector<8x32xbf16>, vector<32x8xbf16>, vector<8x8xf32> -> vector<8x8xf32>
    %177 = vector.extract_strided_slice %155 {offsets = [224, 0], sizes = [32, 8], strides = [1, 1]} : vector<256x8xf32> to vector<32x8xf32>
    %178 = arith.truncf %177 : vector<32x8xf32> to vector<32x8xbf16>
    %cst_49 = arith.constant dense<0.000000e+00> : vector<8x8xf32>
    %179 = tpu.matmul %23, %178, %cst_49 {dimension_numbers = #tpu.dot_dimension_numbers<[1], [0], [0], [1], [0, 0, 1, 1], [], []>} : vector<8x32xbf16>, vector<32x8xbf16>, vector<8x8xf32> -> vector<8x8xf32>
    %180 = tpu.concatenate %158, %161, %164, %167, %170, %173, %176, %179 in 0 : vector<8x8xf32>, vector<8x8xf32>, vector<8x8xf32>, vector<8x8xf32>, vector<8x8xf32>, vector<8x8xf32>, vector<8x8xf32>, vector<8x8xf32> -> vector<64x8xf32>
    %cst_50 = arith.constant 6.250000e-02 : f32
    %181 = vector.broadcast %cst_50 : f32 to vector<64x8xf32>
    %182 = arith.mulf %180, %181 : vector<64x8xf32>
    %c1_51 = arith.constant 1 : index
    %c0_52 = arith.constant 0 : index
    %c0_53 = arith.constant 0 : index
    %183 = vector.load %arg2[%c1_51, %c0_52, %c0_53] : memref<6x64x8xf32, #tpu.memory_space<vmem>>, vector<1x64x8xf32>
    %184 = vector.shape_cast %183 : vector<1x64x8xf32> to vector<64x8xf32>
    %185 = vector.shape_cast %182 : vector<64x8xf32> to vector<1x64x8xf32>
    tpu.vector_store %arg2[%c1_51, %c0_52, %c0_53], %185 {strides = array<i32>} : memref<6x64x8xf32, #tpu.memory_space<vmem>>, vector<1x64x8xf32>,
    %c2 = arith.constant 2 : index
    %c0_54 = arith.constant 0 : index
    %c0_55 = arith.constant 0 : index
    %186 = vector.load %arg1[%c2, %c0_54, %c0_55] : memref<6x32x32xf32, #tpu.memory_space<vmem>>, vector<1x32x32xf32>
    %187 = vector.shape_cast %186 : vector<1x32x32xf32> to vector<32x32xf32>
    %cst_56 = arith.constant 8.000000e+00 : f32
    %188 = vector.broadcast %cst_56 : f32 to vector<32x32xf32>
    %189 = arith.mulf %187, %188 : vector<32x32xf32>
    %190 = math.floor %189 : vector<32x32xf32>
    %cst_57 = arith.constant 0.000000e+00 : f32
    %cst_58 = arith.constant 7.000000e+00 : f32
    %191 = vector.broadcast %cst_57 : f32 to vector<32x32xf32>
    %192 = arith.maximumf %191, %190 : vector<32x32xf32>
    %193 = vector.broadcast %cst_58 : f32 to vector<32x32xf32>
    %194 = arith.minimumf %193, %192 : vector<32x32xf32>
    %cst_59 = arith.constant 0.000000e+00 : f32
    %195 = vector.broadcast %cst_59 : f32 to vector<32x32xf32>
    %196 = arith.cmpf oeq, %194, %195 : vector<32x32xf32>
    %197 = arith.extui %196 : vector<32x32xi1> to vector<32x32xi32>
    %198 = arith.sitofp %197 : vector<32x32xi32> to vector<32x32xf32>
    %199 = arith.truncf %198 : vector<32x32xf32> to vector<32x32xbf16>
    %cst_60 = arith.constant 1.000000e+00 : f32
    %200 = vector.broadcast %cst_60 : f32 to vector<32x32xf32>
    %201 = arith.cmpf oeq, %194, %200 : vector<32x32xf32>
    %202 = arith.extui %201 : vector<32x32xi1> to vector<32x32xi32>
    %203 = arith.sitofp %202 : vector<32x32xi32> to vector<32x32xf32>
    %204 = arith.truncf %203 : vector<32x32xf32> to vector<32x32xbf16>
    %cst_61 = arith.constant 2.000000e+00 : f32
    %205 = vector.broadcast %cst_61 : f32 to vector<32x32xf32>
    %206 = arith.cmpf oeq, %194, %205 : vector<32x32xf32>
    %207 = arith.extui %206 : vector<32x32xi1> to vector<32x32xi32>
    %208 = arith.sitofp %207 : vector<32x32xi32> to vector<32x32xf32>
    %209 = arith.truncf %208 : vector<32x32xf32> to vector<32x32xbf16>
    %cst_62 = arith.constant 3.000000e+00 : f32
    %210 = vector.broadcast %cst_62 : f32 to vector<32x32xf32>
    %211 = arith.cmpf oeq, %194, %210 : vector<32x32xf32>
    %212 = arith.extui %211 : vector<32x32xi1> to vector<32x32xi32>
    %213 = arith.sitofp %212 : vector<32x32xi32> to vector<32x32xf32>
    %214 = arith.truncf %213 : vector<32x32xf32> to vector<32x32xbf16>
    %cst_63 = arith.constant 4.000000e+00 : f32
    %215 = vector.broadcast %cst_63 : f32 to vector<32x32xf32>
    %216 = arith.cmpf oeq, %194, %215 : vector<32x32xf32>
    %217 = arith.extui %216 : vector<32x32xi1> to vector<32x32xi32>
    %218 = arith.sitofp %217 : vector<32x32xi32> to vector<32x32xf32>
    %219 = arith.truncf %218 : vector<32x32xf32> to vector<32x32xbf16>
    %cst_64 = arith.constant 5.000000e+00 : f32
    %220 = vector.broadcast %cst_64 : f32 to vector<32x32xf32>
    %221 = arith.cmpf oeq, %194, %220 : vector<32x32xf32>
    %222 = arith.extui %221 : vector<32x32xi1> to vector<32x32xi32>
    %223 = arith.sitofp %222 : vector<32x32xi32> to vector<32x32xf32>
    %224 = arith.truncf %223 : vector<32x32xf32> to vector<32x32xbf16>
    %cst_65 = arith.constant 6.000000e+00 : f32
    %225 = vector.broadcast %cst_65 : f32 to vector<32x32xf32>
    %226 = arith.cmpf oeq, %194, %225 : vector<32x32xf32>
    %227 = arith.extui %226 : vector<32x32xi1> to vector<32x32xi32>
    %228 = arith.sitofp %227 : vector<32x32xi32> to vector<32x32xf32>
    %229 = arith.truncf %228 : vector<32x32xf32> to vector<32x32xbf16>
    %cst_66 = arith.constant 7.000000e+00 : f32
    %230 = vector.broadcast %cst_66 : f32 to vector<32x32xf32>
    %231 = arith.cmpf oeq, %194, %230 : vector<32x32xf32>
    %232 = arith.extui %231 : vector<32x32xi1> to vector<32x32xi32>
    %233 = arith.sitofp %232 : vector<32x32xi32> to vector<32x32xf32>
    %234 = arith.truncf %233 : vector<32x32xf32> to vector<32x32xbf16>
    %235 = tpu.concatenate %199, %204, %209, %214, %219, %224, %229, %234 in 0 : vector<32x32xbf16>, vector<32x32xbf16>, vector<32x32xbf16>, vector<32x32xbf16>, vector<32x32xbf16>, vector<32x32xbf16>, vector<32x32xbf16>, vector<32x32xbf16> -> vector<256x32xbf16>
    %cst_67 = arith.constant dense<0.000000e+00> : vector<256x8xf32>
    %236 = tpu.matmul %235, %11, %cst_67 {dimension_numbers = #tpu.dot_dimension_numbers<[1], [0], [0], [1], [0, 0, 1, 1], [], []>} : vector<256x32xbf16>, vector<32x8xbf16>, vector<256x8xf32> -> vector<256x8xf32>
    %237 = vector.extract_strided_slice %236 {offsets = [0, 0], sizes = [32, 8], strides = [1, 1]} : vector<256x8xf32> to vector<32x8xf32>
    %238 = arith.truncf %237 : vector<32x8xf32> to vector<32x8xbf16>
    %cst_68 = arith.constant dense<0.000000e+00> : vector<8x8xf32>
    %239 = tpu.matmul %23, %238, %cst_68 {dimension_numbers = #tpu.dot_dimension_numbers<[1], [0], [0], [1], [0, 0, 1, 1], [], []>} : vector<8x32xbf16>, vector<32x8xbf16>, vector<8x8xf32> -> vector<8x8xf32>
    %240 = vector.extract_strided_slice %236 {offsets = [32, 0], sizes = [32, 8], strides = [1, 1]} : vector<256x8xf32> to vector<32x8xf32>
    %241 = arith.truncf %240 : vector<32x8xf32> to vector<32x8xbf16>
    %cst_69 = arith.constant dense<0.000000e+00> : vector<8x8xf32>
    %242 = tpu.matmul %23, %241, %cst_69 {dimension_numbers = #tpu.dot_dimension_numbers<[1], [0], [0], [1], [0, 0, 1, 1], [], []>} : vector<8x32xbf16>, vector<32x8xbf16>, vector<8x8xf32> -> vector<8x8xf32>
    %243 = vector.extract_strided_slice %236 {offsets = [64, 0], sizes = [32, 8], strides = [1, 1]} : vector<256x8xf32> to vector<32x8xf32>
    %244 = arith.truncf %243 : vector<32x8xf32> to vector<32x8xbf16>
    %cst_70 = arith.constant dense<0.000000e+00> : vector<8x8xf32>
    %245 = tpu.matmul %23, %244, %cst_70 {dimension_numbers = #tpu.dot_dimension_numbers<[1], [0], [0], [1], [0, 0, 1, 1], [], []>} : vector<8x32xbf16>, vector<32x8xbf16>, vector<8x8xf32> -> vector<8x8xf32>
    %246 = vector.extract_strided_slice %236 {offsets = [96, 0], sizes = [32, 8], strides = [1, 1]} : vector<256x8xf32> to vector<32x8xf32>
    %247 = arith.truncf %246 : vector<32x8xf32> to vector<32x8xbf16>
    %cst_71 = arith.constant dense<0.000000e+00> : vector<8x8xf32>
    %248 = tpu.matmul %23, %247, %cst_71 {dimension_numbers = #tpu.dot_dimension_numbers<[1], [0], [0], [1], [0, 0, 1, 1], [], []>} : vector<8x32xbf16>, vector<32x8xbf16>, vector<8x8xf32> -> vector<8x8xf32>
    %249 = vector.extract_strided_slice %236 {offsets = [128, 0], sizes = [32, 8], strides = [1, 1]} : vector<256x8xf32> to vector<32x8xf32>
    %250 = arith.truncf %249 : vector<32x8xf32> to vector<32x8xbf16>
    %cst_72 = arith.constant dense<0.000000e+00> : vector<8x8xf32>
    %251 = tpu.matmul %23, %250, %cst_72 {dimension_numbers = #tpu.dot_dimension_numbers<[1], [0], [0], [1], [0, 0, 1, 1], [], []>} : vector<8x32xbf16>, vector<32x8xbf16>, vector<8x8xf32> -> vector<8x8xf32>
    %252 = vector.extract_strided_slice %236 {offsets = [160, 0], sizes = [32, 8], strides = [1, 1]} : vector<256x8xf32> to vector<32x8xf32>
    %253 = arith.truncf %252 : vector<32x8xf32> to vector<32x8xbf16>
    %cst_73 = arith.constant dense<0.000000e+00> : vector<8x8xf32>
    %254 = tpu.matmul %23, %253, %cst_73 {dimension_numbers = #tpu.dot_dimension_numbers<[1], [0], [0], [1], [0, 0, 1, 1], [], []>} : vector<8x32xbf16>, vector<32x8xbf16>, vector<8x8xf32> -> vector<8x8xf32>
    %255 = vector.extract_strided_slice %236 {offsets = [192, 0], sizes = [32, 8], strides = [1, 1]} : vector<256x8xf32> to vector<32x8xf32>
    %256 = arith.truncf %255 : vector<32x8xf32> to vector<32x8xbf16>
    %cst_74 = arith.constant dense<0.000000e+00> : vector<8x8xf32>
    %257 = tpu.matmul %23, %256, %cst_74 {dimension_numbers = #tpu.dot_dimension_numbers<[1], [0], [0], [1], [0, 0, 1, 1], [], []>} : vector<8x32xbf16>, vector<32x8xbf16>, vector<8x8xf32> -> vector<8x8xf32>
    %258 = vector.extract_strided_slice %236 {offsets = [224, 0], sizes = [32, 8], strides = [1, 1]} : vector<256x8xf32> to vector<32x8xf32>
    %259 = arith.truncf %258 : vector<32x8xf32> to vector<32x8xbf16>
    %cst_75 = arith.constant dense<0.000000e+00> : vector<8x8xf32>
    %260 = tpu.matmul %23, %259, %cst_75 {dimension_numbers = #tpu.dot_dimension_numbers<[1], [0], [0], [1], [0, 0, 1, 1], [], []>} : vector<8x32xbf16>, vector<32x8xbf16>, vector<8x8xf32> -> vector<8x8xf32>
    %261 = tpu.concatenate %239, %242, %245, %248, %251, %254, %257, %260 in 0 : vector<8x8xf32>, vector<8x8xf32>, vector<8x8xf32>, vector<8x8xf32>, vector<8x8xf32>, vector<8x8xf32>, vector<8x8xf32>, vector<8x8xf32> -> vector<64x8xf32>
    %cst_76 = arith.constant 6.250000e-02 : f32
    %262 = vector.broadcast %cst_76 : f32 to vector<64x8xf32>
    %263 = arith.mulf %261, %262 : vector<64x8xf32>
    %c2_77 = arith.constant 2 : index
    %c0_78 = arith.constant 0 : index
    %c0_79 = arith.constant 0 : index
    %264 = vector.load %arg2[%c2_77, %c0_78, %c0_79] : memref<6x64x8xf32, #tpu.memory_space<vmem>>, vector<1x64x8xf32>
    %265 = vector.shape_cast %264 : vector<1x64x8xf32> to vector<64x8xf32>
    %266 = vector.shape_cast %263 : vector<64x8xf32> to vector<1x64x8xf32>
    tpu.vector_store %arg2[%c2_77, %c0_78, %c0_79], %266 {strides = array<i32>} : memref<6x64x8xf32, #tpu.memory_space<vmem>>, vector<1x64x8xf32>,
    %c3 = arith.constant 3 : index
    %c0_80 = arith.constant 0 : index
    %c0_81 = arith.constant 0 : index
    %267 = vector.load %arg1[%c3, %c0_80, %c0_81] : memref<6x32x32xf32, #tpu.memory_space<vmem>>, vector<1x32x32xf32>
    %268 = vector.shape_cast %267 : vector<1x32x32xf32> to vector<32x32xf32>
    %cst_82 = arith.constant 8.000000e+00 : f32
    %269 = vector.broadcast %cst_82 : f32 to vector<32x32xf32>
    %270 = arith.mulf %268, %269 : vector<32x32xf32>
    %271 = math.floor %270 : vector<32x32xf32>
    %cst_83 = arith.constant 0.000000e+00 : f32
    %cst_84 = arith.constant 7.000000e+00 : f32
    %272 = vector.broadcast %cst_83 : f32 to vector<32x32xf32>
    %273 = arith.maximumf %272, %271 : vector<32x32xf32>
    %274 = vector.broadcast %cst_84 : f32 to vector<32x32xf32>
    %275 = arith.minimumf %274, %273 : vector<32x32xf32>
    %cst_85 = arith.constant 0.000000e+00 : f32
    %276 = vector.broadcast %cst_85 : f32 to vector<32x32xf32>
    %277 = arith.cmpf oeq, %275, %276 : vector<32x32xf32>
    %278 = arith.extui %277 : vector<32x32xi1> to vector<32x32xi32>
    %279 = arith.sitofp %278 : vector<32x32xi32> to vector<32x32xf32>
    %280 = arith.truncf %279 : vector<32x32xf32> to vector<32x32xbf16>
    %cst_86 = arith.constant 1.000000e+00 : f32
    %281 = vector.broadcast %cst_86 : f32 to vector<32x32xf32>
    %282 = arith.cmpf oeq, %275, %281 : vector<32x32xf32>
    %283 = arith.extui %282 : vector<32x32xi1> to vector<32x32xi32>
    %284 = arith.sitofp %283 : vector<32x32xi32> to vector<32x32xf32>
    %285 = arith.truncf %284 : vector<32x32xf32> to vector<32x32xbf16>
    %cst_87 = arith.constant 2.000000e+00 : f32
    %286 = vector.broadcast %cst_87 : f32 to vector<32x32xf32>
    %287 = arith.cmpf oeq, %275, %286 : vector<32x32xf32>
    %288 = arith.extui %287 : vector<32x32xi1> to vector<32x32xi32>
    %289 = arith.sitofp %288 : vector<32x32xi32> to vector<32x32xf32>
    %290 = arith.truncf %289 : vector<32x32xf32> to vector<32x32xbf16>
    %cst_88 = arith.constant 3.000000e+00 : f32
    %291 = vector.broadcast %cst_88 : f32 to vector<32x32xf32>
    %292 = arith.cmpf oeq, %275, %291 : vector<32x32xf32>
    %293 = arith.extui %292 : vector<32x32xi1> to vector<32x32xi32>
    %294 = arith.sitofp %293 : vector<32x32xi32> to vector<32x32xf32>
    %295 = arith.truncf %294 : vector<32x32xf32> to vector<32x32xbf16>
    %cst_89 = arith.constant 4.000000e+00 : f32
    %296 = vector.broadcast %cst_89 : f32 to vector<32x32xf32>
    %297 = arith.cmpf oeq, %275, %296 : vector<32x32xf32>
    %298 = arith.extui %297 : vector<32x32xi1> to vector<32x32xi32>
    %299 = arith.sitofp %298 : vector<32x32xi32> to vector<32x32xf32>
    %300 = arith.truncf %299 : vector<32x32xf32> to vector<32x32xbf16>
    %cst_90 = arith.constant 5.000000e+00 : f32
    %301 = vector.broadcast %cst_90 : f32 to vector<32x32xf32>
    %302 = arith.cmpf oeq, %275, %301 : vector<32x32xf32>
    %303 = arith.extui %302 : vector<32x32xi1> to vector<32x32xi32>
    %304 = arith.sitofp %303 : vector<32x32xi32> to vector<32x32xf32>
    %305 = arith.truncf %304 : vector<32x32xf32> to vector<32x32xbf16>
    %cst_91 = arith.constant 6.000000e+00 : f32
    %306 = vector.broadcast %cst_91 : f32 to vector<32x32xf32>
    %307 = arith.cmpf oeq, %275, %306 : vector<32x32xf32>
    %308 = arith.extui %307 : vector<32x32xi1> to vector<32x32xi32>
    %309 = arith.sitofp %308 : vector<32x32xi32> to vector<32x32xf32>
    %310 = arith.truncf %309 : vector<32x32xf32> to vector<32x32xbf16>
    %cst_92 = arith.constant 7.000000e+00 : f32
    %311 = vector.broadcast %cst_92 : f32 to vector<32x32xf32>
    %312 = arith.cmpf oeq, %275, %311 : vector<32x32xf32>
    %313 = arith.extui %312 : vector<32x32xi1> to vector<32x32xi32>
    %314 = arith.sitofp %313 : vector<32x32xi32> to vector<32x32xf32>
    %315 = arith.truncf %314 : vector<32x32xf32> to vector<32x32xbf16>
    %316 = tpu.concatenate %280, %285, %290, %295, %300, %305, %310, %315 in 0 : vector<32x32xbf16>, vector<32x32xbf16>, vector<32x32xbf16>, vector<32x32xbf16>, vector<32x32xbf16>, vector<32x32xbf16>, vector<32x32xbf16>, vector<32x32xbf16> -> vector<256x32xbf16>
    %cst_93 = arith.constant dense<0.000000e+00> : vector<256x8xf32>
    %317 = tpu.matmul %316, %11, %cst_93 {dimension_numbers = #tpu.dot_dimension_numbers<[1], [0], [0], [1], [0, 0, 1, 1], [], []>} : vector<256x32xbf16>, vector<32x8xbf16>, vector<256x8xf32> -> vector<256x8xf32>
    %318 = vector.extract_strided_slice %317 {offsets = [0, 0], sizes = [32, 8], strides = [1, 1]} : vector<256x8xf32> to vector<32x8xf32>
    %319 = arith.truncf %318 : vector<32x8xf32> to vector<32x8xbf16>
    %cst_94 = arith.constant dense<0.000000e+00> : vector<8x8xf32>
    %320 = tpu.matmul %23, %319, %cst_94 {dimension_numbers = #tpu.dot_dimension_numbers<[1], [0], [0], [1], [0, 0, 1, 1], [], []>} : vector<8x32xbf16>, vector<32x8xbf16>, vector<8x8xf32> -> vector<8x8xf32>
    %321 = vector.extract_strided_slice %317 {offsets = [32, 0], sizes = [32, 8], strides = [1, 1]} : vector<256x8xf32> to vector<32x8xf32>
    %322 = arith.truncf %321 : vector<32x8xf32> to vector<32x8xbf16>
    %cst_95 = arith.constant dense<0.000000e+00> : vector<8x8xf32>
    %323 = tpu.matmul %23, %322, %cst_95 {dimension_numbers = #tpu.dot_dimension_numbers<[1], [0], [0], [1], [0, 0, 1, 1], [], []>} : vector<8x32xbf16>, vector<32x8xbf16>, vector<8x8xf32> -> vector<8x8xf32>
    %324 = vector.extract_strided_slice %317 {offsets = [64, 0], sizes = [32, 8], strides = [1, 1]} : vector<256x8xf32> to vector<32x8xf32>
    %325 = arith.truncf %324 : vector<32x8xf32> to vector<32x8xbf16>
    %cst_96 = arith.constant dense<0.000000e+00> : vector<8x8xf32>
    %326 = tpu.matmul %23, %325, %cst_96 {dimension_numbers = #tpu.dot_dimension_numbers<[1], [0], [0], [1], [0, 0, 1, 1], [], []>} : vector<8x32xbf16>, vector<32x8xbf16>, vector<8x8xf32> -> vector<8x8xf32>
    %327 = vector.extract_strided_slice %317 {offsets = [96, 0], sizes = [32, 8], strides = [1, 1]} : vector<256x8xf32> to vector<32x8xf32>
    %328 = arith.truncf %327 : vector<32x8xf32> to vector<32x8xbf16>
    %cst_97 = arith.constant dense<0.000000e+00> : vector<8x8xf32>
    %329 = tpu.matmul %23, %328, %cst_97 {dimension_numbers = #tpu.dot_dimension_numbers<[1], [0], [0], [1], [0, 0, 1, 1], [], []>} : vector<8x32xbf16>, vector<32x8xbf16>, vector<8x8xf32> -> vector<8x8xf32>
    %330 = vector.extract_strided_slice %317 {offsets = [128, 0], sizes = [32, 8], strides = [1, 1]} : vector<256x8xf32> to vector<32x8xf32>
    %331 = arith.truncf %330 : vector<32x8xf32> to vector<32x8xbf16>
    %cst_98 = arith.constant dense<0.000000e+00> : vector<8x8xf32>
    %332 = tpu.matmul %23, %331, %cst_98 {dimension_numbers = #tpu.dot_dimension_numbers<[1], [0], [0], [1], [0, 0, 1, 1], [], []>} : vector<8x32xbf16>, vector<32x8xbf16>, vector<8x8xf32> -> vector<8x8xf32>
    %333 = vector.extract_strided_slice %317 {offsets = [160, 0], sizes = [32, 8], strides = [1, 1]} : vector<256x8xf32> to vector<32x8xf32>
    %334 = arith.truncf %333 : vector<32x8xf32> to vector<32x8xbf16>
    %cst_99 = arith.constant dense<0.000000e+00> : vector<8x8xf32>
    %335 = tpu.matmul %23, %334, %cst_99 {dimension_numbers = #tpu.dot_dimension_numbers<[1], [0], [0], [1], [0, 0, 1, 1], [], []>} : vector<8x32xbf16>, vector<32x8xbf16>, vector<8x8xf32> -> vector<8x8xf32>
    %336 = vector.extract_strided_slice %317 {offsets = [192, 0], sizes = [32, 8], strides = [1, 1]} : vector<256x8xf32> to vector<32x8xf32>
    %337 = arith.truncf %336 : vector<32x8xf32> to vector<32x8xbf16>
    %cst_100 = arith.constant dense<0.000000e+00> : vector<8x8xf32>
    %338 = tpu.matmul %23, %337, %cst_100 {dimension_numbers = #tpu.dot_dimension_numbers<[1], [0], [0], [1], [0, 0, 1, 1], [], []>} : vector<8x32xbf16>, vector<32x8xbf16>, vector<8x8xf32> -> vector<8x8xf32>
    %339 = vector.extract_strided_slice %317 {offsets = [224, 0], sizes = [32, 8], strides = [1, 1]} : vector<256x8xf32> to vector<32x8xf32>
    %340 = arith.truncf %339 : vector<32x8xf32> to vector<32x8xbf16>
    %cst_101 = arith.constant dense<0.000000e+00> : vector<8x8xf32>
    %341 = tpu.matmul %23, %340, %cst_101 {dimension_numbers = #tpu.dot_dimension_numbers<[1], [0], [0], [1], [0, 0, 1, 1], [], []>} : vector<8x32xbf16>, vector<32x8xbf16>, vector<8x8xf32> -> vector<8x8xf32>
    %342 = tpu.concatenate %320, %323, %326, %329, %332, %335, %338, %341 in 0 : vector<8x8xf32>, vector<8x8xf32>, vector<8x8xf32>, vector<8x8xf32>, vector<8x8xf32>, vector<8x8xf32>, vector<8x8xf32>, vector<8x8xf32> -> vector<64x8xf32>
    %cst_102 = arith.constant 6.250000e-02 : f32
    %343 = vector.broadcast %cst_102 : f32 to vector<64x8xf32>
    %344 = arith.mulf %342, %343 : vector<64x8xf32>
    %c3_103 = arith.constant 3 : index
    %c0_104 = arith.constant 0 : index
    %c0_105 = arith.constant 0 : index
    %345 = vector.load %arg2[%c3_103, %c0_104, %c0_105] : memref<6x64x8xf32, #tpu.memory_space<vmem>>, vector<1x64x8xf32>
    %346 = vector.shape_cast %345 : vector<1x64x8xf32> to vector<64x8xf32>
    %347 = vector.shape_cast %344 : vector<64x8xf32> to vector<1x64x8xf32>
    tpu.vector_store %arg2[%c3_103, %c0_104, %c0_105], %347 {strides = array<i32>} : memref<6x64x8xf32, #tpu.memory_space<vmem>>, vector<1x64x8xf32>,
    %c4 = arith.constant 4 : index
    %c0_106 = arith.constant 0 : index
    %c0_107 = arith.constant 0 : index
    %348 = vector.load %arg1[%c4, %c0_106, %c0_107] : memref<6x32x32xf32, #tpu.memory_space<vmem>>, vector<1x32x32xf32>
    %349 = vector.shape_cast %348 : vector<1x32x32xf32> to vector<32x32xf32>
    %cst_108 = arith.constant 8.000000e+00 : f32
    %350 = vector.broadcast %cst_108 : f32 to vector<32x32xf32>
    %351 = arith.mulf %349, %350 : vector<32x32xf32>
    %352 = math.floor %351 : vector<32x32xf32>
    %cst_109 = arith.constant 0.000000e+00 : f32
    %cst_110 = arith.constant 7.000000e+00 : f32
    %353 = vector.broadcast %cst_109 : f32 to vector<32x32xf32>
    %354 = arith.maximumf %353, %352 : vector<32x32xf32>
    %355 = vector.broadcast %cst_110 : f32 to vector<32x32xf32>
    %356 = arith.minimumf %355, %354 : vector<32x32xf32>
    %cst_111 = arith.constant 0.000000e+00 : f32
    %357 = vector.broadcast %cst_111 : f32 to vector<32x32xf32>
    %358 = arith.cmpf oeq, %356, %357 : vector<32x32xf32>
    %359 = arith.extui %358 : vector<32x32xi1> to vector<32x32xi32>
    %360 = arith.sitofp %359 : vector<32x32xi32> to vector<32x32xf32>
    %361 = arith.truncf %360 : vector<32x32xf32> to vector<32x32xbf16>
    %cst_112 = arith.constant 1.000000e+00 : f32
    %362 = vector.broadcast %cst_112 : f32 to vector<32x32xf32>
    %363 = arith.cmpf oeq, %356, %362 : vector<32x32xf32>
    %364 = arith.extui %363 : vector<32x32xi1> to vector<32x32xi32>
    %365 = arith.sitofp %364 : vector<32x32xi32> to vector<32x32xf32>
    %366 = arith.truncf %365 : vector<32x32xf32> to vector<32x32xbf16>
    %cst_113 = arith.constant 2.000000e+00 : f32
    %367 = vector.broadcast %cst_113 : f32 to vector<32x32xf32>
    %368 = arith.cmpf oeq, %356, %367 : vector<32x32xf32>
    %369 = arith.extui %368 : vector<32x32xi1> to vector<32x32xi32>
    %370 = arith.sitofp %369 : vector<32x32xi32> to vector<32x32xf32>
    %371 = arith.truncf %370 : vector<32x32xf32> to vector<32x32xbf16>
    %cst_114 = arith.constant 3.000000e+00 : f32
    %372 = vector.broadcast %cst_114 : f32 to vector<32x32xf32>
    %373 = arith.cmpf oeq, %356, %372 : vector<32x32xf32>
    %374 = arith.extui %373 : vector<32x32xi1> to vector<32x32xi32>
    %375 = arith.sitofp %374 : vector<32x32xi32> to vector<32x32xf32>
    %376 = arith.truncf %375 : vector<32x32xf32> to vector<32x32xbf16>
    %cst_115 = arith.constant 4.000000e+00 : f32
    %377 = vector.broadcast %cst_115 : f32 to vector<32x32xf32>
    %378 = arith.cmpf oeq, %356, %377 : vector<32x32xf32>
    %379 = arith.extui %378 : vector<32x32xi1> to vector<32x32xi32>
    %380 = arith.sitofp %379 : vector<32x32xi32> to vector<32x32xf32>
    %381 = arith.truncf %380 : vector<32x32xf32> to vector<32x32xbf16>
    %cst_116 = arith.constant 5.000000e+00 : f32
    %382 = vector.broadcast %cst_116 : f32 to vector<32x32xf32>
    %383 = arith.cmpf oeq, %356, %382 : vector<32x32xf32>
    %384 = arith.extui %383 : vector<32x32xi1> to vector<32x32xi32>
    %385 = arith.sitofp %384 : vector<32x32xi32> to vector<32x32xf32>
    %386 = arith.truncf %385 : vector<32x32xf32> to vector<32x32xbf16>
    %cst_117 = arith.constant 6.000000e+00 : f32
    %387 = vector.broadcast %cst_117 : f32 to vector<32x32xf32>
    %388 = arith.cmpf oeq, %356, %387 : vector<32x32xf32>
    %389 = arith.extui %388 : vector<32x32xi1> to vector<32x32xi32>
    %390 = arith.sitofp %389 : vector<32x32xi32> to vector<32x32xf32>
    %391 = arith.truncf %390 : vector<32x32xf32> to vector<32x32xbf16>
    %cst_118 = arith.constant 7.000000e+00 : f32
    %392 = vector.broadcast %cst_118 : f32 to vector<32x32xf32>
    %393 = arith.cmpf oeq, %356, %392 : vector<32x32xf32>
    %394 = arith.extui %393 : vector<32x32xi1> to vector<32x32xi32>
    %395 = arith.sitofp %394 : vector<32x32xi32> to vector<32x32xf32>
    %396 = arith.truncf %395 : vector<32x32xf32> to vector<32x32xbf16>
    %397 = tpu.concatenate %361, %366, %371, %376, %381, %386, %391, %396 in 0 : vector<32x32xbf16>, vector<32x32xbf16>, vector<32x32xbf16>, vector<32x32xbf16>, vector<32x32xbf16>, vector<32x32xbf16>, vector<32x32xbf16>, vector<32x32xbf16> -> vector<256x32xbf16>
    %cst_119 = arith.constant dense<0.000000e+00> : vector<256x8xf32>
    %398 = tpu.matmul %397, %11, %cst_119 {dimension_numbers = #tpu.dot_dimension_numbers<[1], [0], [0], [1], [0, 0, 1, 1], [], []>} : vector<256x32xbf16>, vector<32x8xbf16>, vector<256x8xf32> -> vector<256x8xf32>
    %399 = vector.extract_strided_slice %398 {offsets = [0, 0], sizes = [32, 8], strides = [1, 1]} : vector<256x8xf32> to vector<32x8xf32>
    %400 = arith.truncf %399 : vector<32x8xf32> to vector<32x8xbf16>
    %cst_120 = arith.constant dense<0.000000e+00> : vector<8x8xf32>
    %401 = tpu.matmul %23, %400, %cst_120 {dimension_numbers = #tpu.dot_dimension_numbers<[1], [0], [0], [1], [0, 0, 1, 1], [], []>} : vector<8x32xbf16>, vector<32x8xbf16>, vector<8x8xf32> -> vector<8x8xf32>
    %402 = vector.extract_strided_slice %398 {offsets = [32, 0], sizes = [32, 8], strides = [1, 1]} : vector<256x8xf32> to vector<32x8xf32>
    %403 = arith.truncf %402 : vector<32x8xf32> to vector<32x8xbf16>
    %cst_121 = arith.constant dense<0.000000e+00> : vector<8x8xf32>
    %404 = tpu.matmul %23, %403, %cst_121 {dimension_numbers = #tpu.dot_dimension_numbers<[1], [0], [0], [1], [0, 0, 1, 1], [], []>} : vector<8x32xbf16>, vector<32x8xbf16>, vector<8x8xf32> -> vector<8x8xf32>
    %405 = vector.extract_strided_slice %398 {offsets = [64, 0], sizes = [32, 8], strides = [1, 1]} : vector<256x8xf32> to vector<32x8xf32>
    %406 = arith.truncf %405 : vector<32x8xf32> to vector<32x8xbf16>
    %cst_122 = arith.constant dense<0.000000e+00> : vector<8x8xf32>
    %407 = tpu.matmul %23, %406, %cst_122 {dimension_numbers = #tpu.dot_dimension_numbers<[1], [0], [0], [1], [0, 0, 1, 1], [], []>} : vector<8x32xbf16>, vector<32x8xbf16>, vector<8x8xf32> -> vector<8x8xf32>
    %408 = vector.extract_strided_slice %398 {offsets = [96, 0], sizes = [32, 8], strides = [1, 1]} : vector<256x8xf32> to vector<32x8xf32>
    %409 = arith.truncf %408 : vector<32x8xf32> to vector<32x8xbf16>
    %cst_123 = arith.constant dense<0.000000e+00> : vector<8x8xf32>
    %410 = tpu.matmul %23, %409, %cst_123 {dimension_numbers = #tpu.dot_dimension_numbers<[1], [0], [0], [1], [0, 0, 1, 1], [], []>} : vector<8x32xbf16>, vector<32x8xbf16>, vector<8x8xf32> -> vector<8x8xf32>
    %411 = vector.extract_strided_slice %398 {offsets = [128, 0], sizes = [32, 8], strides = [1, 1]} : vector<256x8xf32> to vector<32x8xf32>
    %412 = arith.truncf %411 : vector<32x8xf32> to vector<32x8xbf16>
    %cst_124 = arith.constant dense<0.000000e+00> : vector<8x8xf32>
    %413 = tpu.matmul %23, %412, %cst_124 {dimension_numbers = #tpu.dot_dimension_numbers<[1], [0], [0], [1], [0, 0, 1, 1], [], []>} : vector<8x32xbf16>, vector<32x8xbf16>, vector<8x8xf32> -> vector<8x8xf32>
    %414 = vector.extract_strided_slice %398 {offsets = [160, 0], sizes = [32, 8], strides = [1, 1]} : vector<256x8xf32> to vector<32x8xf32>
    %415 = arith.truncf %414 : vector<32x8xf32> to vector<32x8xbf16>
    %cst_125 = arith.constant dense<0.000000e+00> : vector<8x8xf32>
    %416 = tpu.matmul %23, %415, %cst_125 {dimension_numbers = #tpu.dot_dimension_numbers<[1], [0], [0], [1], [0, 0, 1, 1], [], []>} : vector<8x32xbf16>, vector<32x8xbf16>, vector<8x8xf32> -> vector<8x8xf32>
    %417 = vector.extract_strided_slice %398 {offsets = [192, 0], sizes = [32, 8], strides = [1, 1]} : vector<256x8xf32> to vector<32x8xf32>
    %418 = arith.truncf %417 : vector<32x8xf32> to vector<32x8xbf16>
    %cst_126 = arith.constant dense<0.000000e+00> : vector<8x8xf32>
    %419 = tpu.matmul %23, %418, %cst_126 {dimension_numbers = #tpu.dot_dimension_numbers<[1], [0], [0], [1], [0, 0, 1, 1], [], []>} : vector<8x32xbf16>, vector<32x8xbf16>, vector<8x8xf32> -> vector<8x8xf32>
    %420 = vector.extract_strided_slice %398 {offsets = [224, 0], sizes = [32, 8], strides = [1, 1]} : vector<256x8xf32> to vector<32x8xf32>
    %421 = arith.truncf %420 : vector<32x8xf32> to vector<32x8xbf16>
    %cst_127 = arith.constant dense<0.000000e+00> : vector<8x8xf32>
    %422 = tpu.matmul %23, %421, %cst_127 {dimension_numbers = #tpu.dot_dimension_numbers<[1], [0], [0], [1], [0, 0, 1, 1], [], []>} : vector<8x32xbf16>, vector<32x8xbf16>, vector<8x8xf32> -> vector<8x8xf32>
    %423 = tpu.concatenate %401, %404, %407, %410, %413, %416, %419, %422 in 0 : vector<8x8xf32>, vector<8x8xf32>, vector<8x8xf32>, vector<8x8xf32>, vector<8x8xf32>, vector<8x8xf32>, vector<8x8xf32>, vector<8x8xf32> -> vector<64x8xf32>
    %cst_128 = arith.constant 6.250000e-02 : f32
    %424 = vector.broadcast %cst_128 : f32 to vector<64x8xf32>
    %425 = arith.mulf %423, %424 : vector<64x8xf32>
    %c4_129 = arith.constant 4 : index
    %c0_130 = arith.constant 0 : index
    %c0_131 = arith.constant 0 : index
    %426 = vector.load %arg2[%c4_129, %c0_130, %c0_131] : memref<6x64x8xf32, #tpu.memory_space<vmem>>, vector<1x64x8xf32>
    %427 = vector.shape_cast %426 : vector<1x64x8xf32> to vector<64x8xf32>
    %428 = vector.shape_cast %425 : vector<64x8xf32> to vector<1x64x8xf32>
    tpu.vector_store %arg2[%c4_129, %c0_130, %c0_131], %428 {strides = array<i32>} : memref<6x64x8xf32, #tpu.memory_space<vmem>>, vector<1x64x8xf32>,
    %c5 = arith.constant 5 : index
    %c0_132 = arith.constant 0 : index
    %c0_133 = arith.constant 0 : index
    %429 = vector.load %arg1[%c5, %c0_132, %c0_133] : memref<6x32x32xf32, #tpu.memory_space<vmem>>, vector<1x32x32xf32>
    %430 = vector.shape_cast %429 : vector<1x32x32xf32> to vector<32x32xf32>
    %cst_134 = arith.constant 8.000000e+00 : f32
    %431 = vector.broadcast %cst_134 : f32 to vector<32x32xf32>
    %432 = arith.mulf %430, %431 : vector<32x32xf32>
    %433 = math.floor %432 : vector<32x32xf32>
    %cst_135 = arith.constant 0.000000e+00 : f32
    %cst_136 = arith.constant 7.000000e+00 : f32
    %434 = vector.broadcast %cst_135 : f32 to vector<32x32xf32>
    %435 = arith.maximumf %434, %433 : vector<32x32xf32>
    %436 = vector.broadcast %cst_136 : f32 to vector<32x32xf32>
    %437 = arith.minimumf %436, %435 : vector<32x32xf32>
    %cst_137 = arith.constant 0.000000e+00 : f32
    %438 = vector.broadcast %cst_137 : f32 to vector<32x32xf32>
    %439 = arith.cmpf oeq, %437, %438 : vector<32x32xf32>
    %440 = arith.extui %439 : vector<32x32xi1> to vector<32x32xi32>
    %441 = arith.sitofp %440 : vector<32x32xi32> to vector<32x32xf32>
    %442 = arith.truncf %441 : vector<32x32xf32> to vector<32x32xbf16>
    %cst_138 = arith.constant 1.000000e+00 : f32
    %443 = vector.broadcast %cst_138 : f32 to vector<32x32xf32>
    %444 = arith.cmpf oeq, %437, %443 : vector<32x32xf32>
    %445 = arith.extui %444 : vector<32x32xi1> to vector<32x32xi32>
    %446 = arith.sitofp %445 : vector<32x32xi32> to vector<32x32xf32>
    %447 = arith.truncf %446 : vector<32x32xf32> to vector<32x32xbf16>
    %cst_139 = arith.constant 2.000000e+00 : f32
    %448 = vector.broadcast %cst_139 : f32 to vector<32x32xf32>
    %449 = arith.cmpf oeq, %437, %448 : vector<32x32xf32>
    %450 = arith.extui %449 : vector<32x32xi1> to vector<32x32xi32>
    %451 = arith.sitofp %450 : vector<32x32xi32> to vector<32x32xf32>
    %452 = arith.truncf %451 : vector<32x32xf32> to vector<32x32xbf16>
    %cst_140 = arith.constant 3.000000e+00 : f32
    %453 = vector.broadcast %cst_140 : f32 to vector<32x32xf32>
    %454 = arith.cmpf oeq, %437, %453 : vector<32x32xf32>
    %455 = arith.extui %454 : vector<32x32xi1> to vector<32x32xi32>
    %456 = arith.sitofp %455 : vector<32x32xi32> to vector<32x32xf32>
    %457 = arith.truncf %456 : vector<32x32xf32> to vector<32x32xbf16>
    %cst_141 = arith.constant 4.000000e+00 : f32
    %458 = vector.broadcast %cst_141 : f32 to vector<32x32xf32>
    %459 = arith.cmpf oeq, %437, %458 : vector<32x32xf32>
    %460 = arith.extui %459 : vector<32x32xi1> to vector<32x32xi32>
    %461 = arith.sitofp %460 : vector<32x32xi32> to vector<32x32xf32>
    %462 = arith.truncf %461 : vector<32x32xf32> to vector<32x32xbf16>
    %cst_142 = arith.constant 5.000000e+00 : f32
    %463 = vector.broadcast %cst_142 : f32 to vector<32x32xf32>
    %464 = arith.cmpf oeq, %437, %463 : vector<32x32xf32>
    %465 = arith.extui %464 : vector<32x32xi1> to vector<32x32xi32>
    %466 = arith.sitofp %465 : vector<32x32xi32> to vector<32x32xf32>
    %467 = arith.truncf %466 : vector<32x32xf32> to vector<32x32xbf16>
    %cst_143 = arith.constant 6.000000e+00 : f32
    %468 = vector.broadcast %cst_143 : f32 to vector<32x32xf32>
    %469 = arith.cmpf oeq, %437, %468 : vector<32x32xf32>
    %470 = arith.extui %469 : vector<32x32xi1> to vector<32x32xi32>
    %471 = arith.sitofp %470 : vector<32x32xi32> to vector<32x32xf32>
    %472 = arith.truncf %471 : vector<32x32xf32> to vector<32x32xbf16>
    %cst_144 = arith.constant 7.000000e+00 : f32
    %473 = vector.broadcast %cst_144 : f32 to vector<32x32xf32>
    %474 = arith.cmpf oeq, %437, %473 : vector<32x32xf32>
    %475 = arith.extui %474 : vector<32x32xi1> to vector<32x32xi32>
    %476 = arith.sitofp %475 : vector<32x32xi32> to vector<32x32xf32>
    %477 = arith.truncf %476 : vector<32x32xf32> to vector<32x32xbf16>
    %478 = tpu.concatenate %442, %447, %452, %457, %462, %467, %472, %477 in 0 : vector<32x32xbf16>, vector<32x32xbf16>, vector<32x32xbf16>, vector<32x32xbf16>, vector<32x32xbf16>, vector<32x32xbf16>, vector<32x32xbf16>, vector<32x32xbf16> -> vector<256x32xbf16>
    %cst_145 = arith.constant dense<0.000000e+00> : vector<256x8xf32>
    %479 = tpu.matmul %478, %11, %cst_145 {dimension_numbers = #tpu.dot_dimension_numbers<[1], [0], [0], [1], [0, 0, 1, 1], [], []>} : vector<256x32xbf16>, vector<32x8xbf16>, vector<256x8xf32> -> vector<256x8xf32>
    %480 = vector.extract_strided_slice %479 {offsets = [0, 0], sizes = [32, 8], strides = [1, 1]} : vector<256x8xf32> to vector<32x8xf32>
    %481 = arith.truncf %480 : vector<32x8xf32> to vector<32x8xbf16>
    %cst_146 = arith.constant dense<0.000000e+00> : vector<8x8xf32>
    %482 = tpu.matmul %23, %481, %cst_146 {dimension_numbers = #tpu.dot_dimension_numbers<[1], [0], [0], [1], [0, 0, 1, 1], [], []>} : vector<8x32xbf16>, vector<32x8xbf16>, vector<8x8xf32> -> vector<8x8xf32>
    %483 = vector.extract_strided_slice %479 {offsets = [32, 0], sizes = [32, 8], strides = [1, 1]} : vector<256x8xf32> to vector<32x8xf32>
    %484 = arith.truncf %483 : vector<32x8xf32> to vector<32x8xbf16>
    %cst_147 = arith.constant dense<0.000000e+00> : vector<8x8xf32>
    %485 = tpu.matmul %23, %484, %cst_147 {dimension_numbers = #tpu.dot_dimension_numbers<[1], [0], [0], [1], [0, 0, 1, 1], [], []>} : vector<8x32xbf16>, vector<32x8xbf16>, vector<8x8xf32> -> vector<8x8xf32>
    %486 = vector.extract_strided_slice %479 {offsets = [64, 0], sizes = [32, 8], strides = [1, 1]} : vector<256x8xf32> to vector<32x8xf32>
    %487 = arith.truncf %486 : vector<32x8xf32> to vector<32x8xbf16>
    %cst_148 = arith.constant dense<0.000000e+00> : vector<8x8xf32>
    %488 = tpu.matmul %23, %487, %cst_148 {dimension_numbers = #tpu.dot_dimension_numbers<[1], [0], [0], [1], [0, 0, 1, 1], [], []>} : vector<8x32xbf16>, vector<32x8xbf16>, vector<8x8xf32> -> vector<8x8xf32>
    %489 = vector.extract_strided_slice %479 {offsets = [96, 0], sizes = [32, 8], strides = [1, 1]} : vector<256x8xf32> to vector<32x8xf32>
    %490 = arith.truncf %489 : vector<32x8xf32> to vector<32x8xbf16>
    %cst_149 = arith.constant dense<0.000000e+00> : vector<8x8xf32>
    %491 = tpu.matmul %23, %490, %cst_149 {dimension_numbers = #tpu.dot_dimension_numbers<[1], [0], [0], [1], [0, 0, 1, 1], [], []>} : vector<8x32xbf16>, vector<32x8xbf16>, vector<8x8xf32> -> vector<8x8xf32>
    %492 = vector.extract_strided_slice %479 {offsets = [128, 0], sizes = [32, 8], strides = [1, 1]} : vector<256x8xf32> to vector<32x8xf32>
    %493 = arith.truncf %492 : vector<32x8xf32> to vector<32x8xbf16>
    %cst_150 = arith.constant dense<0.000000e+00> : vector<8x8xf32>
    %494 = tpu.matmul %23, %493, %cst_150 {dimension_numbers = #tpu.dot_dimension_numbers<[1], [0], [0], [1], [0, 0, 1, 1], [], []>} : vector<8x32xbf16>, vector<32x8xbf16>, vector<8x8xf32> -> vector<8x8xf32>
    %495 = vector.extract_strided_slice %479 {offsets = [160, 0], sizes = [32, 8], strides = [1, 1]} : vector<256x8xf32> to vector<32x8xf32>
    %496 = arith.truncf %495 : vector<32x8xf32> to vector<32x8xbf16>
    %cst_151 = arith.constant dense<0.000000e+00> : vector<8x8xf32>
    %497 = tpu.matmul %23, %496, %cst_151 {dimension_numbers = #tpu.dot_dimension_numbers<[1], [0], [0], [1], [0, 0, 1, 1], [], []>} : vector<8x32xbf16>, vector<32x8xbf16>, vector<8x8xf32> -> vector<8x8xf32>
    %498 = vector.extract_strided_slice %479 {offsets = [192, 0], sizes = [32, 8], strides = [1, 1]} : vector<256x8xf32> to vector<32x8xf32>
    %499 = arith.truncf %498 : vector<32x8xf32> to vector<32x8xbf16>
    %cst_152 = arith.constant dense<0.000000e+00> : vector<8x8xf32>
    %500 = tpu.matmul %23, %499, %cst_152 {dimension_numbers = #tpu.dot_dimension_numbers<[1], [0], [0], [1], [0, 0, 1, 1], [], []>} : vector<8x32xbf16>, vector<32x8xbf16>, vector<8x8xf32> -> vector<8x8xf32>
    %501 = vector.extract_strided_slice %479 {offsets = [224, 0], sizes = [32, 8], strides = [1, 1]} : vector<256x8xf32> to vector<32x8xf32>
    %502 = arith.truncf %501 : vector<32x8xf32> to vector<32x8xbf16>
    %cst_153 = arith.constant dense<0.000000e+00> : vector<8x8xf32>
    %503 = tpu.matmul %23, %502, %cst_153 {dimension_numbers = #tpu.dot_dimension_numbers<[1], [0], [0], [1], [0, 0, 1, 1], [], []>} : vector<8x32xbf16>, vector<32x8xbf16>, vector<8x8xf32> -> vector<8x8xf32>
    %504 = tpu.concatenate %482, %485, %488, %491, %494, %497, %500, %503 in 0 : vector<8x8xf32>, vector<8x8xf32>, vector<8x8xf32>, vector<8x8xf32>, vector<8x8xf32>, vector<8x8xf32>, vector<8x8xf32>, vector<8x8xf32> -> vector<64x8xf32>
    %cst_154 = arith.constant 6.250000e-02 : f32
    %505 = vector.broadcast %cst_154 : f32 to vector<64x8xf32>
    %506 = arith.mulf %504, %505 : vector<64x8xf32>
    %c5_155 = arith.constant 5 : index
    %c0_156 = arith.constant 0 : index
    %c0_157 = arith.constant 0 : index
    %507 = vector.load %arg2[%c5_155, %c0_156, %c0_157] : memref<6x64x8xf32, #tpu.memory_space<vmem>>, vector<1x64x8xf32>
    %508 = vector.shape_cast %507 : vector<1x64x8xf32> to vector<64x8xf32>
    %509 = vector.shape_cast %506 : vector<64x8xf32> to vector<1x64x8xf32>
    tpu.vector_store %arg2[%c5_155, %c0_156, %c0_157], %509 {strides = array<i32>} : memref<6x64x8xf32, #tpu.memory_space<vmem>>, vector<1x64x8xf32>,
    return
  }
  func.func @transform_0(%arg0: i32) -> (i32, i32, i32) {
    %c0_i32 = arith.constant 0 : i32
    %c0_i32_0 = arith.constant 0 : i32
    %c0_i32_1 = arith.constant 0 : i32
    return %arg0, %c0_i32, %c0_i32_0 : i32, i32, i32
  }
  func.func @transform_1(%arg0: i32) -> (i32, i32, i32) {
    %c0_i32 = arith.constant 0 : i32
    %c0_i32_0 = arith.constant 0 : i32
    %c0_i32_1 = arith.constant 0 : i32
    return %arg0, %c0_i32, %c0_i32_0 : i32, i32, i32
  }
}

</mosaic_0001>

<bundles_post_ra>
// kernel: tpu_custom_call.1
= control target key start
LH: loop header
LB: loop body
LE: loop exit
PB: predicated region body
PF: predicated region fallthrough
CT: control target
= control target key end

     0   :  { %6 = vsyncpa [#allocation3], 0  ;;  %s4762_s0 = inlined_call_operand.hbm [shape: f32[18,32,32], index: 0, kind: input, shape index: {}]   ;;  %s4763_s1 = inlined_call_operand.vmem [shape: f32[18,64,8], index: 1, kind: output, shape index: {}]  }
   0x1   :  { %8 = vsyncpa [#allocation3 + $0x1], 0  ;;  %s3845_s6 = smov 0   ;;  %s3847_s7 = smov 0  }
   0x2   :  { %s3849_s8 = smov 0   ;;  %s3851_s9 = smov 0  }
   0x3 LB: > { %s3274_s10 = sadd.s32 4294967295, %s3829_s9   ;;  %s3865_s11 = sadd.s32 1, %s3829_s9   ;;  %s3829_s9 = sphi %s3851_s9, %s4779_s9   ;;  %s3825_s8 = sphi %s3849_s8, %s4778_s8   ;;  %s3821_s7 = sphi %s3847_s7, %s4777_s7   ;;  %s3817_s6 = sphi %s3845_s6, %s4776_s6  }
   0x4   : > { %s18_s12 = ssub.s32 %s3829_s9, %s3865_s11  ;;  %s21_s13 = sadd.s32 1, %s3825_s8 }
   0x5   : > { %p19_p0 = scmp.eq.s32.totalorder %s18_s12, 0  ;;  %p28_p1 = scmp.ne.s32.totalorder %s3825_s8, %s3821_s7 }
   0x6   : > { %p29_p2 = scmp.eq.s32.totalorder %s3829_s9, 0  ;;  %p34_p3 = scmp.ne.s32.totalorder %s3821_s7, %s3817_s6 }
   0x7   : > { %s3875_s14 = scalar_select %p19_p0, %s3825_s8, %s21_s13  }
   0x8   : > { %p30_p4 = por %p29_p2, %p28_p1  ;;  %p35_p5 = scmp.eq.s32.totalorder %s3274_s10, 0 }
   0x9   : > { %p3728_p6 = scmp.lt.s32.totalorder %s3829_s9, 3  ;;  %s84_s16 = sand.u32 1, %s3825_s8  }
   0xa   : > { %p3880_p7 = por %p35_p5, %p34_p3  ;;  %s3720_s17 = smul.u32 192, %s84_s16 }
   0xb   : > { %s3713_s18 = smul.u32 192, %s3829_s9  ;;  %p3886_p8 = pnand %p3728_p6, %p30_p4 }
   0xc   : > { %s88_s23 = scalar_lea.vmem [#allocation2], %s3720_s17  ;;  %p3280_p9 = scmp.ge.s32.totalorder %s3829_s9, 1 }
   0xd   : > { %s94_s22 = scalar_lea.hbm %s4762_s0, %s3713_s18  ;;  %s97_s24 = sshll.u32 %s88_s23, 4  ;;  %s98_s24 = int_to_ptr.vmem [resolvable:$true] %s97_s24 }
   0xe   : > { %s95_s25 = sshll.u32 %s94_s22, 4  ;;  %s85_s26 = scalar_lea.sflag [#allocation3], %s84_s16  ;;  %s96_s25 = int_to_ptr.hbm [resolvable:$true] %s95_s25 }
   0xf   : > { %s3765_s27 = sshra.s32 %s96_s25, 4  ;;  %p3769_p11 = pneg %p3886_p8  ;;  %s3766_s27 = int_to_ptr.hbm [resolvable:$true] %s3765_s27 }
  0x10   : > { %s3767_s28 = scalar_lea.hbm %s3766_s27, 192  ;;  %s3772_s2 = scalar_lea.hbm %s4762_s0, 576 }
  0x11   : > { %p3768_p10 = scmp.ne.s32.totalorder %s3766_s27, %s3767_s28  ;;  %p3773_p0 = scmp.lt.s32.totalorder %s3766_s27, %s4762_s0 }
  0x12   : > { %p3774_p1 = scmp.lt.s32.totalorder %s3772_s2, %s3767_s28 }
  0x13   : > { %p3770_p12 = pnand %p3769_p11, %p3768_p10 }
  0x14   : > { %p3775_p2 = por %p3774_p1, %p3773_p0 }
  0x15   : > { %p3771_p13 = pneg %p3770_p12 }
  0x17   : > { %p3776_p3 = pnand %p3775_p2, %p3771_p13 }
  0x19   : > { %3779 = shalt.err (!%p3776_p3)
}
  0x1a   : > { %s3831_s5 = smov 128   ;;  %s3832_s6 = smov 8  }
  0x1b   : > { %3727 = dma.hbm_to_vmem [thread:$0]  (!%p3886_p8), %s96_s25, 3072, %s98_s24, %s85_s26, %s3831_s5, %s3831_s5, %s3832_s6  }
  0x1c   : > { %p105_p4 = scmp.lt.s32.totalorder %s3829_s9, 4 }
  0x1e   : > { %p106_p5 = pnand %p3280_p9, %p105_p4 }
  0x1f   : > { %s111_s12 = sand.u32 (!%p106_p5), 1, %s3821_s7  }
  0x20   : > { %109 = sbr.rel (%p106_p5) target bundleno = 2348 (0x92c), region = 24  ;;  %s112_s16 = scalar_lea.sflag (!%p106_p5), [#allocation3], %s111_s12 }
  0x21   : > { %s3721_s13 = smul.u32 (!%p106_p5), 192, %s111_s12 }
  0x23   : > { %s3908_s17 = scalar_lea.vmem (!%p106_p5), [#allocation2], %s3721_s13 }
  0x25   : > { %3812 = dma.done.wait (%p3880_p7), %s112_s16, 3072  }
  0x26   : > { %3814 = vsyncadd (%p3880_p7), %s112_s16, 4294964224  ;;  %v145_v0 = vlaneseq  ;;  %v184_v11 = vld [vmem:[%s3908_s17] sm:$0xff]  ;;  %v185_v12 = vld [vmem:[%s3908_s17 + $0x8] sm:$0xff]  ;;  %v3833_v26 = vmov 1.0|1.0   ;;  %v3834_v34 = vmov 0.0  }
  0x27   : > { %v186_v13 = vld [vmem:[%s3908_s17 + $0x10] sm:$0xff]  ;;  %v187_v14 = vld [vmem:[%s3908_s17 + $0x18] sm:$0xff]  ;;  %v188_v16 = vmul.f32 8.0, %v184_v11  ;;  %v189_v17 = vmul.f32 8.0, %v185_v12  ;;  %s137_s15 = smul.u32 6, %s3274_s10 }
  0x28   : > { %v146_v1 = vshrl.u32 %v145_v0, 7  ;;  %v151_v2 = vand.u32 127, %v145_v0  ;;  %v190_v18 = vmul.f32 8.0, %v186_v13  ;;  %v191_v19 = vmul.f32 8.0, %v187_v14 }
  0x29   : > { %v192_v21 = vfloor.f32 %v188_v16  ;;  %v193_v22 = vfloor.f32 %v189_v17  ;;  %p138_p6 = scmp.lt.s32.totalorder %s137_s15, 17 }
  0x2a   : > { %v148_v3 = vadd.s32 16, %v146_v1  ;;  %v149_v4 = vadd.s32 24, %v146_v1  ;;  %v152_v5 = vmul.u32 4, %v151_v2  ;;  %v176_v6 = vmul.u32 4, %v146_v1 }
  0x2b   : > { %v147_v9 = vadd.s32 8, %v146_v1  ;;  %v194_v23 = vfloor.f32 %v190_v18  ;;  %v195_v25 = vfloor.f32 %v191_v19  ;;  %v196_v27 = vmax.f32 %v192_v21, 0.0  ;;  %s4781_s15 = smov (!%p138_p6, %s137_s15), 17 }
  0x2c   : > { %vm155_vm0 = vcmp.ge.s32.totalorder %v148_v3, %v152_v5  ;;  %v157_v7 = vadd.s32 4, %v152_v5  ;;  %vm3914_vm1 = vcmp.ge.s32.totalorder %v151_v2, %v176_v6  ;;  %vm156_vm2 = vcmp.ge.s32.totalorder %v149_v4, %v152_v5  ;;  %s3712_s9 = sshll.u32 %s4781_s15, 6 }
  0x2d   : > { %v178_v10 = vadd.s32 4, %v176_v6  ;;  %vm153_vm8 = vcmp.ge.s32.totalorder %v146_v1, %v152_v5  ;;  %vm154_vm9 = vcmp.ge.s32.totalorder %v147_v9, %v152_v5  ;;  %v197_v28 = vmax.f32 %v193_v22, 0.0  ;;  %s4130_s19 = scalar_lea.vmem %s4763_s1, %s3712_s9 }
  0x2e   : > { %vm160_vm3 = vcmp.lt.s32.totalorder %v148_v3, %v157_v7  ;;  %vm161_vm4 = vcmp.lt.s32.totalorder %v149_v4, %v157_v7  ;;  %vm158_vm10 = vcmp.lt.s32.totalorder %v146_v1, %v157_v7  ;;  %vm159_vm12 = vcmp.lt.s32.totalorder %v147_v9, %v157_v7 }
  0x2f   : > { %vm3922_vm5 = vmand %vm155_vm0, %vm160_vm3  ;;  %vm179_vm6 = vcmp.lt.s32.totalorder %v151_v2, %v178_v10  ;;  %v3949_v30 = vmin.f32 %v196_v27, 7.0  ;;  %v3951_v31 = vmin.f32 %v197_v28, 7.0  ;;  %v198_v32 = vmax.f32 %v194_v23, 0.0 }
  0x30   : > { %vm165_vm7 = vmand %vm156_vm2, %vm161_vm4  ;;  %v199_v33 = vmax.f32 %v195_v25, 0.0  ;;  %vm412_vm3 = vcmask 261120  }
  0x31   : > { %vm3928_vm11 = vmand %vm3914_vm1, %vm179_vm6  ;;  %vm204_vm1 = vcmp.eq.f32.partialorder %v3949_v30, 0.0  ;;  %vm205_vm2 = vcmp.eq.f32.partialorder %v3951_v31, 0.0  ;;  %v3963_v39 = vmin.f32 %v198_v32, 7.0  ;;  %vm220_vm6 = vcmp.eq.f32.partialorder %v3949_v30, 1.0 }
  0x32   : > { %vm3934_vm13 = vmpackc.low %vm165_vm7, %vm3922_vm5  ;;  %v3288_v35 = vsel %vm204_vm1, 1.0, %v3834_v34  ;;  %v3289_v36 = vsel %vm205_vm2, 1.0, %v3834_v34  ;;  %v3965_v40 = vmin.f32 %v199_v33, 7.0  ;;  %vm221_vm7 = vcmp.eq.f32.partialorder %v3951_v31, 1.0 }
  0x33   : > { %3321 = vmatpush.bf16.msk.msra.mxu0 %vm3934_vm13, %v3833_v26  ;;  %vm162_vm14 = vmand %vm153_vm8, %vm158_vm10  ;;  %3714 = vmatpush.bf16.msk.msra.mxu2 %vm3934_vm13, %v3833_v26  ;;  %v216_v37 = vpack.c.bf16 %v3288_v35, %v3288_v35  ;;  %v217_v38 = vpack.c.bf16 %v3289_v36, %v3289_v36  ;;  %vm206_vm4 = vcmp.eq.f32.partialorder %v3963_v39, 0.0  ;;  %v3292_v51 = vsel %vm220_vm6, 1.0, %v3834_v34 }
  0x34   : > { %vm163_vm15 = vmand %vm154_vm9, %vm159_vm12  ;;  %vm207_vm5 = vcmp.eq.f32.partialorder %v3965_v40, 0.0  ;;  %v3290_v44 = vsel %vm206_vm4, 1.0, %v3834_v34  ;;  %v3293_v52 = vsel %vm221_vm7, 1.0, %v3834_v34  ;;  %v232_v53 = vpack.c.bf16 %v3292_v51, %v3292_v51 }
  0x35   : > { %vm3945_vm0 = vmpackc.low %vm163_vm15, %vm162_vm14  ;;  %v336_v41 = vunpack.c.l.b16 %v216_v37  ;;  %v337_v42 = vunpack.c.l.b16 %v217_v38  ;;  %v3291_v45 = vsel %vm207_vm5, 1.0, %v3834_v34  ;;  %v218_v46 = vpack.c.bf16 %v3290_v44, %v3290_v44 }
  0x36   : > { %v219_v47 = vpack.c.bf16 %v3291_v45, %v3291_v45  ;;  %v233_v54 = vpack.c.bf16 %v3293_v52, %v3293_v52  ;;  %v346_v55 = vunpack.c.l.b16 %v232_v53  ;;  %vm222_vm8 = vcmp.eq.f32.partialorder %v3963_v39, 1.0 }
  0x37   : > { %3323 = vmatpush.bf16.msk.msra.mxu0 %vm3945_vm0, %v3833_v26  ;;  %3715 = vmatpush.bf16.msk.msra.mxu2 %vm3945_vm0, %v3833_v26  ;;  %v340_v43 = vpack.c.b16 %v337_v42, %v336_v41  ;;  %v338_v48 = vunpack.c.l.b16 %v218_v46  ;;  %vm223_vm9 = vcmp.eq.f32.partialorder %v3965_v40, 1.0  ;;  %v3294_v58 = vsel %vm222_vm8, 1.0, %v3834_v34 }
  0x38   : > { %v339_v49 = vunpack.c.l.b16 %v219_v47  ;;  %v347_v56 = vunpack.c.l.b16 %v233_v54  ;;  %v3295_v59 = vsel %vm223_vm9, 1.0, %v3834_v34  ;;  %v234_v60 = vpack.c.bf16 %v3294_v58, %v3294_v58 }
  0x39   : > { %v235_v61 = vpack.c.bf16 %v3295_v59, %v3295_v59  ;;  %vm236_vm10 = vcmp.eq.f32.partialorder %v3949_v30, 2.0  ;;  %vm237_vm12 = vcmp.eq.f32.partialorder %v3951_v31, 2.0  ;;  %vm238_vm14 = vcmp.eq.f32.partialorder %v3963_v39, 2.0 }
  0x3a   : > { %3324 = vmatmul.msk.bf16.vlgmr.msra.gmra.mxu0 %vm412_vm3, %v340_v43  ;;  %v341_v50 = vpack.c.b16 %v339_v49, %v338_v48  ;;  %v350_v57 = vpack.c.b16 %v347_v56, %v346_v55  ;;  %v348_v62 = vunpack.c.l.b16 %v234_v60  ;;  %v3296_v1 = vsel %vm236_vm10, 1.0, %v3834_v34 }
  0x3b   : > { %v349_v63 = vunpack.c.l.b16 %v235_v61  ;;  %v3297_v2 = vsel %vm237_vm12, 1.0, %v3834_v34  ;;  %v248_v3 = vpack.c.bf16 %v3296_v1, %v3296_v1  ;;  %vm239_vm15 = vcmp.eq.f32.partialorder %v3965_v40, 2.0 }
  0x3c   : > { %v249_v4 = vpack.c.bf16 %v3297_v2, %v3297_v2  ;;  %v3298_v8 = vsel %vm238_vm14, 1.0, %v3834_v34  ;;  %v3299_v9 = vsel %vm239_vm15, 1.0, %v3834_v34  ;;  %vm252_vm1 = vcmp.eq.f32.partialorder %v3949_v30, 3.0 }
  0x3d   : > { %v351_v0 = vpack.c.b16 %v349_v63, %v348_v62  ;;  %v356_v5 = vunpack.c.l.b16 %v248_v3  ;;  %v250_v10 = vpack.c.bf16 %v3298_v8, %v3298_v8  ;;  %v251_v11 = vpack.c.bf16 %v3299_v9, %v3299_v9 }
  0x3e   : > { %v357_v6 = vunpack.c.l.b16 %v249_v4  ;;  %vm253_vm2 = vcmp.eq.f32.partialorder %v3951_v31, 3.0  ;;  %v3300_v15 = vsel %vm252_vm1, 1.0, %v3834_v34  ;;  %vm254_vm4 = vcmp.eq.f32.partialorder %v3963_v39, 3.0 }
  0x3f   : > { %v358_v12 = vunpack.c.l.b16 %v250_v10  ;;  %v359_v13 = vunpack.c.l.b16 %v251_v11  ;;  %v3301_v16 = vsel %vm253_vm2, 1.0, %v3834_v34  ;;  %v264_v17 = vpack.c.bf16 %v3300_v15, %v3300_v15 }
  0x40   : > { %v360_v7 = vpack.c.b16 %v357_v6, %v356_v5  ;;  %v265_v18 = vpack.c.bf16 %v3301_v16, %v3301_v16  ;;  %vm255_vm5 = vcmp.eq.f32.partialorder %v3965_v40, 3.0  ;;  %v3302_v23 = vsel %vm254_vm4, 1.0, %v3834_v34 }
  0x41   : > { %v361_v14 = vpack.c.b16 %v359_v13, %v358_v12  ;;  %v366_v19 = vunpack.c.l.b16 %v264_v17  ;;  %v3303_v25 = vsel %vm255_vm5, 1.0, %v3834_v34  ;;  %v266_v27 = vpack.c.bf16 %v3302_v23, %v3302_v23 }
  0x42   : > { %v367_v21 = vunpack.c.l.b16 %v265_v18  ;;  %v267_v28 = vpack.c.bf16 %v3303_v25, %v3303_v25  ;;  %vm268_vm6 = vcmp.eq.f32.partialorder %v3949_v30, 4.0  ;;  %vm269_vm7 = vcmp.eq.f32.partialorder %v3951_v31, 4.0 }
  0x43   : > { %v368_v32 = vunpack.c.l.b16 %v266_v27  ;;  %v3304_v36 = vsel %vm268_vm6, 1.0, %v3834_v34  ;;  %v3305_v37 = vsel %vm269_vm7, 1.0, %v3834_v34  ;;  %vm270_vm8 = vcmp.eq.f32.partialorder %v3963_v39, 4.0 }
  0x44   : > { %v370_v22 = vpack.c.b16 %v367_v21, %v366_v19  ;;  %v369_v33 = vunpack.c.l.b16 %v267_v28  ;;  %v280_v38 = vpack.c.bf16 %v3304_v36, %v3304_v36  ;;  %v281_v41 = vpack.c.bf16 %v3305_v37, %v3305_v37 }
  0x45   : > { %vm271_vm9 = vcmp.eq.f32.partialorder %v3965_v40, 4.0  ;;  %v3306_v46 = vsel %vm270_vm8, 1.0, %v3834_v34  ;;  %vm284_vm10 = vcmp.eq.f32.partialorder %v3949_v30, 5.0  ;;  %vm285_vm12 = vcmp.eq.f32.partialorder %v3951_v31, 5.0 }
  0x46   : > { %v371_v35 = vpack.c.b16 %v369_v33, %v368_v32  ;;  %v376_v42 = vunpack.c.l.b16 %v280_v38  ;;  %v377_v43 = vunpack.c.l.b16 %v281_v41  ;;  %v3307_v47 = vsel %vm271_vm9, 1.0, %v3834_v34 }
  0x47   : > { %v282_v48 = vpack.c.bf16 %v3306_v46, %v3306_v46  ;;  %v283_v49 = vpack.c.bf16 %v3307_v47, %v3307_v47  ;;  %v3308_v55 = vsel %vm284_vm10, 1.0, %v3834_v34  ;;  %v3309_v56 = vsel %vm285_vm12, 1.0, %v3834_v34 }
  0x48   : > { %v380_v44 = vpack.c.b16 %v377_v43, %v376_v42  ;;  %v297_v58 = vpack.c.bf16 %v3309_v56, %v3309_v56  ;;  %v3287_v63 = vsel %vm3928_vm11, 1.0, %v3834_v34  ;;  %vm286_vm14 = vcmp.eq.f32.partialorder %v3963_v39, 5.0 }
  0x49   : > { %v378_v51 = vunpack.c.l.b16 %v282_v48  ;;  %v379_v52 = vunpack.c.l.b16 %v283_v49  ;;  %v4020_v2 = vpack.c.bf16 %v3287_v63, %v3287_v63  ;;  %vm287_vm15 = vcmp.eq.f32.partialorder %v3965_v40, 5.0 }
  0x4a   : > { %3325 = vmatmul.msk.bf16.gmra.mxu0 %vm412_vm3, %v341_v50  ;;  %v387_v62 = vunpack.c.l.b16 %v297_v58  ;;  %v3310_v4 = vsel %vm286_vm14, 1.0, %v3834_v34  ;;  %v3311_v20 = vsel %vm287_vm15, 1.0, %v3834_v34  ;;  %vm300_vm11 = vcmp.eq.f32.partialorder %v3949_v30, 6.0 }
  0x4b   : > { %v381_v53 = vpack.c.b16 %v379_v52, %v378_v51  ;;  %v298_v5 = vpack.c.bf16 %v3310_v4, %v3310_v4  ;;  %v299_v6 = vpack.c.bf16 %v3311_v20, %v3311_v20  ;;  %vm301_vm1 = vcmp.eq.f32.partialorder %v3951_v31, 6.0  ;;  %v3348_v20 = vld [vmem:[%s3908_s17 + $0x20] sm:$0xff] }
  0x4c   : > { %vm318_vm2 = vcmp.eq.f32.partialorder %v3963_v39, 7.0  ;;  %vm319_vm4 = vcmp.eq.f32.partialorder %v3965_v40, 7.0  ;;  %v3312_v16 = vsel %vm300_vm11, 1.0, %v3834_v34  ;;  %v3313_v17 = vsel %vm301_vm1, 1.0, %v3834_v34 }
  0x4d   : > { %v388_v8 = vunpack.c.l.b16 %v298_v5  ;;  %v389_v9 = vunpack.c.l.b16 %v299_v6  ;;  %v3318_v12 = vsel %vm318_vm2, 1.0, %v3834_v34  ;;  %v3319_v13 = vsel %vm319_vm4, 1.0, %v3834_v34  ;;  %v3349_v5 = vld [vmem:[%s3908_s17 + $0x28] sm:$0xff] }
  0x4e   : > { %v331_v15 = vpack.c.bf16 %v3319_v13, %v3319_v13  ;;  %v312_v21 = vpack.c.bf16 %v3312_v16, %v3312_v16  ;;  %vm302_vm5 = vcmp.eq.f32.partialorder %v3963_v39, 6.0  ;;  %vm303_vm6 = vcmp.eq.f32.partialorder %v3965_v40, 6.0 }
  0x4f   : > { %v391_v10 = vpack.c.b16 %v389_v9, %v388_v8  ;;  %v3314_v37 = vsel %vm302_vm5, 1.0, %v3834_v34  ;;  %v3315_v38 = vsel %vm303_vm6, 1.0, %v3834_v34  ;;  %vm316_vm7 = vcmp.eq.f32.partialorder %v3949_v30, 7.0 }
  0x50   : > { %v409_v19 = vunpack.c.l.b16 %v331_v15  ;;  %v396_v28 = vunpack.c.l.b16 %v312_v21  ;;  %v314_v41 = vpack.c.bf16 %v3314_v37, %v3314_v37  ;;  %v315_v42 = vpack.c.bf16 %v3315_v38, %v3315_v38  ;;  %v3351_v21 = vld [vmem:[%s3908_s17 + $0x38] sm:$0xff] }
  0x51   : > { %vm317_vm8 = vcmp.eq.f32.partialorder %v3951_v31, 7.0  ;;  %v3316_v39 = vsel %vm316_vm7, 1.0, %v3834_v34  ;;  %v696_v8 = vmul.f32 8.0, %v3349_v5 }
  0x52   : > { %v3317_v40 = vsel %vm317_vm8, 1.0, %v3834_v34  ;;  %v328_v48 = vpack.c.bf16 %v3316_v39, %v3316_v39 }
  0x53   : > { %v329_v49 = vpack.c.bf16 %v3317_v40, %v3317_v40 }
  0x54   : > { %v406_v52 = vunpack.c.l.b16 %v328_v48 }
  0x5a   : > { %3326 = vmatmul.msk.bf16.gmra.mxu0 %vm412_vm3, %v350_v57  ;;  %v296_v57 = vpack.c.bf16 %v3308_v55, %v3308_v55 }
  0x5c   : > { %v386_v61 = vunpack.c.l.b16 %v296_v57 }
  0x5e   : > { %v390_v1 = vpack.c.b16 %v387_v62, %v386_v61 }
  0x6a   : > { %3327 = vmatmul.msk.bf16.gmra.mxu0 %vm412_vm3, %v351_v0 }
  0x7a   : > { %3328 = vmatmul.msk.bf16.gmra.mxu0 %vm412_vm3, %v360_v7 }
  0x8a   : > { %3329 = vmatmul.msk.bf16.gmra.mxu0 %vm412_vm3, %v361_v14  ;;  %v330_v14 = vpack.c.bf16 %v3318_v12, %v3318_v12 }
  0x8c   : > { %v408_v18 = vunpack.c.l.b16 %v330_v14 }
  0x8e   : > { %v411_v23 = vpack.c.b16 %v409_v19, %v408_v18  ;;  %v3350_v19 = vld [vmem:[%s3908_s17 + $0x30] sm:$0xff] }
  0x90   : > { %3339 = vmatmul.msk.bf16.vlgmr.msra.gmra.mxu2 %vm412_vm3, %v411_v23  ;;  %v697_v23 = vmul.f32 8.0, %v3350_v19 }
  0x9a   : > { %3330 = vmatmul.msk.bf16.gmra.mxu0 %vm412_vm3, %v370_v22  ;;  %v313_v22 = vpack.c.bf16 %v3313_v17, %v3313_v17 }
  0x9c   : > { %v397_v32 = vunpack.c.l.b16 %v313_v22 }
  0xaa   : > { %3331 = vmatmul.msk.bf16.gmra.mxu0 %vm412_vm3, %v371_v35  ;;  %v400_v35 = vpack.c.b16 %v397_v32, %v396_v28  ;;  %v701_v32 = vfloor.f32 %v697_v23 }
  0xb7   : > { %v470_v45 = vpop.f32.mrf.mxu0 }
  0xba   : > { %3332 = vmatmul.msk.bf16.gmra.mxu0 %vm412_vm3, %v380_v44  ;;  %v398_v44 = vunpack.c.l.b16 %v314_v41 }
  0xbf   : > { %v472_v50 = vpop.f32.mrf.mxu0 }
  0xc0   : > { %v550_v0 = vpack.c.bf16 %v472_v50, %v470_v45  ;;  %v399_v45 = vunpack.c.l.b16 %v315_v42  ;;  %v705_v42 = vmax.f32 %v701_v32, 0.0 }
  0xc2   : > { %v401_v46 = vpack.c.b16 %v399_v45, %v398_v44 }
  0xc7   : > { %v475_v54 = vpop.f32.mrf.mxu0 }
  0xca   : > { %3333 = vmatmul.msk.bf16.gmra.mxu0 %vm412_vm3, %v381_v53  ;;  %v407_v53 = vunpack.c.l.b16 %v329_v49 }
  0xcc   : > { %v410_v55 = vpack.c.b16 %v407_v53, %v406_v52 }
  0xcf   : > { %v477_v59 = vpop.f32.mrf.mxu0 }
  0xd0   : > { %v551_v60 = vpack.c.bf16 %v477_v59, %v475_v54 }
  0xd2   : > { %561 = vmatpush.bf16.msra.mxu1 %v551_v60 }
  0xd6   : > { %562 = vmatpush.bf16.msra.mxu1 %v550_v0 }
  0xd7   : > { %v480_v3 = vpop.f32.mrf.mxu0 }
  0xd9   : > { %3340 = vmatmul.msk.bf16.vlgmr.msra.gmra.mxu1 %vm412_vm3, %v4020_v2 }
  0xda   : > { %3334 = vmatmul.msk.bf16.gmra.mxu0 %vm412_vm3, %v390_v1 }
  0xdf   : > { %v482_v7 = vpop.f32.mrf.mxu0 }
  0xe0   : > { %v568_v33 = vpack.c.bf16 %v482_v7, %v480_v3  ;;  %v695_v7 = vmul.f32 8.0, %v3348_v20 }
  0xe2   : > { %v699_v9 = vfloor.f32 %v695_v7 }
  0xe4   : > { %v703_v12 = vmax.f32 %v699_v9, 0.0 }
  0xe6   : > { %v4060_v15 = vmin.f32 %v703_v12, 7.0 }
  0xe7   : > { %v485_v11 = vpop.f32.mrf.mxu0 }
  0xe8   : > { %vm727_vm9 = vcmp.eq.f32.partialorder %v4060_v15, 1.0  ;;  %vm743_vm15 = vcmp.eq.f32.partialorder %v4060_v15, 2.0  ;;  %vm711_vm1 = vcmp.eq.f32.partialorder %v4060_v15, 0.0  ;;  %vm759_vm8 = vcmp.eq.f32.partialorder %v4060_v15, 3.0 }
  0xea   : > { %3335 = vmatmul.msk.bf16.gmra.mxu0 %vm412_vm3, %v391_v10  ;;  %v700_v10 = vfloor.f32 %v696_v8 }
  0xec   : > { %v704_v13 = vmax.f32 %v700_v10, 0.0 }
  0xee   : > { %v4062_v16 = vmin.f32 %v704_v13, 7.0 }
  0xef   : > { %v487_v25 = vpop.f32.mrf.mxu0 }
  0xf0   : > { %v569_v27 = vpack.c.bf16 %v487_v25, %v485_v11  ;;  %vm728_vm10 = vcmp.eq.f32.partialorder %v4062_v16, 1.0  ;;  %v698_v25 = vmul.f32 8.0, %v3351_v21  ;;  %vm744_vm11 = vcmp.eq.f32.partialorder %v4062_v16, 2.0 }
  0xf1   : > { %v3357_v28 = vsel %vm728_vm10, 1.0, %v3834_v34  ;;  %vm712_vm2 = vcmp.eq.f32.partialorder %v4062_v16, 0.0  ;;  %vm681_vm10 = vcmask 64512  }
  0xf2   : > { %576 = vmatpush.bf16.msrb.mxu2 %v569_v27  ;;  %v3356_v27 = vsel %vm727_vm9, 1.0, %v3834_v34  ;;  %v740_v38 = vpack.c.bf16 %v3357_v28, %v3357_v28  ;;  %vm760_vm9 = vcmp.eq.f32.partialorder %v4062_v16, 3.0 }
  0xf3   : > { %v739_v37 = vpack.c.bf16 %v3356_v27, %v3356_v27  ;;  %v3365_v27 = vsel %vm760_vm9, 1.0, %v3834_v34  ;;  %vm808_vm9 = vcmp.eq.f32.partialorder %v4062_v16, 6.0 }
  0xf4   : > { %v854_v45 = vunpack.c.l.b16 %v740_v38 }
  0xf5   : > { %v853_v44 = vunpack.c.l.b16 %v739_v37 }
  0xf6   : > { %577 = vmatpush.bf16.msrb.mxu2 %v568_v33  ;;  %v702_v33 = vfloor.f32 %v698_v25  ;;  %v3364_v25 = vsel %vm759_vm8, 1.0, %v3834_v34  ;;  %vm807_vm8 = vcmp.eq.f32.partialorder %v4060_v15, 6.0 }
  0xf7   : > { %v490_v36 = vpop.f32.mrf.mxu0  ;;  %v857_v39 = vpack.c.b16 %v854_v45, %v853_v44 }
  0xf9   : > { %3341 = vmatmul.msk.bf16.vlgmr.msrb.gmra.mxu2 %vm412_vm3, %v4020_v2 }
  0xfa   : > { %3336 = vmatmul.msk.bf16.gmra.mxu0 %vm412_vm3, %v400_v35 }
  0xff   : > { %v492_v43 = vpop.f32.mrf.mxu0 }
 0x100   : > { %v583_v54 = vpack.c.bf16 %v492_v43, %v490_v36  ;;  %v706_v43 = vmax.f32 %v702_v33, 0.0 }
 0x107   : > { %v495_v47 = vpop.f32.mrf.mxu0 }
 0x10a   : > { %3337 = vmatmul.msk.bf16.gmra.mxu0 %vm412_vm3, %v401_v46  ;;  %v4084_v46 = vmin.f32 %v705_v42, 7.0 }
 0x10c   : > { %vm729_vm12 = vcmp.eq.f32.partialorder %v4084_v46, 1.0  ;;  %vm745_vm4 = vcmp.eq.f32.partialorder %v4084_v46, 2.0  ;;  %vm713_vm6 = vcmp.eq.f32.partialorder %v4084_v46, 0.0 }
 0x10d   : > { %v3358_v48 = vsel %vm729_vm12, 1.0, %v3834_v34  ;;  %vm761_vm12 = vcmp.eq.f32.partialorder %v4084_v46, 3.0 }
 0x10e   : > { %v3366_v44 = vsel %vm761_vm12, 1.0, %v3834_v34  ;;  %vm809_vm12 = vcmp.eq.f32.partialorder %v4084_v46, 6.0 }
 0x10f   : > { %v497_v50 = vpop.f32.mrf.mxu0 }
 0x110   : > { %v584_v51 = vpack.c.bf16 %v497_v50, %v495_v47  ;;  %v4086_v47 = vmin.f32 %v706_v43, 7.0  ;;  %v741_v50 = vpack.c.bf16 %v3358_v48, %v3358_v48 }
 0x112   : > { %591 = vmatpush.bf16.msra.mxu3 %v584_v51  ;;  %vm730_vm14 = vcmp.eq.f32.partialorder %v4086_v47, 1.0  ;;  %vm746_vm5 = vcmp.eq.f32.partialorder %v4086_v47, 2.0  ;;  %vm714_vm7 = vcmp.eq.f32.partialorder %v4086_v47, 0.0 }
 0x113   : > { %v545_v17 = vpop.f32.mrf.mxu2  ;;  %v3359_v49 = vsel %vm730_vm14, 1.0, %v3834_v34  ;;  %v3363_v7 = vsel %vm746_vm5, 1.0, %v3834_v34  ;;  %v3355_v19 = vsel %vm714_vm7, 1.0, %v3834_v34  ;;  %vm762_vm14 = vcmp.eq.f32.partialorder %v4086_v47, 3.0 }
 0x114   : > { %v742_v51 = vpack.c.bf16 %v3359_v49, %v3359_v49  ;;  %v3367_v45 = vsel %vm762_vm14, 1.0, %v3834_v34  ;;  %vm792_vm5 = vcmp.eq.f32.partialorder %v4062_v16, 5.0  ;;  %vm794_vm7 = vcmp.eq.f32.partialorder %v4086_v47, 5.0 }
 0x115   : > { %vm810_vm14 = vcmp.eq.f32.partialorder %v4086_v47, 6.0 }
 0x116   : > { %592 = vmatpush.bf16.msra.mxu3 %v583_v54  ;;  %v855_v54 = vunpack.c.l.b16 %v741_v50 }
 0x117   : > { %v500_v56 = vpop.f32.mrf.mxu0 }
 0x119   : > { %3342 = vmatmul.msk.bf16.vlgmr.msra.gmra.mxu3 %vm412_vm3, %v4020_v2 }
 0x11a   : > { %3338 = vmatmul.msk.bf16.gmra.mxu0 %vm412_vm3, %v410_v55  ;;  %v856_v55 = vunpack.c.l.b16 %v742_v51 }
 0x11b   : > { %v547_v35 = vpop.f32.mrf.mxu2 }
 0x11c   : > { %v659_v36 = vpack.c.bf16 %v547_v35, %v545_v17  ;;  %v771_v35 = vpack.c.bf16 %v3364_v25, %v3364_v25 }
 0x11e   : > { %v873_v38 = vunpack.c.l.b16 %v771_v35 }
 0x11f   : > { %v502_v30 = vpop.f32.mrf.mxu0 }
 0x120   : > { %v598_v59 = vpack.c.bf16 %v502_v30, %v500_v56  ;;  %v858_v30 = vpack.c.b16 %v856_v55, %v855_v54 }
 0x127   : > { %v505_v31 = vpop.f32.mrf.mxu0 }
 0x12f   : > { %v507_v57 = vpop.f32.mrf.mxu0 }
 0x130   : > { %v599_v58 = vpack.c.bf16 %v507_v57, %v505_v31  ;;  %v3360_v57 = vsel %vm743_vm15, 1.0, %v3834_v34  ;;  %vm775_vm15 = vcmp.eq.f32.partialorder %v4060_v15, 4.0 }
 0x131   : > { %v3368_v51 = vsel %vm775_vm15, 1.0, %v3834_v34  ;;  %vm823_vm15 = vcmp.eq.f32.partialorder %v4060_v15, 7.0 }
 0x132   : > { %606 = vmatpush.bf16.msrb.mxu1 %v599_v58  ;;  %v3361_v58 = vsel %vm744_vm11, 1.0, %v3834_v34  ;;  %vm776_vm11 = vcmp.eq.f32.partialorder %v4062_v16, 4.0 }
 0x136   : > { %607 = vmatpush.bf16.msrb.mxu1 %v598_v59  ;;  %v755_v59 = vpack.c.bf16 %v3360_v57, %v3360_v57 }
 0x137   : > { %v510_v60 = vpop.f32.mrf.mxu0 }
 0x139   : > { %3343 = vmatmul.msk.bf16.vlgmr.msrb.gmra.mxu1 %vm412_vm3, %v4020_v2 }
 0x13f   : > { %v512_v61 = vpop.f32.mrf.mxu0 }
 0x140   : > { %v613_v1 = vpack.c.bf16 %v512_v61, %v510_v60  ;;  %v756_v60 = vpack.c.bf16 %v3361_v58, %v3361_v58 }
 0x147   : > { %v515_v62 = vpop.f32.mrf.mxu0 }
 0x14f   : > { %v517_v63 = vpop.f32.mrf.mxu0 }
 0x150   : > { %v614_v0 = vpack.c.bf16 %v517_v63, %v515_v62  ;;  %v863_v63 = vunpack.c.l.b16 %v755_v59 }
 0x152   : > { %621 = vmatpush.bf16.msra.mxu2 %v614_v0  ;;  %v864_v0 = vunpack.c.l.b16 %v756_v60 }
 0x156   : > { %622 = vmatpush.bf16.msra.mxu2 %v613_v1  ;;  %v867_v1 = vpack.c.b16 %v864_v0, %v863_v63 }
 0x157   : > { %v520_v3 = vpop.f32.mrf.mxu0 }
 0x159   : > { %3344 = vmatmul.msk.bf16.vlgmr.msra.gmra.mxu2 %vm412_vm3, %v4020_v2 }
 0x15a   : > { %666 = vmatpush.bf16.msrb.mxu2 %v659_v36  ;;  %v772_v36 = vpack.c.bf16 %v3365_v27, %v3365_v27 }
 0x15f   : > { %v522_v4 = vpop.f32.mrf.mxu0 }
 0x160   : > { %v628_v18 = vpack.c.bf16 %v522_v4, %v520_v3  ;;  %v3352_v3 = vsel %vm711_vm1, 1.0, %v3834_v34  ;;  %v3353_v4 = vsel %vm712_vm2, 1.0, %v3834_v34  ;;  %vm777_vm1 = vcmp.eq.f32.partialorder %v4084_v46, 4.0 }
 0x161   : > { %v723_v20 = vpack.c.bf16 %v3352_v3, %v3352_v3  ;;  %v724_v5 = vpack.c.bf16 %v3353_v4, %v3353_v4  ;;  %vm778_vm2 = vcmp.eq.f32.partialorder %v4086_v47, 4.0  ;;  %v3370_v58 = vsel %vm777_vm1, 1.0, %v3834_v34 }
 0x162   : > { %v3371_v59 = vsel %vm778_vm2, 1.0, %v3834_v34  ;;  %vm825_vm1 = vcmp.eq.f32.partialorder %v4084_v46, 7.0  ;;  %vm826_vm2 = vcmp.eq.f32.partialorder %v4086_v47, 7.0 }
 0x163   : > { %v843_v8 = vunpack.c.l.b16 %v723_v20  ;;  %v844_v9 = vunpack.c.l.b16 %v724_v5  ;;  %v3373_v5 = vsel %vm792_vm5, 1.0, %v3834_v34 }
 0x165   : > { %v847_v12 = vpack.c.b16 %v844_v9, %v843_v8  ;;  %v804_v9 = vpack.c.bf16 %v3373_v5, %v3373_v5 }
 0x167   : > { %v525_v6 = vpop.f32.mrf.mxu0 }
 0x16f   : > { %v527_v11 = vpop.f32.mrf.mxu0 }
 0x170   : > { %v629_v14 = vpack.c.bf16 %v527_v11, %v525_v6  ;;  %v3362_v6 = vsel %vm745_vm4, 1.0, %v3834_v34  ;;  %v758_v11 = vpack.c.bf16 %v3363_v7, %v3363_v7  ;;  %vm791_vm4 = vcmp.eq.f32.partialorder %v4060_v15, 5.0  ;;  %v3421_v15 = vld [vmem:[%s3908_s17 + $0x48] sm:$0xff] }
 0x171   : > { %v757_v10 = vpack.c.bf16 %v3362_v6, %v3362_v6  ;;  %v3372_v20 = vsel %vm791_vm4, 1.0, %v3834_v34 }
 0x172   : > { %636 = vmatpush.bf16.msrb.mxu3 %v629_v14  ;;  %v866_v14 = vunpack.c.l.b16 %v758_v11  ;;  %v803_v8 = vpack.c.bf16 %v3372_v20, %v3372_v20 }
 0x173   : > { %v865_v13 = vunpack.c.l.b16 %v757_v10 }
 0x174   : > { %v893_v11 = vunpack.c.l.b16 %v803_v8 }
 0x175   : > { %v868_v17 = vpack.c.b16 %v866_v14, %v865_v13 }
 0x176   : > { %637 = vmatpush.bf16.msrb.mxu3 %v628_v18  ;;  %v3354_v18 = vsel %vm713_vm6, 1.0, %v3834_v34  ;;  %vm793_vm6 = vcmp.eq.f32.partialorder %v4084_v46, 5.0 }
 0x177   : > { %v530_v22 = vpop.f32.mrf.mxu0  ;;  %v725_v21 = vpack.c.bf16 %v3354_v18, %v3354_v18  ;;  %v3375_v18 = vsel %vm794_vm7, 1.0, %v3834_v34 }
 0x179   : > { %3345 = vmatmul.msk.bf16.vlgmr.msrb.gmra.mxu3 %vm412_vm3, %v4020_v2  ;;  %v845_v32 = vunpack.c.l.b16 %v725_v21 }
 0x17a   : > { %3716 = vmatpush.bf16.msk.msra.mxu3 %vm3934_vm13, %v3833_v26 }
 0x17e   : > { %3717 = vmatpush.bf16.msk.msra.mxu3 %vm3945_vm0, %v3833_v26 }
 0x17f   : > { %v532_v41 = vpop.f32.mrf.mxu0 }
 0x180   : > { %v643_v56 = vpack.c.bf16 %v532_v41, %v530_v22  ;;  %v726_v22 = vpack.c.bf16 %v3355_v19, %v3355_v19  ;;  %v874_v41 = vunpack.c.l.b16 %v772_v36 }
 0x182   : > { %3718 = vmatpush.bf16.msk.msrb.mxu3 %vm3934_vm13, %v3833_v26  ;;  %v846_v33 = vunpack.c.l.b16 %v726_v22  ;;  %v877_v43 = vpack.c.b16 %v874_v41, %v873_v38  ;;  %v806_v22 = vpack.c.bf16 %v3375_v18, %v3375_v18 }
 0x184   : > { %v848_v37 = vpack.c.b16 %v846_v33, %v845_v32  ;;  %v896_v25 = vunpack.c.l.b16 %v806_v22  ;;  %v3376_v32 = vsel %vm807_vm8, 1.0, %v3834_v34  ;;  %v3377_v33 = vsel %vm808_vm9, 1.0, %v3834_v34 }
 0x185   : > { %v819_v36 = vpack.c.bf16 %v3376_v32, %v3376_v32 }
 0x186   : > { %3719 = vmatpush.bf16.msk.msrb.mxu3 %vm3945_vm0, %v3833_v26 }
 0x187   : > { %v535_v40 = vpop.f32.mrf.mxu0  ;;  %v903_v38 = vunpack.c.l.b16 %v819_v36 }
 0x189   : > { %3390 = vmatmul.msk.bf16.vlgmr.msra.gmra.mxu3 %vm412_vm3, %v857_v39  ;;  %v773_v39 = vpack.c.bf16 %v3366_v44, %v3366_v44 }
 0x18b   : > { %v875_v48 = vunpack.c.l.b16 %v773_v39 }
 0x18f   : > { %v537_v52 = vpop.f32.mrf.mxu0 }
 0x190   : > { %v644_v53 = vpack.c.bf16 %v537_v52, %v535_v40  ;;  %v774_v40 = vpack.c.bf16 %v3367_v45, %v3367_v45  ;;  %v3369_v52 = vsel %vm776_vm11, 1.0, %v3834_v34  ;;  %vm824_vm11 = vcmp.eq.f32.partialorder %v4062_v16, 7.0 }
 0x191   : > { %v788_v54 = vpack.c.bf16 %v3369_v52, %v3369_v52 }
 0x192   : > { %651 = vmatpush.bf16.msra.mxu1 %v644_v53  ;;  %v876_v49 = vunpack.c.l.b16 %v774_v40  ;;  %v787_v53 = vpack.c.bf16 %v3368_v51, %v3368_v51 }
 0x194   : > { %v878_v50 = vpack.c.b16 %v876_v49, %v875_v48  ;;  %v883_v55 = vunpack.c.l.b16 %v787_v53  ;;  %v3378_v48 = vsel %vm809_vm12, 1.0, %v3834_v34  ;;  %v3379_v49 = vsel %vm810_vm14, 1.0, %v3834_v34 }
 0x195   : > { %v821_v51 = vpack.c.bf16 %v3378_v48, %v3378_v48  ;;  %v822_v52 = vpack.c.bf16 %v3379_v49, %v3379_v49 }
 0x196   : > { %652 = vmatpush.bf16.msra.mxu1 %v643_v56  ;;  %v884_v56 = vunpack.c.l.b16 %v788_v54 }
 0x197   : > { %v540_v31 = vpop.f32.mrf.mxu0  ;;  %v905_v54 = vunpack.c.l.b16 %v821_v51 }
 0x199   : > { %3391 = vmatmul.msk.bf16.gmra.mxu3 %vm412_vm3, %v858_v30  ;;  %3346 = vmatmul.msk.bf16.vlgmr.msra.gmra.mxu1 %vm412_vm3, %v4020_v2  ;;  %v579_v30 = vpop.f32.mrf.mxu2 }
 0x19a   : > { %v674_v57 = vmul.f32 0.0625, %v579_v30 }
 0x19c   : > { %v594_v23 = vpop.f32.mrf.mxu3  ;;  %683 = vst.msk [vmem:[%s4130_s19 + $0x8] sm:$0xff] %vm681_vm10, %v674_v57 }
 0x19d   : > { %v675_v28 = vmul.f32 0.0625, %v594_v23 }
 0x19f   : > { %v542_v61 = vpop.f32.mrf.mxu0  ;;  %684 = vst.msk [vmem:[%s4130_s19 + $0x10] sm:$0xff] %vm681_vm10, %v675_v28 }
 0x1a0   : > { %v658_v62 = vpack.c.bf16 %v542_v61, %v540_v31  ;;  %v887_v31 = vpack.c.b16 %v884_v56, %v883_v55  ;;  %v789_v61 = vpack.c.bf16 %v3370_v58, %v3370_v58  ;;  %v906_v55 = vunpack.c.l.b16 %v822_v52 }
 0x1a1   : > { %v581_v60 = vpop.f32.mrf.mxu2 }
 0x1a2   : > { %667 = vmatpush.bf16.msrb.mxu2 %v658_v62  ;;  %v790_v62 = vpack.c.bf16 %v3371_v59, %v3371_v59  ;;  %v885_v63 = vunpack.c.l.b16 %v789_v61  ;;  %v908_v30 = vpack.c.b16 %v906_v55, %v905_v54 }
 0x1a4   : > { %v596_v42 = vpop.f32.mrf.mxu3  ;;  %v886_v0 = vunpack.c.l.b16 %v790_v62 }
 0x1a5   : > { %3347 = vmatmul.msk.bf16.vlgmr.msrb.gmra.mxu2 %vm412_vm3, %v4020_v2 }
 0x1a6   : > { %3385 = vmatpush.bf16.msk.msra.mxu2 %vm3934_vm13, %v3833_v26 }
 0x1a9   : > { %3392 = vmatmul.msk.bf16.gmra.mxu3 %vm412_vm3, %v867_v1  ;;  %v888_v1 = vpack.c.b16 %v886_v0, %v885_v63 }
 0x1aa   : > { %3387 = vmatpush.bf16.msk.msra.mxu2 %vm3945_vm0, %v3833_v26 }
 0x1b5   : > { %3388 = vmatmul.msk.bf16.vlgmr.msra.gmra.mxu2 %vm412_vm3, %v847_v12  ;;  %v894_v12 = vunpack.c.l.b16 %v804_v9 }
 0x1b7   : > { %v897_v14 = vpack.c.b16 %v894_v12, %v893_v11 }
 0x1b9   : > { %3393 = vmatmul.msk.bf16.gmra.mxu3 %vm412_vm3, %v868_v17  ;;  %v3374_v17 = vsel %vm793_vm6, 1.0, %v3834_v34 }
 0x1ba   : > { %v805_v21 = vpack.c.bf16 %v3374_v17, %v3374_v17 }
 0x1bc   : > { %v895_v23 = vunpack.c.l.b16 %v805_v21 }
 0x1be   : > { %v898_v28 = vpack.c.b16 %v896_v25, %v895_v23  ;;  %v3380_v25 = vsel %vm823_vm15, 1.0, %v3834_v34 }
 0x1c5   : > { %3389 = vmatmul.msk.bf16.gmra.mxu2 %vm412_vm3, %v848_v37  ;;  %v820_v37 = vpack.c.bf16 %v3377_v33, %v3377_v33 }
 0x1c7   : > { %v904_v41 = vunpack.c.l.b16 %v820_v37 }
 0x1c9   : > { %3394 = vmatmul.msk.bf16.gmra.mxu3 %vm412_vm3, %v877_v43  ;;  %v907_v44 = vpack.c.b16 %v904_v41, %v903_v38  ;;  %v3420_v38 = vld [vmem:[%s3908_s17 + $0x40] sm:$0xff] }
 0x1ca   : > { %v1198_v41 = vmul.f32 8.0, %v3420_v38 }
 0x1cc   : > { %v1202_v51 = vfloor.f32 %v1198_v41 }
 0x1d9   : > { %3395 = vmatmul.msk.bf16.gmra.mxu3 %vm412_vm3, %v878_v50 }
 0x1dc   : > { %v624_v3 = vpop.f32.mrf.mxu2 }
 0x1dd   : > { %v677_v4 = vmul.f32 0.0625, %v624_v3 }
 0x1df   : > { %686 = vst.msk [vmem:[%s4130_s19 + $0x20] sm:$0xff] %vm681_vm10, %v677_v4 }
 0x1e4   : > { %v626_v10 = vpop.f32.mrf.mxu2 }
 0x1e9   : > { %3396 = vmatmul.msk.bf16.gmra.mxu3 %vm412_vm3, %v887_v31 }
 0x1f9   : > { %3397 = vmatmul.msk.bf16.gmra.mxu3 %vm412_vm3, %v888_v1 }
 0x1fc   : > { %v639_v6 = vpop.f32.mrf.mxu3 }
 0x1fd   : > { %v678_v7 = vmul.f32 0.0625, %v639_v6 }
 0x1ff   : > { %687 = vst.msk [vmem:[%s4130_s19 + $0x28] sm:$0xff] %vm681_vm10, %v678_v7 }
 0x204   : > { %v641_v13 = vpop.f32.mrf.mxu3 }
 0x209   : > { %3398 = vmatmul.msk.bf16.gmra.mxu3 %vm412_vm3, %v897_v14 }
 0x20c   : > { %v986_v19 = vpop.f32.mrf.mxu3 }
 0x214   : > { %v988_v27 = vpop.f32.mrf.mxu3 }
 0x215   : > { %v1071_v39 = vpack.c.bf16 %v988_v27, %v986_v19  ;;  %v3381_v27 = vsel %vm824_vm11, 1.0, %v3834_v34 }
 0x216   : > { %v836_v32 = vpack.c.bf16 %v3381_v27, %v3381_v27 }
 0x219   : > { %3399 = vmatmul.msk.bf16.gmra.mxu3 %vm412_vm3, %v898_v28  ;;  %v835_v28 = vpack.c.bf16 %v3380_v25, %v3380_v25 }
 0x21b   : > { %v913_v33 = vunpack.c.l.b16 %v835_v28 }
 0x21c   : > { %v991_v35 = vpop.f32.mrf.mxu3 }
 0x224   : > { %v993_v42 = vpop.f32.mrf.mxu3 }
 0x225   : > { %v1072_v43 = vpack.c.bf16 %v993_v42, %v991_v35  ;;  %v914_v35 = vunpack.c.l.b16 %v836_v32  ;;  %v1199_v42 = vmul.f32 8.0, %v3421_v15 }
 0x227   : > { %1079 = vmatpush.bf16.msrb.mxu2 %v1072_v43  ;;  %v917_v36 = vpack.c.b16 %v914_v35, %v913_v33  ;;  %v3382_v43 = vsel %vm825_vm1, 1.0, %v3834_v34  ;;  %v1203_v52 = vfloor.f32 %v1199_v42 }
 0x228   : > { %v669_v45 = vpop.f32.mrf.mxu2 }
 0x229   : > { %v680_v40 = vmul.f32 0.0625, %v669_v45  ;;  %3400 = vmatmul.msk.bf16.gmra.mxu3 %vm412_vm3, %v907_v44  ;;  %v3383_v44 = vsel %vm826_vm2, 1.0, %v3834_v34  ;;  %v837_v45 = vpack.c.bf16 %v3382_v43, %v3382_v43  ;;  %v1207_v54 = vmax.f32 %v1203_v52, 0.0 }
 0x22b   : > { %689 = vst.msk [vmem:[%s4130_s19 + $0x38] sm:$0xff] %vm681_vm10, %v680_v40  ;;  %1080 = vmatpush.bf16.msrb.mxu2 %v1071_v39  ;;  %v838_v39 = vpack.c.bf16 %v3383_v44, %v3383_v44  ;;  %v564_v40 = vpop.f32.mrf.mxu1  ;;  %v915_v49 = vunpack.c.l.b16 %v837_v45 }
 0x22c   : > { %v996_v50 = vpop.f32.mrf.mxu3  ;;  %v673_v48 = vmul.f32 0.0625, %v564_v40 }
 0x22e   : > { %3405 = vmatmul.msk.bf16.vlgmr.msrb.gmra.mxu2 %vm412_vm3, %v4020_v2  ;;  %682 = vst.msk [vmem:[%s4130_s19] sm:$0xff] %vm681_vm10, %v673_v48 }
 0x230   : > { %v671_v53 = vpop.f32.mrf.mxu2 }
 0x231   : > { %v1206_v53 = vmax.f32 %v1202_v51, 0.0 }
 0x234   : > { %v998_v56 = vpop.f32.mrf.mxu3 }
 0x235   : > { %v1086_v4 = vpack.c.bf16 %v998_v56, %v996_v50  ;;  %v916_v50 = vunpack.c.l.b16 %v838_v39  ;;  %v566_v56 = vpop.f32.mrf.mxu1 }
 0x237   : > { %v918_v46 = vpack.c.b16 %v916_v50, %v915_v49 }
 0x238   : > { %v976_v31 = vpop.f32.mrf.mxu2 }
 0x239   : > { %3401 = vmatmul.msk.bf16.gmra.mxu3 %vm412_vm3, %v908_v30  ;;  %v4207_v30 = vmin.f32 %v1206_v53, 7.0 }
 0x23b   : > { %vm1214_vm4 = vcmp.eq.f32.partialorder %v4207_v30, 0.0  ;;  %vm1230_vm8 = vcmp.eq.f32.partialorder %v4207_v30, 1.0  ;;  %vm1294_vm15 = vcmp.eq.f32.partialorder %v4207_v30, 5.0  ;;  %vm1246_vm1 = vcmp.eq.f32.partialorder %v4207_v30, 2.0 }
 0x23c   : > { %v1001_v57 = vpop.f32.mrf.mxu3  ;;  %v3428_v33 = vsel %vm1230_vm8, 1.0, %v3834_v34  ;;  %v3444_v52 = vsel %vm1294_vm15, 1.0, %v3834_v34  ;;  %vm1310_vm8 = vcmp.eq.f32.partialorder %v4207_v30, 6.0 }
 0x240   : > { %v978_v58 = vpop.f32.mrf.mxu2 }
 0x241   : > { %v1056_v0 = vpack.c.bf16 %v978_v58, %v976_v31  ;;  %v4209_v31 = vmin.f32 %v1207_v54, 7.0  ;;  %v3422_v58 = vld [vmem:[%s3908_s17 + $0x50] sm:$0xff] }
 0x243   : > { %vm1215_vm5 = vcmp.eq.f32.partialorder %v4209_v31, 0.0  ;;  %vm1231_vm9 = vcmp.eq.f32.partialorder %v4209_v31, 1.0  ;;  %vm1295_vm11 = vcmp.eq.f32.partialorder %v4209_v31, 5.0  ;;  %vm1247_vm2 = vcmp.eq.f32.partialorder %v4209_v31, 2.0 }
 0x244   : > { %v1003_v59 = vpop.f32.mrf.mxu3  ;;  %v3429_v35 = vsel %vm1231_vm9, 1.0, %v3834_v34  ;;  %vm1311_vm9 = vcmp.eq.f32.partialorder %v4209_v31, 6.0 }
 0x245   : > { %v1087_v3 = vpack.c.bf16 %v1003_v59, %v1001_v57  ;;  %v3423_v59 = vld [vmem:[%s3908_s17 + $0x58] sm:$0xff]  ;;  %v1243_v38 = vpack.c.bf16 %v3429_v35, %v3429_v35 }
 0x248   : > { %v981_v60 = vpop.f32.mrf.mxu2 }
 0x249   : > { %3402 = vmatmul.msk.bf16.gmra.mxu3 %vm412_vm3, %v917_v36 }
 0x24c   : > { %v1006_v61 = vpop.f32.mrf.mxu3 }
 0x250   : > { %v983_v62 = vpop.f32.mrf.mxu2 }
 0x251   : > { %v1057_v63 = vpack.c.bf16 %v983_v62, %v981_v60  ;;  %v1200_v60 = vmul.f32 8.0, %v3422_v58  ;;  %v609_v62 = vpop.f32.mrf.mxu1 }
 0x253   : > { %1064 = vmatpush.bf16.msrb.mxu1 %v1057_v63  ;;  %v3424_v63 = vsel %vm1214_vm4, 1.0, %v3834_v34 }
 0x254   : > { %v1008_v1 = vpop.f32.mrf.mxu3 }
 0x255   : > { %v1101_v7 = vpack.c.bf16 %v1008_v1, %v1006_v61  ;;  %v1201_v61 = vmul.f32 8.0, %v3423_v59  ;;  %v676_v1 = vmul.f32 0.0625, %v609_v62  ;;  %v3432_v59 = vsel %vm1246_vm1, 1.0, %v3834_v34 }
 0x256   : > { %v1258_v62 = vpack.c.bf16 %v3432_v59, %v3432_v59 }
 0x257   : > { %1065 = vmatpush.bf16.msrb.mxu1 %v1056_v0  ;;  %v3425_v0 = vsel %vm1215_vm5, 1.0, %v3834_v34  ;;  %685 = vst.msk [vmem:[%s4130_s19 + $0x18] sm:$0xff] %vm681_vm10, %v676_v1 }
 0x259   : > { %3403 = vmatmul.msk.bf16.gmra.mxu3 %vm412_vm3, %v918_v46  ;;  %v3445_v46 = vsel %vm1295_vm11, 1.0, %v3834_v34 }
 0x25a   : > { %3404 = vmatmul.msk.bf16.vlgmr.msrb.gmra.mxu1 %vm412_vm3, %v4020_v2  ;;  %v1307_v53 = vpack.c.bf16 %v3445_v46, %v3445_v46 }
 0x25b   : > { %1094 = vmatpush.bf16.msra.mxu1 %v1087_v3  ;;  %v1204_v3 = vfloor.f32 %v1200_v60  ;;  %v3433_v60 = vsel %vm1247_vm2, 1.0, %v3834_v34 }
 0x25c   : > { %v1011_v20 = vpop.f32.mrf.mxu3  ;;  %v1397_v56 = vunpack.c.l.b16 %v1307_v53 }
 0x25f   : > { %1095 = vmatpush.bf16.msra.mxu1 %v1086_v4  ;;  %v1205_v4 = vfloor.f32 %v1201_v61 }
 0x264   : > { %v1013_v5 = vpop.f32.mrf.mxu3 }
 0x265   : > { %v1102_v6 = vpack.c.bf16 %v1013_v5, %v1011_v20  ;;  %v1226_v20 = vpack.c.bf16 %v3424_v63, %v3424_v63  ;;  %v1227_v5 = vpack.c.bf16 %v3425_v0, %v3425_v0  ;;  %v1259_v63 = vpack.c.bf16 %v3433_v60, %v3433_v60 }
 0x266   : > { %v1366_v0 = vunpack.c.l.b16 %v1258_v62 }
 0x267   : > { %1109 = vmatpush.bf16.msra.mxu2 %v1102_v6  ;;  %v1208_v6 = vmax.f32 %v1204_v3, 0.0  ;;  %v1367_v1 = vunpack.c.l.b16 %v1259_v63 }
 0x26a   : > { %3406 = vmatmul.msk.bf16.vlgmr.msra.gmra.mxu1 %vm412_vm3, %v4020_v2 }
 0x26b   : > { %1110 = vmatpush.bf16.msra.mxu2 %v1101_v7  ;;  %v1209_v7 = vmax.f32 %v1205_v4, 0.0 }
 0x26c   : > { %v1016_v8 = vpop.f32.mrf.mxu3 }
 0x26e   : > { %3407 = vmatmul.msk.bf16.vlgmr.msra.gmra.mxu2 %vm412_vm3, %v4020_v2 }
 0x274   : > { %v1018_v9 = vpop.f32.mrf.mxu3 }
 0x275   : > { %v1116_v13 = vpack.c.bf16 %v1018_v9, %v1016_v8  ;;  %v1346_v8 = vunpack.c.l.b16 %v1226_v20  ;;  %v1347_v9 = vunpack.c.l.b16 %v1227_v5 }
 0x27c   : > { %v1021_v10 = vpop.f32.mrf.mxu3 }
 0x284   : > { %v1023_v11 = vpop.f32.mrf.mxu3 }
 0x285   : > { %v1117_v12 = vpack.c.bf16 %v1023_v11, %v1021_v10  ;;  %v611_v10 = vpop.f32.mrf.mxu1  ;;  %v4227_v11 = vmin.f32 %v1208_v6, 7.0 }
 0x287   : > { %1124 = vmatpush.bf16.msrb.mxu1 %v1117_v12  ;;  %v4229_v12 = vmin.f32 %v1209_v7, 7.0  ;;  %vm1216_vm6 = vcmp.eq.f32.partialorder %v4227_v11, 0.0  ;;  %vm1232_vm12 = vcmp.eq.f32.partialorder %v4227_v11, 1.0  ;;  %vm1296_vm4 = vcmp.eq.f32.partialorder %v4227_v11, 5.0 }
 0x288   : > { %v3430_v44 = vsel %vm1232_vm12, 1.0, %v3834_v34  ;;  %v3446_v4 = vsel %vm1296_vm4, 1.0, %v3834_v34  ;;  %v1370_v7 = vpack.c.b16 %v1367_v1, %v1366_v0  ;;  %vm1262_vm12 = vcmp.eq.f32.partialorder %v4207_v30, 3.0 }
 0x289   : > { %vm1217_vm7 = vcmp.eq.f32.partialorder %v4229_v12, 0.0  ;;  %vm1233_vm14 = vcmp.eq.f32.partialorder %v4229_v12, 1.0  ;;  %v1244_v40 = vpack.c.bf16 %v3430_v44, %v3430_v44  ;;  %vm1297_vm5 = vcmp.eq.f32.partialorder %v4229_v12, 5.0 }
 0x28a   : > { %v3431_v45 = vsel %vm1233_vm14, 1.0, %v3834_v34  ;;  %v3447_v20 = vsel %vm1297_vm5, 1.0, %v3834_v34  ;;  %v1308_v5 = vpack.c.bf16 %v3446_v4, %v3446_v4  ;;  %vm1263_vm14 = vcmp.eq.f32.partialorder %v4209_v31, 3.0 }
 0x28b   : > { %1125 = vmatpush.bf16.msrb.mxu1 %v1116_v13  ;;  %v1350_v13 = vpack.c.b16 %v1347_v9, %v1346_v8  ;;  %v1245_v48 = vpack.c.bf16 %v3431_v45, %v3431_v45  ;;  %v1358_v49 = vunpack.c.l.b16 %v1244_v40  ;;  %v1309_v6 = vpack.c.bf16 %v3447_v20, %v3447_v20 }
 0x28c   : > { %v1026_v14 = vpop.f32.mrf.mxu3  ;;  %v1398_v8 = vunpack.c.l.b16 %v1308_v5  ;;  %vm1312_vm15 = vcmp.eq.f32.partialorder %v4227_v11, 6.0  ;;  %vm1313_vm11 = vcmp.eq.f32.partialorder %v4229_v12, 6.0  ;;  %vm1264_vm1 = vcmp.eq.f32.partialorder %v4227_v11, 3.0 }
 0x28d   : > { %v1359_v50 = vunpack.c.l.b16 %v1245_v48  ;;  %v1399_v9 = vunpack.c.l.b16 %v1309_v6  ;;  %v3451_v44 = vsel %vm1313_vm11, 1.0, %v3834_v34  ;;  %vm1265_vm2 = vcmp.eq.f32.partialorder %v4229_v12, 3.0 }
 0x28e   : > { %3408 = vmatmul.msk.bf16.vlgmr.msrb.gmra.mxu1 %vm412_vm3, %v4020_v2  ;;  %v3439_v46 = vsel %vm1265_vm2, 1.0, %v3834_v34  ;;  %vm1326_vm4 = vcmp.eq.f32.partialorder %v4207_v30, 7.0  ;;  %vm1327_vm5 = vcmp.eq.f32.partialorder %v4209_v31, 7.0 }
 0x28f   : > { %v1361_v54 = vpack.c.b16 %v1359_v50, %v1358_v49  ;;  %v1401_v10 = vpack.c.b16 %v1399_v9, %v1398_v8  ;;  %v1277_v53 = vpack.c.bf16 %v3439_v46, %v3439_v46 }
 0x294   : > { %v1028_v17 = vpop.f32.mrf.mxu3 }
 0x295   : > { %v1131_v22 = vpack.c.bf16 %v1028_v17, %v1026_v14  ;;  %v654_v14 = vpop.f32.mrf.mxu1  ;;  %v3426_v17 = vsel %vm1216_vm6, 1.0, %v3834_v34  ;;  %vm1248_vm6 = vcmp.eq.f32.partialorder %v4227_v11, 2.0 }
 0x29c   : > { %v1031_v18 = vpop.f32.mrf.mxu3 }
 0x29d   : > { %v656_v27 = vpop.f32.mrf.mxu1 }
 0x2a4   : > { %v1033_v19 = vpop.f32.mrf.mxu3 }
 0x2a5   : > { %v1132_v21 = vpack.c.bf16 %v1033_v19, %v1031_v18  ;;  %v3427_v18 = vsel %vm1217_vm7, 1.0, %v3834_v34  ;;  %v679_v19 = vmul.f32 0.0625, %v654_v14  ;;  %vm1249_vm7 = vcmp.eq.f32.partialorder %v4229_v12, 2.0 }
 0x2a6   : > { %v3435_v14 = vsel %vm1249_vm7, 1.0, %v3834_v34  ;;  %vm1279_vm7 = vcmp.eq.f32.partialorder %v4209_v31, 4.0 }
 0x2a7   : > { %1139 = vmatpush.bf16.msrb.mxu2 %v1132_v21  ;;  %688 = vst.msk [vmem:[%s4130_s19 + $0x30] sm:$0xff] %vm681_vm10, %v679_v19  ;;  %v1228_v21 = vpack.c.bf16 %v3426_v17, %v3426_v17  ;;  %v3441_v5 = vsel %vm1279_vm7, 1.0, %v3834_v34 }
 0x2a8   : > { %v1291_v9 = vpack.c.bf16 %v3441_v5, %v3441_v5 }
 0x2ab   : > { %1140 = vmatpush.bf16.msrb.mxu2 %v1131_v22  ;;  %v1229_v22 = vpack.c.bf16 %v3427_v18, %v3427_v18  ;;  %v1261_v18 = vpack.c.bf16 %v3435_v14, %v3435_v14 }
 0x2ac   : > { %v1036_v23 = vpop.f32.mrf.mxu3 }
 0x2ad   : > { %v1349_v25 = vunpack.c.l.b16 %v1229_v22  ;;  %v3448_v22 = vsel %vm1310_vm8, 1.0, %v3834_v34  ;;  %vm1328_vm8 = vcmp.eq.f32.partialorder %v4227_v11, 7.0 }
 0x2ae   : > { %3409 = vmatmul.msk.bf16.vlgmr.msrb.gmra.mxu2 %vm412_vm3, %v4020_v2 }
 0x2b4   : > { %v1038_v37 = vpop.f32.mrf.mxu3 }
 0x2b5   : > { %v1146_v57 = vpack.c.bf16 %v1038_v37, %v1036_v23  ;;  %v1348_v23 = vunpack.c.l.b16 %v1228_v21  ;;  %v1242_v37 = vpack.c.bf16 %v3428_v33, %v3428_v33  ;;  %v1369_v21 = vunpack.c.l.b16 %v1261_v18 }
 0x2b7   : > { %v1351_v28 = vpack.c.b16 %v1349_v25, %v1348_v23  ;;  %v1356_v15 = vunpack.c.l.b16 %v1242_v37  ;;  %v3449_v23 = vsel %vm1311_vm9, 1.0, %v3834_v34  ;;  %v1322_v25 = vpack.c.bf16 %v3448_v22, %v3448_v22 }
 0x2b8   : > { %v1323_v27 = vpack.c.bf16 %v3449_v23, %v3449_v23  ;;  %v3437_v37 = vsel %vm1263_vm14, 1.0, %v3834_v34  ;;  %vm1329_vm9 = vcmp.eq.f32.partialorder %v4229_v12, 7.0  ;;  %vm1281_vm14 = vcmp.eq.f32.partialorder %v4229_v12, 4.0 }
 0x2b9   : > { %v3455_v14 = vsel %vm1329_vm9, 1.0, %v3834_v34 }
 0x2ba   : > { %v1407_v33 = vunpack.c.l.b16 %v1323_v27  ;;  %v1341_v18 = vpack.c.bf16 %v3455_v14, %v3455_v14 }
 0x2bc   : > { %v1041_v16 = vpop.f32.mrf.mxu3  ;;  %v1419_v23 = vunpack.c.l.b16 %v1341_v18 }
 0x2c4   : > { %v1043_v47 = vpop.f32.mrf.mxu3 }
 0x2c5   : > { %v1147_v55 = vpack.c.bf16 %v1043_v47, %v1041_v16  ;;  %v1357_v16 = vunpack.c.l.b16 %v1243_v38  ;;  %v1306_v47 = vpack.c.bf16 %v3444_v52, %v3444_v52  ;;  %v3438_v52 = vsel %vm1264_vm1, 1.0, %v3834_v34 }
 0x2c7   : > { %1154 = vmatpush.bf16.msra.mxu1 %v1147_v55  ;;  %v1360_v42 = vpack.c.b16 %v1357_v16, %v1356_v15  ;;  %v1396_v55 = vunpack.c.l.b16 %v1306_v47  ;;  %v1275_v15 = vpack.c.bf16 %v3437_v37, %v3437_v37  ;;  %v1276_v47 = vpack.c.bf16 %v3438_v52, %v3438_v52 }
 0x2cb   : > { %1155 = vmatpush.bf16.msra.mxu1 %v1146_v57  ;;  %v1400_v57 = vpack.c.b16 %v1397_v56, %v1396_v55  ;;  %v1379_v55 = vunpack.c.l.b16 %v1277_v53 }
 0x2cd   : > { %3470 = vmatmul.msk.bf16.vlgmr.msrb.gmra.mxu3 %vm412_vm3, %v1400_v57  ;;  %v3452_v57 = vsel %vm1326_vm4, 1.0, %v3834_v34 }
 0x2ce   : > { %3410 = vmatmul.msk.bf16.vlgmr.msra.gmra.mxu1 %vm412_vm3, %v4020_v2  ;;  %v1338_v59 = vpack.c.bf16 %v3452_v57, %v3452_v57 }
 0x2cf   : > { %3457 = vmatpush.bf16.msk.msrb.mxu1 %vm3934_vm13, %v3833_v26 }
 0x2d0   : > { %v1416_v63 = vunpack.c.l.b16 %v1338_v59 }
 0x2d3   : > { %3459 = vmatpush.bf16.msk.msrb.mxu1 %vm3945_vm0, %v3833_v26 }
 0x2d7   : > { %v1067_v32 = vpop.f32.mrf.mxu1 }
 0x2d8   : > { %v1176_v36 = vmul.f32 0.0625, %v1067_v32  ;;  %v1406_v32 = vunpack.c.l.b16 %v1322_v25 }
 0x2da   : > { %3412 = vst.msk [vmem:[%s4130_s19 + $0x40] sm:$0xff] %vm681_vm10, %v1176_v36  ;;  %v1410_v35 = vpack.c.b16 %v1407_v33, %v1406_v32  ;;  %v3436_v36 = vsel %vm1262_vm12, 1.0, %v3834_v34  ;;  %vm1280_vm12 = vcmp.eq.f32.partialorder %v4227_v11, 4.0 }
 0x2db   : > { %v1274_v38 = vpack.c.bf16 %v3436_v36, %v3436_v36  ;;  %v3442_v27 = vsel %vm1280_vm12, 1.0, %v3834_v34 }
 0x2dc   : > { %v1292_v32 = vpack.c.bf16 %v3442_v27, %v3442_v27 }
 0x2dd   : > { %3471 = vmatmul.msk.bf16.gmra.mxu3 %vm412_vm3, %v1401_v10  ;;  %v1376_v16 = vunpack.c.l.b16 %v1274_v38  ;;  %v1387_v10 = vunpack.c.l.b16 %v1291_v9 }
 0x2de   : > { %3460 = vmatmul.msk.bf16.vlgmr.msrb.gmra.mxu1 %vm412_vm3, %v1350_v13  ;;  %v3434_v13 = vsel %vm1248_vm6, 1.0, %v3834_v34  ;;  %vm1278_vm6 = vcmp.eq.f32.partialorder %v4207_v30, 4.0  ;;  %v1388_v36 = vunpack.c.l.b16 %v1292_v32 }
 0x2df   : > { %v1069_v41 = vpop.f32.mrf.mxu1  ;;  %v1260_v17 = vpack.c.bf16 %v3434_v13, %v3434_v13  ;;  %v3440_v20 = vsel %vm1278_vm6, 1.0, %v3834_v34  ;;  %v3454_v13 = vsel %vm1328_vm8, 1.0, %v3834_v34 }
 0x2e0   : > { %v1377_v41 = vunpack.c.l.b16 %v1275_v15  ;;  %v1290_v8 = vpack.c.bf16 %v3440_v20, %v3440_v20 }
 0x2e1   : > { %v1368_v19 = vunpack.c.l.b16 %v1260_v17  ;;  %v1340_v17 = vpack.c.bf16 %v3454_v13, %v3454_v13 }
 0x2e2   : > { %v1380_v40 = vpack.c.b16 %v1377_v41, %v1376_v16  ;;  %v1386_v31 = vunpack.c.l.b16 %v1290_v8 }
 0x2e3   : > { %v1418_v22 = vunpack.c.l.b16 %v1340_v17 }
 0x2e5   : > { %v1421_v25 = vpack.c.b16 %v1419_v23, %v1418_v22 }
 0x2e7   : > { %v1097_v43 = vpop.f32.mrf.mxu1 }
 0x2e8   : > { %v1178_v39 = vmul.f32 0.0625, %v1097_v43  ;;  %v3450_v43 = vsel %vm1312_vm15, 1.0, %v3834_v34 }
 0x2e9   : > { %v1324_v45 = vpack.c.bf16 %v3450_v43, %v3450_v43 }
 0x2ea   : > { %3414 = vst.msk [vmem:[%s4130_s19 + $0x50] sm:$0xff] %vm681_vm10, %v1178_v39  ;;  %v1325_v39 = vpack.c.bf16 %v3451_v44, %v3451_v44 }
 0x2eb   : > { %v1408_v48 = vunpack.c.l.b16 %v1324_v45 }
 0x2ec   : > { %v1409_v49 = vunpack.c.l.b16 %v1325_v39 }
 0x2ed   : > { %3472 = vmatmul.msk.bf16.gmra.mxu3 %vm412_vm3, %v1410_v35 }
 0x2ee   : > { %3461 = vmatmul.msk.bf16.gmra.mxu1 %vm412_vm3, %v1351_v28  ;;  %v1371_v28 = vpack.c.b16 %v1369_v21, %v1368_v19  ;;  %v1411_v50 = vpack.c.b16 %v1409_v49, %v1408_v48  ;;  %v1390_v19 = vpack.c.b16 %v1387_v10, %v1386_v31 }
 0x2ef   : > { %v1099_v51 = vpop.f32.mrf.mxu1 }
 0x2fd   : > { %3473 = vmatmul.msk.bf16.gmra.mxu3 %vm412_vm3, %v1411_v50 }
 0x2fe   : > { %3462 = vmatmul.msk.bf16.gmra.mxu1 %vm412_vm3, %v1360_v42  ;;  %v1046_v42 = vpop.f32.mrf.mxu3 }
 0x306   : > { %v1048_v51 = vpop.f32.mrf.mxu3 }
 0x30b   : > { %v1127_v58 = vpop.f32.mrf.mxu1 }
 0x30c   : > { %v1180_v61 = vmul.f32 0.0625, %v1127_v58  ;;  %v3453_v58 = vsel %vm1327_vm5, 1.0, %v3834_v34 }
 0x30d   : > { %v1339_v60 = vpack.c.bf16 %v3453_v58, %v3453_v58 }
 0x30e   : > { %3463 = vmatmul.msk.bf16.gmra.mxu1 %vm412_vm3, %v1361_v54  ;;  %3416 = vst.msk [vmem:[%s4130_s19 + $0x60] sm:$0xff] %vm681_vm10, %v1180_v61  ;;  %v1378_v54 = vunpack.c.l.b16 %v1276_v47  ;;  %v1051_v56 = vpop.f32.mrf.mxu3 }
 0x30f   : > { %v1417_v0 = vunpack.c.l.b16 %v1339_v60 }
 0x310   : > { %v1381_v61 = vpack.c.b16 %v1379_v55, %v1378_v54 }
 0x313   : > { %v1129_v3 = vpop.f32.mrf.mxu1 }
 0x314   : > { %v1420_v3 = vpack.c.b16 %v1417_v0, %v1416_v63  ;;  %v1082_v63 = vpop.f32.mrf.mxu2 }
 0x315   : > { %v1177_v0 = vmul.f32 0.0625, %v1082_v63 }
 0x316   : > { %v1053_v4 = vpop.f32.mrf.mxu3  ;;  %3474 = vmatmul.msk.bf16.gmra.mxu3 %vm412_vm3, %v1420_v3 }
 0x317   : > { %v1162_v6 = vpack.c.bf16 %v1053_v4, %v1051_v56  ;;  %3413 = vst.msk [vmem:[%s4130_s19 + $0x48] sm:$0xff] %vm681_vm10, %v1177_v0 }
 0x319   : > { %1169 = vmatpush.bf16.msra.mxu2 %v1162_v6 }
 0x31c   : > { %v1084_v4 = vpop.f32.mrf.mxu2 }
 0x31e   : > { %3464 = vmatmul.msk.bf16.gmra.mxu1 %vm412_vm3, %v1370_v7  ;;  %v1161_v7 = vpack.c.bf16 %v1048_v51, %v1046_v42 }
 0x320   : > { %1170 = vmatpush.bf16.msra.mxu2 %v1161_v7 }
 0x323   : > { %3411 = vmatmul.msk.bf16.vlgmr.msra.gmra.mxu2 %vm412_vm3, %v4020_v2 }
 0x324   : > { %v1112_v6 = vpop.f32.mrf.mxu2 }
 0x325   : > { %v1179_v7 = vmul.f32 0.0625, %v1112_v6 }
 0x326   : > { %3475 = vmatmul.msk.bf16.gmra.mxu3 %vm412_vm3, %v1421_v25 }
 0x327   : > { %3415 = vst.msk [vmem:[%s4130_s19 + $0x58] sm:$0xff] %vm681_vm10, %v1179_v7 }
 0x32e   : > { %3465 = vmatmul.msk.bf16.gmra.mxu1 %vm412_vm3, %v1371_v28  ;;  %v3443_v28 = vsel %vm1281_vm14, 1.0, %v3834_v34 }
 0x32f   : > { %v1293_v33 = vpack.c.bf16 %v3443_v28, %v3443_v28 }
 0x331   : > { %v1389_v37 = vunpack.c.l.b16 %v1293_v33 }
 0x333   : > { %v1391_v38 = vpack.c.b16 %v1389_v37, %v1388_v36 }
 0x33e   : > { %3466 = vmatmul.msk.bf16.gmra.mxu1 %vm412_vm3, %v1380_v40 }
 0x34b   : > { %v1157_v62 = vpop.f32.mrf.mxu1 }
 0x34c   : > { %v1182_v1 = vmul.f32 0.0625, %v1157_v62 }
 0x34e   : > { %3418 = vst.msk [vmem:[%s4130_s19 + $0x70] sm:$0xff] %vm681_vm10, %v1182_v1  ;;  %3467 = vmatmul.msk.bf16.gmra.mxu1 %vm412_vm3, %v1381_v61 }
 0x350   : > { %v1529_v40 = vpop.f32.mrf.mxu3 }
 0x353   : > { %v1159_v30 = vpop.f32.mrf.mxu1 }
 0x354   : > { %v1114_v30 = vpop.f32.mrf.mxu2 }
 0x358   : > { %v1531_v50 = vpop.f32.mrf.mxu3 }
 0x35b   : > { %v1479_v21 = vpop.f32.mrf.mxu1 }
 0x35c   : > { %v1142_v14 = vpop.f32.mrf.mxu2 }
 0x35d   : > { %v1181_v17 = vmul.f32 0.0625, %v1142_v14 }
 0x35e   : > { %3468 = vmatmul.msk.bf16.gmra.mxu1 %vm412_vm3, %v1390_v19 }
 0x35f   : > { %3417 = vst.msk [vmem:[%s4130_s19 + $0x68] sm:$0xff] %vm681_vm10, %v1181_v17 }
 0x360   : > { %v1534_v52 = vpop.f32.mrf.mxu3 }
 0x363   : > { %v1481_v35 = vpop.f32.mrf.mxu1 }
 0x364   : > { %v1559_v16 = vpack.c.bf16 %v1481_v35, %v1479_v21  ;;  %v1634_v21 = vpack.c.bf16 %v1531_v50, %v1529_v40  ;;  %v1144_v25 = vpop.f32.mrf.mxu2 }
 0x368   : > { %v1536_v53 = vpop.f32.mrf.mxu3 }
 0x369   : > { %v1635_v19 = vpack.c.bf16 %v1536_v53, %v1534_v52  ;;  %v3495_v52 = vld [vmem:[%s3908_s17 + $0x78] sm:$0xff] }
 0x36b   : > { %v1484_v15 = vpop.f32.mrf.mxu1 }
 0x36e   : > { %3469 = vmatmul.msk.bf16.gmra.mxu1 %vm412_vm3, %v1391_v38 }
 0x370   : > { %v1539_v56 = vpop.f32.mrf.mxu3 }
 0x373   : > { %v1486_v11 = vpop.f32.mrf.mxu1 }
 0x374   : > { %v1560_v12 = vpack.c.bf16 %v1486_v11, %v1484_v15  ;;  %v3492_v11 = vld [vmem:[%s3908_s17 + $0x60] sm:$0xff] }
 0x376   : > { %1567 = vmatpush.bf16.msrb.mxu2 %v1560_v12  ;;  %v3493_v12 = vld [vmem:[%s3908_s17 + $0x68] sm:$0xff] }
 0x378   : > { %v1541_v59 = vpop.f32.mrf.mxu3 }
 0x379   : > { %v1649_v27 = vpack.c.bf16 %v1541_v59, %v1539_v56 }
 0x37a   : > { %1568 = vmatpush.bf16.msrb.mxu2 %v1559_v16  ;;  %v1701_v16 = vmul.f32 8.0, %v3492_v11 }
 0x37b   : > { %v1489_v41 = vpop.f32.mrf.mxu1 }
 0x37d   : > { %3476 = vmatmul.msk.bf16.vlgmr.msrb.gmra.mxu2 %vm412_vm3, %v4020_v2 }
 0x380   : > { %v1544_v62 = vpop.f32.mrf.mxu3 }
 0x383   : > { %v1491_v42 = vpop.f32.mrf.mxu1 }
 0x384   : > { %v1574_v39 = vpack.c.bf16 %v1491_v42, %v1489_v41  ;;  %v1702_v41 = vmul.f32 8.0, %v3493_v12 }
 0x388   : > { %v1546_v20 = vpop.f32.mrf.mxu3 }
 0x389   : > { %v1650_v23 = vpack.c.bf16 %v1546_v20, %v1544_v62 }
 0x38b   : > { %v1494_v43 = vpop.f32.mrf.mxu1 }
 0x393   : > { %v1496_v44 = vpop.f32.mrf.mxu1 }
 0x394   : > { %v1575_v45 = vpack.c.bf16 %v1496_v44, %v1494_v43  ;;  %v1705_v43 = vfloor.f32 %v1701_v16  ;;  %v1706_v44 = vfloor.f32 %v1702_v41 }
 0x396   : > { %1582 = vmatpush.bf16.msra.mxu2 %v1575_v45  ;;  %v1709_v45 = vmax.f32 %v1705_v43, 0.0 }
 0x399   : > { %v1549_v8 = vpop.f32.mrf.mxu3 }
 0x39a   : > { %1583 = vmatpush.bf16.msra.mxu2 %v1574_v39  ;;  %v1710_v39 = vmax.f32 %v1706_v44, 0.0 }
 0x39b   : > { %v1499_v48 = vpop.f32.mrf.mxu1 }
 0x39d   : > { %3477 = vmatmul.msk.bf16.vlgmr.msra.gmra.mxu2 %vm412_vm3, %v4020_v2 }
 0x3a1   : > { %v1551_v10 = vpop.f32.mrf.mxu3 }
 0x3a2   : > { %v1664_v37 = vpack.c.bf16 %v1551_v10, %v1549_v8 }
 0x3a3   : > { %v1501_v49 = vpop.f32.mrf.mxu1 }
 0x3a4   : > { %v1589_v54 = vpack.c.bf16 %v1501_v49, %v1499_v48  ;;  %v4351_v48 = vmin.f32 %v1709_v45, 7.0  ;;  %v4353_v49 = vmin.f32 %v1710_v39, 7.0 }
 0x3a6   : > { %v1172_v28 = vpop.f32.mrf.mxu2  ;;  %vm1717_vm15 = vcmp.eq.f32.partialorder %v4351_v48, 0.0  ;;  %vm1718_vm11 = vcmp.eq.f32.partialorder %v4353_v49, 0.0  ;;  %vm1733_vm4 = vcmp.eq.f32.partialorder %v4351_v48, 1.0  ;;  %vm1734_vm5 = vcmp.eq.f32.partialorder %v4353_v49, 1.0 }
 0x3a7   : > { %v1183_v33 = vmul.f32 0.0625, %v1172_v28  ;;  %v3496_v53 = vsel %vm1717_vm15, 1.0, %v3834_v34  ;;  %v3501_v14 = vsel %vm1734_vm5, 1.0, %v3834_v34  ;;  %vm1749_vm8 = vcmp.eq.f32.partialorder %v4351_v48, 2.0 }
 0x3a8   : > { %vm1750_vm9 = vcmp.eq.f32.partialorder %v4353_v49, 2.0  ;;  %vm1765_vm15 = vcmp.eq.f32.partialorder %v4351_v48, 3.0  ;;  %vm1782_vm5 = vcmp.eq.f32.partialorder %v4353_v49, 4.0 }
 0x3a9   : > { %v1554_v22 = vpop.f32.mrf.mxu3  ;;  %3419 = vst.msk [vmem:[%s4130_s19 + $0x78] sm:$0xff] %vm681_vm10, %v1183_v33  ;;  %v3505_v11 = vsel %vm1750_vm9, 1.0, %v3834_v34  ;;  %vm1798_vm9 = vcmp.eq.f32.partialorder %v4353_v49, 5.0 }
 0x3aa   : > { %v1762_v16 = vpack.c.bf16 %v3505_v11, %v3505_v11 }
 0x3ab   : > { %v1504_v51 = vpop.f32.mrf.mxu1 }
 0x3ae   : > { %v1174_v36 = vpop.f32.mrf.mxu2 }
 0x3b1   : > { %v1556_v32 = vpop.f32.mrf.mxu3 }
 0x3b2   : > { %v1665_v35 = vpack.c.bf16 %v1556_v32, %v1554_v22 }
 0x3b3   : > { %v1506_v46 = vpop.f32.mrf.mxu1 }
 0x3b4   : > { %v1590_v47 = vpack.c.bf16 %v1506_v46, %v1504_v51  ;;  %v3494_v51 = vld [vmem:[%s3908_s17 + $0x70] sm:$0xff] }
 0x3b5   : > { %v1703_v46 = vmul.f32 8.0, %v3494_v51 }
 0x3b6   : > { %1597 = vmatpush.bf16.msrb.mxu2 %v1590_v47  ;;  %v1704_v47 = vmul.f32 8.0, %v3495_v52 }
 0x3b7   : > { %v1707_v56 = vfloor.f32 %v1703_v46 }
 0x3ba   : > { %1598 = vmatpush.bf16.msrb.mxu2 %v1589_v54  ;;  %v3497_v54 = vsel %vm1718_vm11, 1.0, %v3834_v34  ;;  %vm1766_vm11 = vcmp.eq.f32.partialorder %v4353_v49, 3.0 }
 0x3bb   : > { %v1509_v55 = vpop.f32.mrf.mxu1  ;;  %v1730_v59 = vpack.c.bf16 %v3497_v54, %v3497_v54  ;;  %v3508_v54 = vsel %vm1765_vm15, 1.0, %v3834_v34  ;;  %vm1813_vm15 = vcmp.eq.f32.partialorder %v4351_v48, 6.0 }
 0x3bd   : > { %3478 = vmatmul.msk.bf16.vlgmr.msrb.gmra.mxu2 %vm412_vm3, %v4020_v2  ;;  %v1850_v63 = vunpack.c.l.b16 %v1730_v59 }
 0x3c3   : > { %v1511_v57 = vpop.f32.mrf.mxu1 }
 0x3c4   : > { %v1604_v1 = vpack.c.bf16 %v1511_v57, %v1509_v55  ;;  %v1708_v57 = vfloor.f32 %v1704_v47 }
 0x3cb   : > { %v1514_v58 = vpop.f32.mrf.mxu1 }
 0x3d3   : > { %v1516_v60 = vpop.f32.mrf.mxu1 }
 0x3d4   : > { %v1605_v61 = vpack.c.bf16 %v1516_v60, %v1514_v58  ;;  %v1729_v58 = vpack.c.bf16 %v3496_v53, %v3496_v53  ;;  %v1711_v60 = vmax.f32 %v1707_v56, 0.0 }
 0x3d6   : > { %1612 = vmatpush.bf16.msra.mxu2 %v1605_v61  ;;  %v1712_v61 = vmax.f32 %v1708_v57, 0.0  ;;  %v1849_v62 = vunpack.c.l.b16 %v1729_v58  ;;  %v4365_v0 = vmin.f32 %v1711_v60, 7.0  ;;  %v1777_v58 = vpack.c.bf16 %v3508_v54, %v3508_v54 }
 0x3d8   : > { %vm1719_vm1 = vcmp.eq.f32.partialorder %v4365_v0, 0.0  ;;  %vm1735_vm6 = vcmp.eq.f32.partialorder %v4365_v0, 1.0  ;;  %vm1751_vm12 = vcmp.eq.f32.partialorder %v4365_v0, 2.0  ;;  %v1879_v60 = vunpack.c.l.b16 %v1777_v58 }
 0x3d9   : > { %v3498_v4 = vsel %vm1719_vm1, 1.0, %v3834_v34  ;;  %v3506_v44 = vsel %vm1751_vm12, 1.0, %v3834_v34  ;;  %vm1767_vm1 = vcmp.eq.f32.partialorder %v4365_v0, 3.0  ;;  %vm1799_vm12 = vcmp.eq.f32.partialorder %v4365_v0, 5.0 }
 0x3da   : > { %1613 = vmatpush.bf16.msra.mxu2 %v1604_v1  ;;  %v4367_v1 = vmin.f32 %v1712_v61, 7.0  ;;  %v1731_v6 = vpack.c.bf16 %v3498_v4, %v3498_v4  ;;  %v3520_v58 = vsel %vm1813_vm15, 1.0, %v3834_v34 }
 0x3db   : > { %v1519_v3 = vpop.f32.mrf.mxu1 }
 0x3dc   : > { %vm1720_vm2 = vcmp.eq.f32.partialorder %v4367_v1, 0.0  ;;  %vm1736_vm7 = vcmp.eq.f32.partialorder %v4367_v1, 1.0  ;;  %vm1752_vm14 = vcmp.eq.f32.partialorder %v4367_v1, 2.0 }
 0x3dd   : > { %3479 = vmatmul.msk.bf16.vlgmr.msra.gmra.mxu2 %vm412_vm3, %v4020_v2  ;;  %v3499_v20 = vsel %vm1720_vm2, 1.0, %v3834_v34  ;;  %v3503_v25 = vsel %vm1736_vm7, 1.0, %v3834_v34  ;;  %v3507_v45 = vsel %vm1752_vm14, 1.0, %v3834_v34  ;;  %vm1768_vm2 = vcmp.eq.f32.partialorder %v4367_v1, 3.0 }
 0x3de   : > { %v1732_v7 = vpack.c.bf16 %v3499_v20, %v3499_v20  ;;  %v1748_v33 = vpack.c.bf16 %v3503_v25, %v3503_v25  ;;  %v1764_v51 = vpack.c.bf16 %v3507_v45, %v3507_v45  ;;  %v3511_v4 = vsel %vm1768_vm2, 1.0, %v3834_v34 }
 0x3df   : > { %vm1784_vm7 = vcmp.eq.f32.partialorder %v4367_v1, 4.0  ;;  %vm1800_vm14 = vcmp.eq.f32.partialorder %v4367_v1, 5.0  ;;  %vm1816_vm2 = vcmp.eq.f32.partialorder %v4367_v1, 6.0 }
 0x3e0   : > { %v1852_v30 = vunpack.c.l.b16 %v1732_v7  ;;  %v1862_v36 = vunpack.c.l.b16 %v1748_v33  ;;  %v1872_v46 = vunpack.c.l.b16 %v1764_v51  ;;  %v1780_v7 = vpack.c.bf16 %v3511_v4, %v3511_v4 }
 0x3e1   : > { %v3518_v51 = vsel %vm1799_vm12, 1.0, %v3834_v34 }
 0x3e3   : > { %v1521_v5 = vpop.f32.mrf.mxu1 }
 0x3e4   : > { %v1619_v18 = vpack.c.bf16 %v1521_v5, %v1519_v3  ;;  %v1853_v3 = vpack.c.b16 %v1850_v63, %v1849_v62 }
 0x3eb   : > { %v1524_v9 = vpop.f32.mrf.mxu1 }
 0x3f3   : > { %v1526_v31 = vpop.f32.mrf.mxu1 }
 0x3f4   : > { %v1620_v13 = vpack.c.bf16 %v1526_v31, %v1524_v9  ;;  %v1851_v9 = vunpack.c.l.b16 %v1731_v6 }
 0x3f6   : > { %1627 = vmatpush.bf16.msrb.mxu2 %v1620_v13  ;;  %v1854_v10 = vpack.c.b16 %v1852_v30, %v1851_v9  ;;  %v3500_v13 = vsel %vm1733_vm4, 1.0, %v3834_v34  ;;  %v1882_v9 = vunpack.c.l.b16 %v1780_v7  ;;  %vm1781_vm4 = vcmp.eq.f32.partialorder %v4351_v48, 4.0 }
 0x3f7   : > { %v1745_v17 = vpack.c.bf16 %v3500_v13, %v3500_v13  ;;  %v3513_v13 = vsel %vm1782_vm5, 1.0, %v3834_v34  ;;  %vm1830_vm5 = vcmp.eq.f32.partialorder %v4353_v49, 7.0 }
 0x3fa   : > { %1628 = vmatpush.bf16.msrb.mxu2 %v1619_v18  ;;  %v1746_v18 = vpack.c.bf16 %v3501_v14, %v3501_v14 }
 0x3fd   : > { %3480 = vmatmul.msk.bf16.vlgmr.msrb.gmra.mxu2 %vm412_vm3, %v4020_v2 }
 0x3fe   : > { %1642 = vmatpush.bf16.msra.mxu2 %v1635_v19  ;;  %v1859_v19 = vunpack.c.l.b16 %v1745_v17 }
 0x400   : > { %v1570_v38 = vpop.f32.mrf.mxu2 }
 0x401   : > { %v1679_v15 = vmul.f32 0.0625, %v1570_v38 }
 0x402   : > { %1643 = vmatpush.bf16.msra.mxu2 %v1634_v21  ;;  %v1860_v21 = vunpack.c.l.b16 %v1746_v18 }
 0x403   : > { %3484 = vst.msk [vmem:[%s4130_s19 + $0x80] sm:$0xff] %vm681_vm10, %v1679_v15  ;;  %v3504_v15 = vsel %vm1749_vm8, 1.0, %v3834_v34  ;;  %vm1797_vm8 = vcmp.eq.f32.partialorder %v4351_v48, 5.0 }
 0x404   : > { %v1863_v22 = vpack.c.b16 %v1860_v21, %v1859_v19  ;;  %v1761_v12 = vpack.c.bf16 %v3504_v15, %v3504_v15  ;;  %v1794_v19 = vpack.c.bf16 %v3513_v13, %v3513_v13  ;;  %v3516_v11 = vsel %vm1797_vm8, 1.0, %v3834_v34 }
 0x406   : > { %1657 = vmatpush.bf16.msrb.mxu2 %v1650_v23  ;;  %v3502_v23 = vsel %vm1735_vm6, 1.0, %v3834_v34  ;;  %v1869_v41 = vunpack.c.l.b16 %v1761_v12  ;;  %vm1783_vm6 = vcmp.eq.f32.partialorder %v4365_v0, 4.0  ;;  %v3517_v12 = vsel %vm1798_vm9, 1.0, %v3834_v34 }
 0x407   : > { %v1747_v32 = vpack.c.bf16 %v3502_v23, %v3502_v23 }
 0x408   : > { %v1572_v42 = vpop.f32.mrf.mxu2 }
 0x409   : > { %v1870_v42 = vunpack.c.l.b16 %v1762_v16 }
 0x40a   : > { %1658 = vmatpush.bf16.msrb.mxu2 %v1649_v27 }
 0x40b   : > { %v1873_v43 = vpack.c.b16 %v1870_v42, %v1869_v41  ;;  %v1809_v41 = vpack.c.bf16 %v3516_v11, %v3516_v11  ;;  %v1810_v42 = vpack.c.bf16 %v3517_v12, %v3517_v12 }
 0x40d   : > { %3481 = vmatmul.msk.bf16.vlgmr.msra.gmra.mxu2 %vm412_vm3, %v4020_v2 }
 0x40e   : > { %1672 = vmatpush.bf16.msra.mxu2 %v1665_v35  ;;  %v1861_v35 = vunpack.c.l.b16 %v1747_v32 }
 0x410   : > { %v1864_v38 = vpack.c.b16 %v1862_v36, %v1861_v35 }
 0x412   : > { %1673 = vmatpush.bf16.msra.mxu2 %v1664_v37 }
 0x41d   : > { %3482 = vmatmul.msk.bf16.vlgmr.msrb.gmra.mxu2 %vm412_vm3, %v4020_v2 }
 0x41e   : > { %3529 = vmatpush.bf16.msk.msrb.mxu2 %vm3934_vm13, %v3833_v26 }
 0x420   : > { %v1585_v40 = vpop.f32.mrf.mxu2 }
 0x421   : > { %v1680_v50 = vmul.f32 0.0625, %v1585_v40 }
 0x422   : > { %3531 = vmatpush.bf16.msk.msrb.mxu2 %vm3945_vm0, %v3833_v26 }
 0x423   : > { %3485 = vst.msk [vmem:[%s4130_s19 + $0x88] sm:$0xff] %vm681_vm10, %v1680_v50  ;;  %v1763_v50 = vpack.c.bf16 %v3506_v44, %v3506_v44  ;;  %v1900_v44 = vunpack.c.l.b16 %v1810_v42 }
 0x425   : > { %v1871_v52 = vunpack.c.l.b16 %v1763_v50 }
 0x427   : > { %v1874_v53 = vpack.c.b16 %v1872_v46, %v1871_v52  ;;  %v3519_v52 = vsel %vm1800_vm14, 1.0, %v3834_v34 }
 0x428   : > { %v1587_v55 = vpop.f32.mrf.mxu2 }
 0x429   : > { %v3509_v55 = vsel %vm1766_vm11, 1.0, %v3834_v34  ;;  %vm1814_vm11 = vcmp.eq.f32.partialorder %v4353_v49, 6.0 }
 0x42a   : > { %v1778_v59 = vpack.c.bf16 %v3509_v55, %v3509_v55 }
 0x42c   : > { %v1880_v61 = vunpack.c.l.b16 %v1778_v59  ;;  %v3521_v59 = vsel %vm1814_vm11, 1.0, %v3834_v34 }
 0x42d   : > { %3483 = vmatmul.msk.bf16.vlgmr.msra.gmra.mxu2 %vm412_vm3, %v4020_v2 }
 0x42e   : > { %v1883_v63 = vpack.c.b16 %v1880_v61, %v1879_v60  ;;  %v1825_v61 = vpack.c.bf16 %v3520_v58, %v3520_v58 }
 0x43d   : > { %3532 = vmatmul.msk.bf16.vlgmr.msrb.gmra.mxu2 %vm412_vm3, %v1853_v3  ;;  %v3510_v3 = vsel %vm1767_vm1, 1.0, %v3834_v34  ;;  %vm1815_vm1 = vcmp.eq.f32.partialorder %v4365_v0, 6.0 }
 0x43e   : > { %v1779_v6 = vpack.c.bf16 %v3510_v3, %v3510_v3  ;;  %v3522_v7 = vsel %vm1815_vm1, 1.0, %v3834_v34 }
 0x440   : > { %v1600_v5 = vpop.f32.mrf.mxu2 }
 0x441   : > { %v1681_v8 = vmul.f32 0.0625, %v1600_v5 }
 0x443   : > { %3486 = vst.msk [vmem:[%s4130_s19 + $0x90] sm:$0xff] %vm681_vm10, %v1681_v8  ;;  %v1881_v8 = vunpack.c.l.b16 %v1779_v6 }
 0x448   : > { %v1602_v31 = vpop.f32.mrf.mxu2 }
 0x449   : > { %v1884_v31 = vpack.c.b16 %v1882_v9, %v1881_v8  ;;  %v3523_v8 = vsel %vm1816_vm2, 1.0, %v3834_v34 }
 0x44d   : > { %3533 = vmatmul.msk.bf16.gmra.mxu2 %vm412_vm3, %v1854_v10  ;;  %v3512_v10 = vsel %vm1781_vm4, 1.0, %v3834_v34  ;;  %vm1829_vm4 = vcmp.eq.f32.partialorder %v4351_v48, 7.0 }
 0x44e   : > { %v1793_v18 = vpack.c.bf16 %v3512_v10, %v3512_v10 }
 0x450   : > { %v1889_v21 = vunpack.c.l.b16 %v1793_v18 }
 0x45d   : > { %3534 = vmatmul.msk.bf16.gmra.mxu2 %vm412_vm3, %v1863_v22  ;;  %v1890_v22 = vunpack.c.l.b16 %v1794_v19 }
 0x45f   : > { %v1893_v25 = vpack.c.b16 %v1890_v22, %v1889_v21 }
 0x460   : > { %v1615_v27 = vpop.f32.mrf.mxu2 }
 0x461   : > { %v1682_v28 = vmul.f32 0.0625, %v1615_v27  ;;  %v3514_v27 = vsel %vm1783_vm6, 1.0, %v3834_v34  ;;  %vm1831_vm6 = vcmp.eq.f32.partialorder %v4365_v0, 7.0 }
 0x462   : > { %v1795_v33 = vpack.c.bf16 %v3514_v27, %v3514_v27 }
 0x463   : > { %3487 = vst.msk [vmem:[%s4130_s19 + $0x98] sm:$0xff] %vm681_vm10, %v1682_v28  ;;  %v3515_v28 = vsel %vm1784_vm7, 1.0, %v3834_v34  ;;  %vm1832_vm7 = vcmp.eq.f32.partialorder %v4367_v1, 7.0 }
 0x464   : > { %v1796_v35 = vpack.c.bf16 %v3515_v28, %v3515_v28  ;;  %v1891_v36 = vunpack.c.l.b16 %v1795_v33  ;;  %v3527_v58 = vsel %vm1832_vm7, 1.0, %v3834_v34 }
 0x468   : > { %v1617_v37 = vpop.f32.mrf.mxu2 }
 0x469   : > { %v1892_v37 = vunpack.c.l.b16 %v1796_v35 }
 0x46b   : > { %v1894_v15 = vpack.c.b16 %v1892_v37, %v1891_v36 }
 0x46d   : > { %3535 = vmatmul.msk.bf16.gmra.mxu2 %vm412_vm3, %v1864_v38 }
 0x47d   : > { %3536 = vmatmul.msk.bf16.gmra.mxu2 %vm412_vm3, %v1873_v43  ;;  %v1899_v43 = vunpack.c.l.b16 %v1809_v41 }
 0x480   : > { %v1630_v39 = vpop.f32.mrf.mxu2 }
 0x481   : > { %v1683_v40 = vmul.f32 0.0625, %v1630_v39 }
 0x483   : > { %3488 = vst.msk [vmem:[%s4130_s19 + $0xa0] sm:$0xff] %vm681_vm10, %v1683_v40  ;;  %v1903_v40 = vpack.c.b16 %v1900_v44, %v1899_v43 }
 0x488   : > { %v1632_v47 = vpop.f32.mrf.mxu2 }
 0x489   : > { %v1811_v47 = vpack.c.bf16 %v3518_v51, %v3518_v51 }
 0x48b   : > { %v1901_v54 = vunpack.c.l.b16 %v1811_v47 }
 0x48d   : > { %3537 = vmatmul.msk.bf16.gmra.mxu2 %vm412_vm3, %v1874_v53  ;;  %v1812_v53 = vpack.c.bf16 %v3519_v52, %v3519_v52 }
 0x48f   : > { %v1902_v55 = vunpack.c.l.b16 %v1812_v53 }
 0x490   : > { %v1645_v56 = vpop.f32.mrf.mxu2 }
 0x491   : > { %v1684_v57 = vmul.f32 0.0625, %v1645_v56 }
 0x493   : > { %3489 = vst.msk [vmem:[%s4130_s19 + $0xa8] sm:$0xff] %vm681_vm10, %v1684_v57  ;;  %v1904_v57 = vpack.c.b16 %v1902_v55, %v1901_v54  ;;  %v3564_v54 = vld [vmem:[%s3908_s17 + $0x80] sm:$0xff]  ;;  %v3565_v55 = vld [vmem:[%s3908_s17 + $0x88] sm:$0xff] }
 0x494   : > { %v2205_v49 = vmul.f32 8.0, %v3565_v55 }
 0x498   : > { %v1647_v62 = vpop.f32.mrf.mxu2 }
 0x499   : > { %v1826_v62 = vpack.c.bf16 %v3521_v59, %v3521_v59 }
 0x49b   : > { %v1910_v3 = vunpack.c.l.b16 %v1826_v62  ;;  %v2209_v62 = vfloor.f32 %v2205_v49 }
 0x49d   : > { %3538 = vmatmul.msk.bf16.gmra.mxu2 %vm412_vm3, %v1883_v63  ;;  %v1909_v63 = vunpack.c.l.b16 %v1825_v61 }
 0x4a0   : > { %v1660_v20 = vpop.f32.mrf.mxu2 }
 0x4a1   : > { %v1685_v5 = vmul.f32 0.0625, %v1660_v20 }
 0x4a3   : > { %3490 = vst.msk [vmem:[%s4130_s19 + $0xb0] sm:$0xff] %vm681_vm10, %v1685_v5  ;;  %v1913_v5 = vpack.c.b16 %v1910_v3, %v1909_v63 }
 0x4a8   : > { %v1662_v30 = vpop.f32.mrf.mxu2 }
 0x4a9   : > { %v1827_v30 = vpack.c.bf16 %v3522_v7, %v3522_v7 }
 0x4ab   : > { %v1911_v10 = vunpack.c.l.b16 %v1827_v30  ;;  %v3567_v30 = vld [vmem:[%s3908_s17 + $0x98] sm:$0xff] }
 0x4ad   : > { %3539 = vmatmul.msk.bf16.gmra.mxu2 %vm412_vm3, %v1884_v31  ;;  %v1828_v31 = vpack.c.bf16 %v3523_v8, %v3523_v8 }
 0x4af   : > { %v1912_v13 = vunpack.c.l.b16 %v1828_v31 }
 0x4b0   : > { %v1675_v14 = vpop.f32.mrf.mxu2 }
 0x4b1   : > { %v1686_v17 = vmul.f32 0.0625, %v1675_v14 }
 0x4b3   : > { %3491 = vst.msk [vmem:[%s4130_s19 + $0xb8] sm:$0xff] %vm681_vm10, %v1686_v17  ;;  %v1914_v17 = vpack.c.b16 %v1912_v13, %v1911_v10  ;;  %v2207_v10 = vmul.f32 8.0, %v3567_v30 }
 0x4b8   : > { %v1677_v23 = vpop.f32.mrf.mxu2 }
 0x4bd   : > { %3540 = vmatmul.msk.bf16.gmra.mxu2 %vm412_vm3, %v1893_v25 }
 0x4c0   : > { %v1982_v32 = vpop.f32.mrf.mxu2 }
 0x4c8   : > { %v1984_v38 = vpop.f32.mrf.mxu2 }
 0x4c9   : > { %v2062_v50 = vpack.c.bf16 %v1984_v38, %v1982_v32 }
 0x4cd   : > { %3541 = vmatmul.msk.bf16.gmra.mxu2 %vm412_vm3, %v1894_v15 }
 0x4d0   : > { %v1987_v16 = vpop.f32.mrf.mxu2 }
 0x4d8   : > { %v1989_v45 = vpop.f32.mrf.mxu2 }
 0x4d9   : > { %v2063_v39 = vpack.c.bf16 %v1989_v45, %v1987_v16 }
 0x4db   : > { %2070 = vmatpush.bf16.msrb.mxu0 %v2063_v39  ;;  %v3524_v39 = vsel %vm1829_vm4, 1.0, %v3834_v34 }
 0x4dd   : > { %3542 = vmatmul.msk.bf16.gmra.mxu2 %vm412_vm3, %v1903_v40  ;;  %v3525_v40 = vsel %vm1830_vm5, 1.0, %v3834_v34 }
 0x4de   : > { %v1842_v51 = vpack.c.bf16 %v3525_v40, %v3525_v40 }
 0x4df   : > { %2071 = vmatpush.bf16.msrb.mxu0 %v2062_v50  ;;  %v1841_v50 = vpack.c.bf16 %v3524_v39, %v3524_v39 }
 0x4e0   : > { %v1992_v46 = vpop.f32.mrf.mxu2 }
 0x4e1   : > { %v1919_v52 = vunpack.c.l.b16 %v1841_v50 }
 0x4e2   : > { %3548 = vmatmul.msk.bf16.vlgmr.msrb.gmra.mxu0 %vm412_vm3, %v4020_v2 }
 0x4e8   : > { %v1994_v56 = vpop.f32.mrf.mxu2 }
 0x4e9   : > { %v2077_v6 = vpack.c.bf16 %v1994_v56, %v1992_v46  ;;  %v1920_v46 = vunpack.c.l.b16 %v1842_v51  ;;  %v2204_v56 = vmul.f32 8.0, %v3564_v54 }
 0x4eb   : > { %v1923_v47 = vpack.c.b16 %v1920_v46, %v1919_v52  ;;  %v2208_v61 = vfloor.f32 %v2204_v56 }
 0x4ed   : > { %3543 = vmatmul.msk.bf16.gmra.mxu2 %vm412_vm3, %v1904_v57  ;;  %v3526_v57 = vsel %vm1831_vm6, 1.0, %v3834_v34 }
 0x4ee   : > { %v1843_v59 = vpack.c.bf16 %v3526_v57, %v3526_v57 }
 0x4f0   : > { %v1997_v60 = vpop.f32.mrf.mxu2  ;;  %v1921_v63 = vunpack.c.l.b16 %v1843_v59 }
 0x4f8   : > { %v1999_v4 = vpop.f32.mrf.mxu2 }
 0x4f9   : > { %v2078_v20 = vpack.c.bf16 %v1999_v4, %v1997_v60  ;;  %v1844_v60 = vpack.c.bf16 %v3527_v58, %v3527_v58 }
 0x4fb   : > { %2085 = vmatpush.bf16.msra.mxu0 %v2078_v20  ;;  %v1922_v3 = vunpack.c.l.b16 %v1844_v60 }
 0x4fd   : > { %3544 = vmatmul.msk.bf16.gmra.mxu2 %vm412_vm3, %v1913_v5  ;;  %v1924_v4 = vpack.c.b16 %v1922_v3, %v1921_v63  ;;  %v2212_v5 = vmax.f32 %v2208_v61, 0.0 }
 0x4ff   : > { %2086 = vmatpush.bf16.msra.mxu0 %v2077_v6  ;;  %v2213_v6 = vmax.f32 %v2209_v62, 0.0  ;;  %v4471_v1 = vmin.f32 %v2212_v5, 7.0 }
 0x500   : > { %v2002_v9 = vpop.f32.mrf.mxu2 }
 0x501   : > { %v4473_v7 = vmin.f32 %v2213_v6, 7.0  ;;  %vm2220_vm8 = vcmp.eq.f32.partialorder %v4471_v1, 0.0  ;;  %vm2236_vm15 = vcmp.eq.f32.partialorder %v4471_v1, 1.0  ;;  %vm2252_vm4 = vcmp.eq.f32.partialorder %v4471_v1, 2.0 }
 0x502   : > { %3549 = vmatmul.msk.bf16.vlgmr.msra.gmra.mxu0 %vm412_vm3, %v4020_v2  ;;  %v3568_v13 = vsel %vm2220_vm8, 1.0, %v3834_v34  ;;  %v3576_v62 = vsel %vm2252_vm4, 1.0, %v3834_v34  ;;  %vm2268_vm8 = vcmp.eq.f32.partialorder %v4471_v1, 3.0  ;;  %vm2300_vm4 = vcmp.eq.f32.partialorder %v4471_v1, 5.0 }
 0x503   : > { %vm2221_vm9 = vcmp.eq.f32.partialorder %v4473_v7, 0.0  ;;  %vm2237_vm11 = vcmp.eq.f32.partialorder %v4473_v7, 1.0  ;;  %vm2253_vm5 = vcmp.eq.f32.partialorder %v4473_v7, 2.0 }
 0x504   : > { %v3577_v63 = vsel %vm2253_vm5, 1.0, %v3834_v34  ;;  %vm2301_vm5 = vcmp.eq.f32.partialorder %v4473_v7, 5.0 }
 0x508   : > { %v2004_v14 = vpop.f32.mrf.mxu2 }
 0x509   : > { %v2092_v22 = vpack.c.bf16 %v2004_v14, %v2002_v9  ;;  %v3566_v9 = vld [vmem:[%s3908_s17 + $0x90] sm:$0xff]  ;;  %v3569_v14 = vsel %vm2221_vm9, 1.0, %v3834_v34  ;;  %vm2269_vm9 = vcmp.eq.f32.partialorder %v4473_v7, 3.0 }
 0x50a   : > { %v2206_v31 = vmul.f32 8.0, %v3566_v9 }
 0x50d   : > { %3545 = vmatmul.msk.bf16.gmra.mxu2 %vm412_vm3, %v1914_v17  ;;  %v2210_v17 = vfloor.f32 %v2206_v31 }
 0x510   : > { %v2007_v18 = vpop.f32.mrf.mxu2 }
 0x518   : > { %v2009_v19 = vpop.f32.mrf.mxu2 }
 0x519   : > { %v2093_v21 = vpack.c.bf16 %v2009_v19, %v2007_v18  ;;  %v2211_v18 = vfloor.f32 %v2207_v10  ;;  %v2232_v19 = vpack.c.bf16 %v3568_v13, %v3568_v13 }
 0x51b   : > { %2100 = vmatpush.bf16.msrb.mxu0 %v2093_v21  ;;  %v2233_v21 = vpack.c.bf16 %v3569_v14, %v3569_v14 }
 0x51d   : > { %3546 = vmatmul.msk.bf16.gmra.mxu2 %vm412_vm3, %v1923_v47 }
 0x51f   : > { %2101 = vmatpush.bf16.msrb.mxu0 %v2092_v22  ;;  %v2214_v22 = vmax.f32 %v2210_v17, 0.0 }
 0x520   : > { %v2012_v23 = vpop.f32.mrf.mxu2 }
 0x522   : > { %3550 = vmatmul.msk.bf16.vlgmr.msrb.gmra.mxu0 %vm412_vm3, %v4020_v2 }
 0x528   : > { %v2014_v25 = vpop.f32.mrf.mxu2 }
 0x529   : > { %v2107_v33 = vpack.c.bf16 %v2014_v25, %v2012_v23  ;;  %v2215_v23 = vmax.f32 %v2211_v18, 0.0  ;;  %v2352_v25 = vunpack.c.l.b16 %v2232_v19  ;;  %v3580_v18 = vsel %vm2268_vm8, 1.0, %v3834_v34 }
 0x52a   : > { %v3581_v19 = vsel %vm2269_vm9, 1.0, %v3834_v34  ;;  %vm2316_vm8 = vcmp.eq.f32.partialorder %v4471_v1, 6.0  ;;  %vm2317_vm9 = vcmp.eq.f32.partialorder %v4473_v7, 6.0 }
 0x52d   : > { %3547 = vmatmul.msk.bf16.gmra.mxu2 %vm412_vm3, %v1924_v4  ;;  %v2264_v4 = vpack.c.bf16 %v3576_v62, %v3576_v62 }
 0x52f   : > { %v2372_v5 = vunpack.c.l.b16 %v2264_v4 }
 0x530   : > { %v2017_v27 = vpop.f32.mrf.mxu2 }
 0x538   : > { %v2019_v28 = vpop.f32.mrf.mxu2 }
 0x539   : > { %v2108_v32 = vpack.c.bf16 %v2019_v28, %v2017_v27  ;;  %v2353_v27 = vunpack.c.l.b16 %v2233_v21  ;;  %v4489_v28 = vmin.f32 %v2214_v22, 7.0  ;;  %v2280_v21 = vpack.c.bf16 %v3580_v18, %v3580_v18 }
 0x53a   : > { %v2281_v22 = vpack.c.bf16 %v3581_v19, %v3581_v19 }
 0x53b   : > { %2115 = vmatpush.bf16.msra.mxu3 %v2108_v32  ;;  %v4491_v32 = vmin.f32 %v2215_v23, 7.0  ;;  %vm2222_vm12 = vcmp.eq.f32.partialorder %v4489_v28, 0.0  ;;  %vm2238_vm1 = vcmp.eq.f32.partialorder %v4489_v28, 1.0  ;;  %vm2254_vm6 = vcmp.eq.f32.partialorder %v4489_v28, 2.0 }
 0x53c   : > { %v3574_v54 = vsel %vm2238_vm1, 1.0, %v3834_v34  ;;  %v3578_v9 = vsel %vm2254_vm6, 1.0, %v3834_v34  ;;  %v2382_v23 = vunpack.c.l.b16 %v2280_v21  ;;  %vm2286_vm1 = vcmp.eq.f32.partialorder %v4489_v28, 4.0 }
 0x53d   : > { %vm2223_vm14 = vcmp.eq.f32.partialorder %v4491_v32, 0.0  ;;  %vm2239_vm2 = vcmp.eq.f32.partialorder %v4491_v32, 1.0  ;;  %v2250_v56 = vpack.c.bf16 %v3574_v54, %v3574_v54  ;;  %vm2255_vm7 = vcmp.eq.f32.partialorder %v4491_v32, 2.0 }
 0x53e   : > { %v3575_v55 = vsel %vm2239_vm2, 1.0, %v3834_v34  ;;  %v3579_v30 = vsel %vm2255_vm7, 1.0, %v3834_v34  ;;  %v2266_v31 = vpack.c.bf16 %v3578_v9, %v3578_v9  ;;  %vm2287_vm2 = vcmp.eq.f32.partialorder %v4491_v32, 4.0 }
 0x53f   : > { %2116 = vmatpush.bf16.msra.mxu3 %v2107_v33  ;;  %v2356_v33 = vpack.c.b16 %v2353_v27, %v2352_v25  ;;  %v2251_v49 = vpack.c.bf16 %v3575_v55, %v3575_v55  ;;  %v2364_v57 = vunpack.c.l.b16 %v2250_v56  ;;  %v2267_v10 = vpack.c.bf16 %v3579_v30, %v3579_v30 }
 0x540   : > { %v2022_v35 = vpop.f32.mrf.mxu2  ;;  %v2374_v13 = vunpack.c.l.b16 %v2266_v31  ;;  %v2383_v25 = vunpack.c.l.b16 %v2281_v22  ;;  %v3587_v56 = vsel %vm2287_vm2, 1.0, %v3834_v34  ;;  %vm2302_vm6 = vcmp.eq.f32.partialorder %v4489_v28, 5.0 }
 0x541   : > { %v2365_v58 = vunpack.c.l.b16 %v2251_v49  ;;  %v2375_v14 = vunpack.c.l.b16 %v2267_v10  ;;  %vm2303_vm7 = vcmp.eq.f32.partialorder %v4491_v32, 5.0  ;;  %v3590_v10 = vsel %vm2302_vm6, 1.0, %v3834_v34 }
 0x542   : > { %3551 = vmatmul.msk.bf16.vlgmr.msra.gmra.mxu3 %vm412_vm3, %v4020_v2  ;;  %vm2335_vm2 = vcmp.eq.f32.partialorder %v4491_v32, 7.0 }
 0x543   : > { %v2367_v60 = vpack.c.b16 %v2365_v58, %v2364_v57  ;;  %v2377_v17 = vpack.c.b16 %v2375_v14, %v2374_v13  ;;  %v2299_v57 = vpack.c.bf16 %v3587_v56, %v3587_v56  ;;  %v3591_v13 = vsel %vm2303_vm7, 1.0, %v3834_v34 }
 0x544   : > { %v2314_v14 = vpack.c.bf16 %v3590_v10, %v3590_v10 }
 0x546   : > { %v2404_v19 = vunpack.c.l.b16 %v2314_v14 }
 0x548   : > { %v2024_v36 = vpop.f32.mrf.mxu2 }
 0x549   : > { %v2122_v11 = vpack.c.bf16 %v2024_v36, %v2022_v35  ;;  %v3570_v36 = vsel %vm2222_vm12, 1.0, %v3834_v34  ;;  %vm2270_vm12 = vcmp.eq.f32.partialorder %v4489_v28, 3.0 }
 0x550   : > { %v2027_v37 = vpop.f32.mrf.mxu2 }
 0x558   : > { %v2029_v38 = vpop.f32.mrf.mxu2 }
 0x559   : > { %v2123_v15 = vpack.c.bf16 %v2029_v38, %v2027_v37  ;;  %v3571_v37 = vsel %vm2223_vm14, 1.0, %v3834_v34  ;;  %vm2271_vm14 = vcmp.eq.f32.partialorder %v4491_v32, 3.0 }
 0x55b   : > { %2130 = vmatpush.bf16.msra.mxu0 %v2123_v15  ;;  %v2234_v15 = vpack.c.bf16 %v3570_v36, %v3570_v36  ;;  %v3583_v36 = vsel %vm2271_vm14, 1.0, %v3834_v34  ;;  %vm2319_vm14 = vcmp.eq.f32.partialorder %v4491_v32, 6.0 }
 0x55f   : > { %2131 = vmatpush.bf16.msra.mxu0 %v2122_v11  ;;  %v2073_v35 = vpop.f32.mrf.mxu0  ;;  %v2235_v11 = vpack.c.bf16 %v3571_v37, %v3571_v37 }
 0x560   : > { %v2032_v12 = vpop.f32.mrf.mxu2  ;;  %v2182_v38 = vmul.f32 0.0625, %v2073_v35  ;;  %v3582_v35 = vsel %vm2270_vm12, 1.0, %v3834_v34  ;;  %vm2318_vm12 = vcmp.eq.f32.partialorder %v4489_v28, 6.0 }
 0x562   : > { %3552 = vmatmul.msk.bf16.vlgmr.msra.gmra.mxu0 %vm412_vm3, %v4020_v2  ;;  %3556 = vst.msk [vmem:[%s4130_s19 + $0xc0] sm:$0xff] %vm681_vm10, %v2182_v38  ;;  %v2282_v38 = vpack.c.bf16 %v3582_v35, %v3582_v35 }
 0x568   : > { %v2034_v16 = vpop.f32.mrf.mxu2 }
 0x569   : > { %v2137_v44 = vpack.c.bf16 %v2034_v16, %v2032_v12  ;;  %v2354_v12 = vunpack.c.l.b16 %v2234_v15  ;;  %v2355_v16 = vunpack.c.l.b16 %v2235_v11  ;;  %v2283_v15 = vpack.c.bf16 %v3583_v36, %v3583_v36 }
 0x56a   : > { %v2384_v11 = vunpack.c.l.b16 %v2282_v38 }
 0x570   : > { %v2037_v41 = vpop.f32.mrf.mxu2 }
 0x578   : > { %v2039_v42 = vpop.f32.mrf.mxu2 }
 0x579   : > { %v2138_v43 = vpack.c.bf16 %v2039_v42, %v2037_v41  ;;  %v2075_v41 = vpop.f32.mrf.mxu0  ;;  %v2357_v42 = vpack.c.b16 %v2355_v16, %v2354_v12  ;;  %v2385_v12 = vunpack.c.l.b16 %v2283_v15 }
 0x57b   : > { %2145 = vmatpush.bf16.msrb.mxu3 %v2138_v43  ;;  %v2387_v41 = vpack.c.b16 %v2385_v12, %v2384_v11 }
 0x57f   : > { %2146 = vmatpush.bf16.msrb.mxu3 %v2137_v44  ;;  %v3572_v44 = vsel %vm2236_vm15, 1.0, %v3834_v34  ;;  %vm2284_vm15 = vcmp.eq.f32.partialorder %v4471_v1, 4.0 }
 0x580   : > { %v2042_v45 = vpop.f32.mrf.mxu2  ;;  %v2248_v40 = vpack.c.bf16 %v3572_v44, %v3572_v44  ;;  %v3584_v44 = vsel %vm2284_vm15, 1.0, %v3834_v34  ;;  %vm2332_vm15 = vcmp.eq.f32.partialorder %v4471_v1, 7.0 }
 0x581   : > { %v2088_v43 = vpop.f32.mrf.mxu0 }
 0x582   : > { %3553 = vmatmul.msk.bf16.vlgmr.msrb.gmra.mxu3 %vm412_vm3, %v4020_v2  ;;  %v2183_v39 = vmul.f32 0.0625, %v2088_v43  ;;  %v2362_v51 = vunpack.c.l.b16 %v2248_v40 }
 0x584   : > { %3557 = vst.msk [vmem:[%s4130_s19 + $0xc8] sm:$0xff] %vm681_vm10, %v2183_v39 }
 0x588   : > { %v2044_v53 = vpop.f32.mrf.mxu2 }
 0x589   : > { %v2152_v8 = vpack.c.bf16 %v2044_v53, %v2042_v45  ;;  %v3573_v45 = vsel %vm2237_vm11, 1.0, %v3834_v34  ;;  %v2090_v46 = vpop.f32.mrf.mxu0  ;;  %vm2285_vm11 = vcmp.eq.f32.partialorder %v4473_v7, 4.0 }
 0x58a   : > { %v2249_v50 = vpack.c.bf16 %v3573_v45, %v3573_v45  ;;  %v3585_v45 = vsel %vm2285_vm11, 1.0, %v3834_v34  ;;  %vm2333_vm11 = vcmp.eq.f32.partialorder %v4473_v7, 7.0 }
 0x58c   : > { %v2363_v52 = vunpack.c.l.b16 %v2249_v50 }
 0x58e   : > { %v2366_v47 = vpack.c.b16 %v2363_v52, %v2362_v51  ;;  %v2296_v51 = vpack.c.bf16 %v3584_v44, %v3584_v44  ;;  %v2297_v52 = vpack.c.bf16 %v3585_v45, %v3585_v45 }
 0x590   : > { %v2047_v48 = vpop.f32.mrf.mxu2 }
 0x598   : > { %v2049_v20 = vpop.f32.mrf.mxu2 }
 0x599   : > { %v2153_v0 = vpack.c.bf16 %v2049_v20, %v2047_v48  ;;  %v2265_v20 = vpack.c.bf16 %v3577_v63, %v3577_v63  ;;  %v3588_v63 = vsel %vm2300_vm4, 1.0, %v3834_v34 }
 0x59a   : > { %v2312_v4 = vpack.c.bf16 %v3588_v63, %v3588_v63 }
 0x59b   : > { %2160 = vmatpush.bf16.msrb.mxu0 %v2153_v0  ;;  %v2373_v6 = vunpack.c.l.b16 %v2265_v20 }
 0x59f   : > { %2161 = vmatpush.bf16.msrb.mxu0 %v2152_v8  ;;  %v2103_v53 = vpop.f32.mrf.mxu0  ;;  %v2376_v8 = vpack.c.b16 %v2373_v6, %v2372_v5 }
 0x5a0   : > { %v2184_v48 = vmul.f32 0.0625, %v2103_v53  ;;  %v2052_v27 = vpop.f32.mrf.mxu2  ;;  %v2393_v53 = vunpack.c.l.b16 %v2297_v52 }
 0x5a2   : > { %3554 = vmatmul.msk.bf16.vlgmr.msrb.gmra.mxu0 %vm412_vm3, %v4020_v2  ;;  %3558 = vst.msk [vmem:[%s4130_s19 + $0xd0] sm:$0xff] %vm681_vm10, %v2184_v48  ;;  %v3586_v48 = vsel %vm2286_vm1, 1.0, %v3834_v34  ;;  %vm2334_vm1 = vcmp.eq.f32.partialorder %v4489_v28, 7.0 }
 0x5a3   : > { %3601 = vmatpush.bf16.msk.msra.mxu0 %vm3934_vm13, %v3833_v26  ;;  %v2298_v49 = vpack.c.bf16 %v3586_v48, %v3586_v48 }
 0x5a7   : > { %3603 = vmatpush.bf16.msk.msra.mxu0 %vm3945_vm0, %v3833_v26  ;;  %v2105_v59 = vpop.f32.mrf.mxu0 }
 0x5a8   : > { %v2054_v37 = vpop.f32.mrf.mxu2  ;;  %v2394_v59 = vunpack.c.l.b16 %v2298_v49 }
 0x5a9   : > { %v2167_v50 = vpack.c.bf16 %v2054_v37, %v2052_v27  ;;  %v3593_v27 = vsel %vm2317_vm9, 1.0, %v3834_v34 }
 0x5aa   : > { %v2329_v35 = vpack.c.bf16 %v3593_v27, %v3593_v27 }
 0x5ac   : > { %v2413_v15 = vunpack.c.l.b16 %v2329_v35 }
 0x5b0   : > { %v2057_v16 = vpop.f32.mrf.mxu2 }
 0x5b2   : > { %3604 = vmatmul.msk.bf16.vlgmr.msra.gmra.mxu0 %vm412_vm3, %v2356_v33  ;;  %v2386_v33 = vpack.c.b16 %v2383_v25, %v2382_v23  ;;  %v3592_v25 = vsel %vm2316_vm8, 1.0, %v3834_v34 }
 0x5b8   : > { %v2059_v39 = vpop.f32.mrf.mxu2 }
 0x5b9   : > { %v2168_v40 = vpack.c.bf16 %v2059_v39, %v2057_v16 }
 0x5bb   : > { %2175 = vmatpush.bf16.msra.mxu3 %v2168_v40 }
 0x5bf   : > { %2176 = vmatpush.bf16.msra.mxu3 %v2167_v50 }
 0x5c2   : > { %3605 = vmatmul.msk.bf16.gmra.mxu0 %vm412_vm3, %v2357_v42  ;;  %3555 = vmatmul.msk.bf16.vlgmr.msra.gmra.mxu3 %vm412_vm3, %v4020_v2 }
 0x5d2   : > { %3606 = vmatmul.msk.bf16.gmra.mxu0 %vm412_vm3, %v2366_v47  ;;  %v2392_v47 = vunpack.c.l.b16 %v2296_v51 }
 0x5d4   : > { %v2396_v54 = vpack.c.b16 %v2393_v53, %v2392_v47 }
 0x5df   : > { %v2133_v61 = vpop.f32.mrf.mxu0 }
 0x5e0   : > { %v2186_v3 = vmul.f32 0.0625, %v2133_v61 }
 0x5e2   : > { %3607 = vmatmul.msk.bf16.gmra.mxu0 %vm412_vm3, %v2367_v60  ;;  %3560 = vst.msk [vmem:[%s4130_s19 + $0xe0] sm:$0xff] %vm681_vm10, %v2186_v3  ;;  %v2395_v60 = vunpack.c.l.b16 %v2299_v57  ;;  %v3589_v3 = vsel %vm2301_vm5, 1.0, %v3834_v34 }
 0x5e3   : > { %v2313_v20 = vpack.c.bf16 %v3589_v3, %v3589_v3 }
 0x5e4   : > { %v2397_v61 = vpack.c.b16 %v2395_v60, %v2394_v59 }
 0x5e7   : > { %v2135_v0 = vpop.f32.mrf.mxu0 }
 0x5e8   : > { %v2402_v0 = vunpack.c.l.b16 %v2312_v4 }
 0x5f2   : > { %3608 = vmatmul.msk.bf16.gmra.mxu0 %vm412_vm3, %v2376_v8  ;;  %v2403_v8 = vunpack.c.l.b16 %v2313_v20 }
 0x5f4   : > { %v2406_v30 = vpack.c.b16 %v2403_v8, %v2402_v0  ;;  %v3596_v8 = vsel %vm2332_vm15, 1.0, %v3834_v34 }
 0x602   : > { %3609 = vmatmul.msk.bf16.gmra.mxu0 %vm412_vm3, %v2377_v17  ;;  %v2315_v17 = vpack.c.bf16 %v3591_v13, %v3591_v13 }
 0x604   : > { %v2405_v21 = vunpack.c.l.b16 %v2315_v17 }
 0x606   : > { %v2407_v22 = vpack.c.b16 %v2405_v21, %v2404_v19  ;;  %v3637_v19 = vld [vmem:[%s3908_s17 + $0xa8] sm:$0xff] }
 0x607   : > { %v2708_v7 = vmul.f32 8.0, %v3637_v19 }
 0x609   : > { %v2712_v27 = vfloor.f32 %v2708_v7 }
 0x612   : > { %3610 = vmatmul.msk.bf16.gmra.mxu0 %vm412_vm3, %v2386_v33  ;;  %v2328_v33 = vpack.c.bf16 %v3592_v25, %v3592_v25 }
 0x614   : > { %v2412_v38 = vunpack.c.l.b16 %v2328_v33 }
 0x616   : > { %v2416_v12 = vpack.c.b16 %v2413_v15, %v2412_v38 }
 0x61f   : > { %v2163_v42 = vpop.f32.mrf.mxu0 }
 0x620   : > { %v2188_v43 = vmul.f32 0.0625, %v2163_v42  ;;  %v3595_v42 = vsel %vm2319_vm14, 1.0, %v3834_v34 }
 0x621   : > { %v2331_v44 = vpack.c.bf16 %v3595_v42, %v3595_v42  ;;  %v3638_v42 = vld [vmem:[%s3908_s17 + $0xb0] sm:$0xff] }
 0x622   : > { %3562 = vst.msk [vmem:[%s4130_s19 + $0xf0] sm:$0xff] %vm681_vm10, %v2188_v43  ;;  %3611 = vmatmul.msk.bf16.gmra.mxu0 %vm412_vm3, %v2387_v41  ;;  %v3594_v41 = vsel %vm2318_vm12, 1.0, %v3834_v34 }
 0x623   : > { %v2330_v43 = vpack.c.bf16 %v3594_v41, %v3594_v41  ;;  %v2415_v40 = vunpack.c.l.b16 %v2331_v44  ;;  %v2709_v44 = vmul.f32 8.0, %v3638_v42 }
 0x625   : > { %v2414_v39 = vunpack.c.l.b16 %v2330_v43  ;;  %v3639_v43 = vld [vmem:[%s3908_s17 + $0xb8] sm:$0xff] }
 0x627   : > { %v2165_v46 = vpop.f32.mrf.mxu0  ;;  %v2417_v50 = vpack.c.b16 %v2415_v40, %v2414_v39 }
 0x62f   : > { %v2485_v55 = vpop.f32.mrf.mxu0 }
 0x632   : > { %3612 = vmatmul.msk.bf16.gmra.mxu0 %vm412_vm3, %v2396_v54 }
 0x637   : > { %v2487_v58 = vpop.f32.mrf.mxu0 }
 0x638   : > { %v2565_v9 = vpack.c.bf16 %v2487_v58, %v2485_v55 }
 0x63f   : > { %v2490_v62 = vpop.f32.mrf.mxu0 }
 0x642   : > { %3613 = vmatmul.msk.bf16.gmra.mxu0 %vm412_vm3, %v2397_v61 }
 0x647   : > { %v2492_v5 = vpop.f32.mrf.mxu0 }
 0x648   : > { %v2566_v6 = vpack.c.bf16 %v2492_v5, %v2490_v62 }
 0x64a   : > { %2573 = vmatpush.bf16.msrb.mxu3 %v2566_v6 }
 0x64e   : > { %2574 = vmatpush.bf16.msrb.mxu3 %v2565_v9  ;;  %v3597_v9 = vsel %vm2333_vm11, 1.0, %v3834_v34 }
 0x64f   : > { %v2495_v31 = vpop.f32.mrf.mxu0 }
 0x651   : > { %3620 = vmatmul.msk.bf16.vlgmr.msrb.gmra.mxu3 %vm412_vm3, %v4020_v2 }
 0x652   : > { %3614 = vmatmul.msk.bf16.gmra.mxu0 %vm412_vm3, %v2406_v30  ;;  %v2344_v30 = vpack.c.bf16 %v3596_v8, %v3596_v8 }
 0x654   : > { %v2422_v10 = vunpack.c.l.b16 %v2344_v30 }
 0x657   : > { %v2497_v18 = vpop.f32.mrf.mxu0 }
 0x658   : > { %v2580_v11 = vpack.c.bf16 %v2497_v18, %v2495_v31  ;;  %v2345_v31 = vpack.c.bf16 %v3597_v9, %v3597_v9  ;;  %v3636_v18 = vld [vmem:[%s3908_s17 + $0xa0] sm:$0xff] }
 0x659   : > { %v2707_v21 = vmul.f32 8.0, %v3636_v18 }
 0x65a   : > { %v2423_v13 = vunpack.c.l.b16 %v2345_v31 }
 0x65b   : > { %v2711_v25 = vfloor.f32 %v2707_v21 }
 0x65c   : > { %v2426_v17 = vpack.c.b16 %v2423_v13, %v2422_v10 }
 0x65d   : > { %v2715_v15 = vmax.f32 %v2711_v25, 0.0 }
 0x65f   : > { %v2500_v23 = vpop.f32.mrf.mxu0  ;;  %v4595_v28 = vmin.f32 %v2715_v15, 7.0 }
 0x661   : > { %vm2723_vm4 = vcmp.eq.f32.partialorder %v4595_v28, 0.0  ;;  %vm2755_vm12 = vcmp.eq.f32.partialorder %v4595_v28, 2.0 }
 0x662   : > { %3615 = vmatmul.msk.bf16.gmra.mxu0 %vm412_vm3, %v2407_v22  ;;  %v3598_v22 = vsel %vm2334_vm1, 1.0, %v3834_v34  ;;  %v3640_v39 = vsel %vm2723_vm4, 1.0, %v3834_v34  ;;  %v3648_v19 = vsel %vm2755_vm12, 1.0, %v3834_v34  ;;  %vm2771_vm1 = vcmp.eq.f32.partialorder %v4595_v28, 3.0 }
 0x663   : > { %v2346_v33 = vpack.c.bf16 %v3598_v22, %v3598_v22  ;;  %v2767_v7 = vpack.c.bf16 %v3648_v19, %v3648_v19 }
 0x667   : > { %v2502_v36 = vpop.f32.mrf.mxu0 }
 0x668   : > { %v2581_v37 = vpack.c.bf16 %v2502_v36, %v2500_v23  ;;  %v3599_v23 = vsel %vm2335_vm2, 1.0, %v3834_v34  ;;  %v2424_v36 = vunpack.c.l.b16 %v2346_v33 }
 0x669   : > { %v2347_v35 = vpack.c.bf16 %v3599_v23, %v3599_v23  ;;  %v2875_v23 = vunpack.c.l.b16 %v2767_v7 }
 0x66a   : > { %2588 = vmatpush.bf16.msra.mxu3 %v2581_v37 }
 0x66b   : > { %v2425_v37 = vunpack.c.l.b16 %v2347_v35 }
 0x66e   : > { %2589 = vmatpush.bf16.msra.mxu3 %v2580_v11  ;;  %v2716_v11 = vmax.f32 %v2712_v27, 0.0 }
 0x66f   : > { %v2505_v16 = vpop.f32.mrf.mxu0 }
 0x670   : > { %v4597_v32 = vmin.f32 %v2716_v11, 7.0 }
 0x671   : > { %3621 = vmatmul.msk.bf16.vlgmr.msra.gmra.mxu3 %vm412_vm3, %v4020_v2 }
 0x672   : > { %3616 = vmatmul.msk.bf16.gmra.mxu0 %vm412_vm3, %v2416_v12  ;;  %v2427_v12 = vpack.c.b16 %v2425_v37, %v2424_v36  ;;  %vm2724_vm5 = vcmp.eq.f32.partialorder %v4597_v32, 0.0  ;;  %vm2740_vm7 = vcmp.eq.f32.partialorder %v4597_v32, 1.0  ;;  %vm2756_vm14 = vcmp.eq.f32.partialorder %v4597_v32, 2.0 }
 0x673   : > { %v3641_v40 = vsel %vm2724_vm5, 1.0, %v3834_v34  ;;  %vm2772_vm2 = vcmp.eq.f32.partialorder %v4597_v32, 3.0 }
 0x677   : > { %v2507_v45 = vpop.f32.mrf.mxu0 }
 0x678   : > { %v2595_v47 = vpack.c.bf16 %v2507_v45, %v2505_v16  ;;  %v2710_v45 = vmul.f32 8.0, %v3639_v43 }
 0x67a   : > { %v2714_v24 = vfloor.f32 %v2710_v45 }
 0x67f   : > { %v2510_v51 = vpop.f32.mrf.mxu0 }
 0x682   : > { %3617 = vmatmul.msk.bf16.gmra.mxu0 %vm412_vm3, %v2417_v50  ;;  %v2713_v50 = vfloor.f32 %v2709_v44 }
 0x687   : > { %v2512_v52 = vpop.f32.mrf.mxu0 }
 0x688   : > { %v2596_v46 = vpack.c.bf16 %v2512_v52, %v2510_v51  ;;  %v2735_v51 = vpack.c.bf16 %v3640_v39, %v3640_v39  ;;  %v2736_v52 = vpack.c.bf16 %v3641_v40, %v3641_v40 }
 0x68a   : > { %2603 = vmatpush.bf16.msra.mxu1 %v2596_v46  ;;  %v2717_v46 = vmax.f32 %v2713_v50, 0.0 }
 0x68e   : > { %2604 = vmatpush.bf16.msra.mxu1 %v2595_v47  ;;  %v2718_v47 = vmax.f32 %v2714_v24, 0.0 }
 0x68f   : > { %v2515_v53 = vpop.f32.mrf.mxu0 }
 0x691   : > { %3622 = vmatmul.msk.bf16.vlgmr.msra.gmra.mxu1 %vm412_vm3, %v4020_v2 }
 0x692   : > { %3618 = vmatmul.msk.bf16.gmra.mxu0 %vm412_vm3, %v2426_v17 }
 0x697   : > { %v2517_v54 = vpop.f32.mrf.mxu0 }
 0x698   : > { %v2610_v49 = vpack.c.bf16 %v2517_v54, %v2515_v53  ;;  %v2855_v53 = vunpack.c.l.b16 %v2735_v51  ;;  %v2856_v54 = vunpack.c.l.b16 %v2736_v52 }
 0x69f   : > { %v2520_v55 = vpop.f32.mrf.mxu0 }
 0x6a2   : > { %3619 = vmatmul.msk.bf16.gmra.mxu0 %vm412_vm3, %v2427_v12 }
 0x6a7   : > { %v2522_v48 = vpop.f32.mrf.mxu0 }
 0x6a8   : > { %v2611_v56 = vpack.c.bf16 %v2522_v48, %v2520_v55  ;;  %v4613_v55 = vmin.f32 %v2717_v46, 7.0  ;;  %v4615_v48 = vmin.f32 %v2718_v47, 7.0 }
 0x6aa   : > { %2618 = vmatpush.bf16.msrb.mxu3 %v2611_v56  ;;  %v2859_v56 = vpack.c.b16 %v2856_v54, %v2855_v53  ;;  %vm2726_vm6 = vcmp.eq.f32.partialorder %v4615_v48, 0.0  ;;  %vm2741_vm8 = vcmp.eq.f32.partialorder %v4613_v55, 1.0  ;;  %vm2742_vm9 = vcmp.eq.f32.partialorder %v4615_v48, 1.0 }
 0x6ab   : > { %v3643_v29 = vsel %vm2726_vm6, 1.0, %v3834_v34  ;;  %v3647_v8 = vsel %vm2742_vm9, 1.0, %v3834_v34  ;;  %vm2757_vm15 = vcmp.eq.f32.partialorder %v4613_v55, 2.0  ;;  %vm2758_vm11 = vcmp.eq.f32.partialorder %v4615_v48, 2.0 }
 0x6ac   : > { %v2754_v31 = vpack.c.bf16 %v3647_v8, %v3647_v8  ;;  %v3650_v35 = vsel %vm2757_vm15, 1.0, %v3834_v34  ;;  %v3651_v36 = vsel %vm2758_vm11, 1.0, %v3834_v34  ;;  %vm2773_vm4 = vcmp.eq.f32.partialorder %v4613_v55, 3.0 }
 0x6ad   : > { %v2769_v37 = vpack.c.bf16 %v3650_v35, %v3650_v35  ;;  %vm2774_vm5 = vcmp.eq.f32.partialorder %v4615_v48, 3.0  ;;  %v3654_v24 = vsel %vm2773_vm4, 1.0, %v3834_v34  ;;  %vm2788_vm6 = vcmp.eq.f32.partialorder %v4597_v32, 4.0 }
 0x6ae   : > { %2619 = vmatpush.bf16.msrb.mxu3 %v2610_v49  ;;  %v2868_v13 = vunpack.c.l.b16 %v2754_v31  ;;  %v3655_v51 = vsel %vm2774_vm5, 1.0, %v3834_v34  ;;  %v2785_v52 = vpack.c.bf16 %v3654_v24, %v3654_v24  ;;  %vm2804_vm9 = vcmp.eq.f32.partialorder %v4597_v32, 5.0 }
 0x6af   : > { %v2525_v57 = vpop.f32.mrf.mxu0  ;;  %v2877_v15 = vunpack.c.l.b16 %v2769_v37  ;;  %v2786_v46 = vpack.c.bf16 %v3655_v51, %v3655_v51  ;;  %vm2805_vm12 = vcmp.eq.f32.partialorder %v4613_v55, 5.0  ;;  %vm2819_vm15 = vcmp.eq.f32.partialorder %v4595_v28, 6.0 }
 0x6b0   : > { %v2887_v53 = vunpack.c.l.b16 %v2785_v52  ;;  %v3662_v35 = vsel %vm2805_vm12, 1.0, %v3834_v34  ;;  %vm2820_vm11 = vcmp.eq.f32.partialorder %v4597_v32, 6.0  ;;  %vm2835_vm4 = vcmp.eq.f32.partialorder %v4595_v28, 7.0 }
 0x6b1   : > { %3623 = vmatmul.msk.bf16.vlgmr.msrb.gmra.mxu3 %vm412_vm3, %v4020_v2  ;;  %v2888_v54 = vunpack.c.l.b16 %v2786_v46  ;;  %v2817_v37 = vpack.c.bf16 %v3662_v35, %v3662_v35  ;;  %vm2836_vm5 = vcmp.eq.f32.partialorder %v4597_v32, 7.0 }
 0x6b7   : > { %v2527_v58 = vpop.f32.mrf.mxu0 }
 0x6b8   : > { %v2625_v62 = vpack.c.bf16 %v2527_v58, %v2525_v57  ;;  %v2738_v57 = vpack.c.bf16 %v3643_v29, %v3643_v29 }
 0x6bf   : > { %v2530_v59 = vpop.f32.mrf.mxu0 }
 0x6c7   : > { %v2532_v60 = vpop.f32.mrf.mxu0 }
 0x6c8   : > { %v2626_v61 = vpack.c.bf16 %v2532_v60, %v2530_v59  ;;  %v2858_v59 = vunpack.c.l.b16 %v2738_v57 }
 0x6ca   : > { %2633 = vmatpush.bf16.msrb.mxu1 %v2626_v61 }
 0x6ce   : > { %2634 = vmatpush.bf16.msrb.mxu1 %v2625_v62  ;;  %v3645_v62 = vsel %vm2740_vm7, 1.0, %v3834_v34  ;;  %vm2790_vm7 = vcmp.eq.f32.partialorder %v4615_v48, 4.0 }
 0x6cf   : > { %v2535_v63 = vpop.f32.mrf.mxu0 }
 0x6d1   : > { %3624 = vmatmul.msk.bf16.vlgmr.msrb.gmra.mxu1 %vm412_vm3, %v4020_v2 }
 0x6d7   : > { %v2537_v3 = vpop.f32.mrf.mxu0 }
 0x6d8   : > { %v2640_v6 = vpack.c.bf16 %v2537_v3, %v2535_v63  ;;  %v2752_v3 = vpack.c.bf16 %v3645_v62, %v3645_v62 }
 0x6df   : > { %v2540_v4 = vpop.f32.mrf.mxu0 }
 0x6e7   : > { %v2542_v20 = vpop.f32.mrf.mxu0 }
 0x6e8   : > { %v2641_v5 = vpack.c.bf16 %v2542_v20, %v2540_v4  ;;  %v2866_v20 = vunpack.c.l.b16 %v2752_v3 }
 0x6ea   : > { %2648 = vmatpush.bf16.msra.mxu3 %v2641_v5 }
 0x6ee   : > { %2649 = vmatpush.bf16.msra.mxu3 %v2640_v6 }
 0x6ef   : > { %v2545_v0 = vpop.f32.mrf.mxu0 }
 0x6f1   : > { %3625 = vmatmul.msk.bf16.vlgmr.msra.gmra.mxu3 %vm412_vm3, %v4020_v2 }
 0x6f7   : > { %v2547_v14 = vpop.f32.mrf.mxu0 }
 0x6f8   : > { %v2655_v41 = vpack.c.bf16 %v2547_v14, %v2545_v0  ;;  %v3646_v0 = vsel %vm2741_vm8, 1.0, %v3834_v34  ;;  %vm2803_vm8 = vcmp.eq.f32.partialorder %v4595_v28, 5.0 }
 0x6f9   : > { %v2753_v30 = vpack.c.bf16 %v3646_v0, %v3646_v0  ;;  %v3659_v0 = vsel %vm2790_vm7, 1.0, %v3834_v34 }
 0x6fb   : > { %v2867_v10 = vunpack.c.l.b16 %v2753_v30 }
 0x6fd   : > { %v2870_v17 = vpack.c.b16 %v2868_v13, %v2867_v10 }
 0x6ff   : > { %v2550_v1 = vpop.f32.mrf.mxu0 }
 0x707   : > { %v2552_v38 = vpop.f32.mrf.mxu0 }
 0x708   : > { %v2656_v16 = vpack.c.bf16 %v2552_v38, %v2550_v1  ;;  %v3649_v1 = vsel %vm2756_vm14, 1.0, %v3834_v34  ;;  %v2770_v38 = vpack.c.bf16 %v3651_v36, %v3651_v36  ;;  %vm2806_vm14 = vcmp.eq.f32.partialorder %v4615_v48, 5.0 }
 0x709   : > { %v2768_v22 = vpack.c.bf16 %v3649_v1, %v3649_v1  ;;  %v3663_v36 = vsel %vm2806_vm14, 1.0, %v3834_v34 }
 0x70a   : > { %2663 = vmatpush.bf16.msra.mxu1 %v2656_v16  ;;  %v2878_v11 = vunpack.c.l.b16 %v2770_v38  ;;  %v3652_v16 = vsel %vm2771_vm1, 1.0, %v3834_v34  ;;  %v2818_v38 = vpack.c.bf16 %v3663_v36, %v3663_v36  ;;  %vm2821_vm1 = vcmp.eq.f32.partialorder %v4613_v55, 6.0 }
 0x70b   : > { %v2876_v25 = vunpack.c.l.b16 %v2768_v22  ;;  %v2783_v42 = vpack.c.bf16 %v3652_v16, %v3652_v16 }
 0x70c   : > { %v2880_v12 = vpack.c.b16 %v2878_v11, %v2877_v15  ;;  %v2907_v11 = vunpack.c.l.b16 %v2817_v37 }
 0x70d   : > { %v2879_v33 = vpack.c.b16 %v2876_v25, %v2875_v23  ;;  %v2885_v45 = vunpack.c.l.b16 %v2783_v42  ;;  %v3664_v42 = vsel %vm2819_vm15, 1.0, %v3834_v34 }
 0x70e   : > { %2664 = vmatpush.bf16.msra.mxu1 %v2655_v41  ;;  %v2606_v6 = vpop.f32.mrf.mxu1  ;;  %v3653_v41 = vsel %vm2772_vm2, 1.0, %v3834_v34  ;;  %vm2822_vm2 = vcmp.eq.f32.partialorder %v4615_v48, 6.0 }
 0x70f   : > { %v2687_v9 = vmul.f32 0.0625, %v2606_v6  ;;  %v2784_v43 = vpack.c.bf16 %v3653_v41, %v3653_v41  ;;  %v2555_v44 = vpop.f32.mrf.mxu0 }
 0x711   : > { %3626 = vmatmul.msk.bf16.vlgmr.msra.gmra.mxu1 %vm412_vm3, %v4020_v2  ;;  %3630 = vst.msk [vmem:[%s4130_s19 + $0x110] sm:$0xff] %vm681_vm10, %v2687_v9  ;;  %v2886_v39 = vunpack.c.l.b16 %v2784_v43  ;;  %v2802_v9 = vpack.c.bf16 %v3659_v0, %v3659_v0  ;;  %v3665_v43 = vsel %vm2820_vm11, 1.0, %v3834_v34 }
 0x712   : > { %3673 = vmatpush.bf16.msk.msrb.mxu1 %vm3934_vm13, %v3833_v26  ;;  %vm2725_vm13 = vcmp.eq.f32.partialorder %v4613_v55, 0.0 }
 0x713   : > { %v2889_v40 = vpack.c.b16 %v2886_v39, %v2885_v45  ;;  %v2898_v10 = vunpack.c.l.b16 %v2802_v9  ;;  %v2832_v45 = vpack.c.bf16 %v3665_v43, %v3665_v43 }
 0x715   : > { %v2916_v24 = vunpack.c.l.b16 %v2832_v45 }
 0x716   : > { %3675 = vmatpush.bf16.msk.msrb.mxu1 %vm3945_vm0, %v3833_v26  ;;  %v3642_v26 = vsel %vm2725_vm13, 1.0, %v3834_v34  ;;  %vm2739_vm0 = vcmp.eq.f32.partialorder %v4595_v28, 1.0  ;;  %v2608_v14 = vpop.f32.mrf.mxu1  ;;  %vm2787_vm13 = vcmp.eq.f32.partialorder %v4595_v28, 4.0 }
 0x717   : > { %v2737_v49 = vpack.c.bf16 %v3642_v26, %v3642_v26  ;;  %v3644_v61 = vsel %vm2739_vm0, 1.0, %v3834_v34  ;;  %v2557_v50 = vpop.f32.mrf.mxu0  ;;  %vm2789_vm0 = vcmp.eq.f32.partialorder %v4613_v55, 4.0 }
 0x718   : > { %v2751_v63 = vpack.c.bf16 %v3644_v61, %v3644_v61  ;;  %v3658_v6 = vsel %vm2789_vm0, 1.0, %v3834_v34 }
 0x719   : > { %v2857_v58 = vunpack.c.l.b16 %v2737_v49  ;;  %v2801_v8 = vpack.c.bf16 %v3658_v6, %v3658_v6 }
 0x71a   : > { %v2865_v4 = vunpack.c.l.b16 %v2751_v63 }
 0x71b   : > { %v2860_v60 = vpack.c.b16 %v2858_v59, %v2857_v58  ;;  %v2670_v58 = vpack.c.bf16 %v2557_v50, %v2555_v44  ;;  %v3656_v59 = vsel %vm2787_vm13, 1.0, %v3834_v34  ;;  %v2897_v31 = vunpack.c.l.b16 %v2801_v8 }
 0x71c   : > { %v2869_v5 = vpack.c.b16 %v2866_v20, %v2865_v4  ;;  %v2799_v61 = vpack.c.bf16 %v3656_v59, %v3656_v59  ;;  %v2831_v44 = vpack.c.bf16 %v3664_v42, %v3664_v42  ;;  %v3668_v59 = vsel %vm2835_vm4, 1.0, %v3834_v34 }
 0x71d   : > { %v2900_v13 = vpack.c.b16 %v2898_v10, %v2897_v31  ;;  %vm2837_vm13 = vcmp.eq.f32.partialorder %v4613_v55, 7.0 }
 0x71e   : > { %v2895_v3 = vunpack.c.l.b16 %v2799_v61  ;;  %v2915_v50 = vunpack.c.l.b16 %v2831_v44  ;;  %v2847_v61 = vpack.c.bf16 %v3668_v59, %v3668_v59  ;;  %v3670_v28 = vsel %vm2837_vm13, 1.0, %v3834_v34 }
 0x71f   : > { %v2560_v47 = vpop.f32.mrf.mxu0  ;;  %v2849_v8 = vpack.c.bf16 %v3670_v28, %v3670_v28 }
 0x720   : > { %v2919_v52 = vpack.c.b16 %v2916_v24, %v2915_v50 }
 0x721   : > { %3676 = vmatmul.msk.bf16.vlgmr.msrb.gmra.mxu1 %vm412_vm3, %v2859_v56  ;;  %v2890_v56 = vpack.c.b16 %v2888_v54, %v2887_v53  ;;  %v3667_v53 = vsel %vm2822_vm2, 1.0, %v3834_v34  ;;  %v2927_v31 = vunpack.c.l.b16 %v2849_v8 }
 0x727   : > { %v2562_v49 = vpop.f32.mrf.mxu0 }
 0x728   : > { %v2671_v57 = vpack.c.bf16 %v2562_v49, %v2560_v47  ;;  %v3666_v47 = vsel %vm2821_vm1, 1.0, %v3834_v34 }
 0x729   : > { %v2833_v54 = vpack.c.bf16 %v3666_v47, %v3666_v47 }
 0x72a   : > { %2678 = vmatpush.bf16.msrb.mxu3 %v2671_v57 }
 0x72e   : > { %2679 = vmatpush.bf16.msrb.mxu3 %v2670_v58 }
 0x731   : > { %3677 = vmatmul.msk.bf16.gmra.mxu1 %vm412_vm3, %v2860_v60  ;;  %v3657_v60 = vsel %vm2788_vm6, 1.0, %v3834_v34  ;;  %3627 = vmatmul.msk.bf16.vlgmr.msrb.gmra.mxu3 %vm412_vm3, %v4020_v2  ;;  %vm2838_vm6 = vcmp.eq.f32.partialorder %v4615_v48, 7.0 }
 0x732   : > { %v2800_v62 = vpack.c.bf16 %v3657_v60, %v3657_v60  ;;  %v3669_v60 = vsel %vm2836_vm5, 1.0, %v3834_v34  ;;  %v3671_v32 = vsel %vm2838_vm6, 1.0, %v3834_v34 }
 0x733   : > { %v2850_v9 = vpack.c.bf16 %v3671_v32, %v3671_v32 }
 0x734   : > { %v2896_v4 = vunpack.c.l.b16 %v2800_v62  ;;  %v2848_v62 = vpack.c.bf16 %v3669_v60, %v3669_v60 }
 0x735   : > { %v2928_v10 = vunpack.c.l.b16 %v2850_v9 }
 0x736   : > { %v2899_v20 = vpack.c.b16 %v2896_v4, %v2895_v3  ;;  %v2925_v4 = vunpack.c.l.b16 %v2847_v61 }
 0x741   : > { %3678 = vmatmul.msk.bf16.gmra.mxu1 %vm412_vm3, %v2869_v5 }
 0x74e   : > { %v2636_v18 = vpop.f32.mrf.mxu1 }
 0x74f   : > { %v2689_v21 = vmul.f32 0.0625, %v2636_v18  ;;  %v3661_v18 = vsel %vm2804_vm9, 1.0, %v3834_v34 }
 0x750   : > { %v2816_v1 = vpack.c.bf16 %v3661_v18, %v3661_v18 }
 0x751   : > { %3679 = vmatmul.msk.bf16.gmra.mxu1 %vm412_vm3, %v2870_v17  ;;  %3632 = vst.msk [vmem:[%s4130_s19 + $0x120] sm:$0xff] %vm681_vm10, %v2689_v21  ;;  %v3660_v17 = vsel %vm2803_vm8, 1.0, %v3834_v34 }
 0x752   : > { %v2815_v19 = vpack.c.bf16 %v3660_v17, %v3660_v17  ;;  %v2906_v23 = vunpack.c.l.b16 %v2816_v1 }
 0x754   : > { %v2905_v22 = vunpack.c.l.b16 %v2815_v19  ;;  %v2118_v19 = vpop.f32.mrf.mxu3 }
 0x756   : > { %v2638_v27 = vpop.f32.mrf.mxu1 }
 0x757   : > { %v2909_v27 = vpack.c.b16 %v2906_v23, %v2905_v22 }
 0x761   : > { %3680 = vmatmul.msk.bf16.gmra.mxu1 %vm412_vm3, %v2879_v33 }
 0x771   : > { %3681 = vmatmul.msk.bf16.gmra.mxu1 %vm412_vm3, %v2880_v12  ;;  %v2908_v12 = vunpack.c.l.b16 %v2818_v38 }
 0x773   : > { %v2910_v16 = vpack.c.b16 %v2908_v12, %v2907_v11 }
 0x781   : > { %3682 = vmatmul.msk.bf16.gmra.mxu1 %vm412_vm3, %v2889_v40 }
 0x78e   : > { %v2666_v26 = vpop.f32.mrf.mxu1 }
 0x78f   : > { %v2691_v29 = vmul.f32 0.0625, %v2666_v26 }
 0x791   : > { %3634 = vst.msk [vmem:[%s4130_s19 + $0x130] sm:$0xff] %vm681_vm10, %v2691_v29  ;;  %3683 = vmatmul.msk.bf16.gmra.mxu1 %vm412_vm3, %v2890_v56  ;;  %v2834_v56 = vpack.c.bf16 %v3667_v53, %v3667_v53  ;;  %v2917_v29 = vunpack.c.l.b16 %v2833_v54 }
 0x793   : > { %v2918_v49 = vunpack.c.l.b16 %v2834_v56 }
 0x795   : > { %v2920_v57 = vpack.c.b16 %v2918_v49, %v2917_v29 }
 0x796   : > { %v2668_v63 = vpop.f32.mrf.mxu1 }
 0x79e   : > { %v2988_v5 = vpop.f32.mrf.mxu1 }
 0x7a1   : > { %3684 = vmatmul.msk.bf16.gmra.mxu1 %vm412_vm3, %v2899_v20  ;;  %v2926_v20 = vunpack.c.l.b16 %v2848_v62 }
 0x7a3   : > { %v2929_v6 = vpack.c.b16 %v2926_v20, %v2925_v4 }
 0x7a6   : > { %v2990_v30 = vpop.f32.mrf.mxu1 }
 0x7a7   : > { %v3068_v25 = vpack.c.bf16 %v2990_v30, %v2988_v5 }
 0x7ae   : > { %v2993_v14 = vpop.f32.mrf.mxu1 }
 0x7b1   : > { %3685 = vmatmul.msk.bf16.gmra.mxu1 %vm412_vm3, %v2900_v13  ;;  %v2930_v13 = vpack.c.b16 %v2928_v10, %v2927_v31 }
 0x7b6   : > { %v2995_v21 = vpop.f32.mrf.mxu1 }
 0x7b7   : > { %v3069_v7 = vpack.c.bf16 %v2995_v21, %v2993_v14  ;;  %v2120_v21 = vpop.f32.mrf.mxu3 }
 0x7b9   : > { %3076 = vmatpush.bf16.msra.mxu3 %v3069_v7  ;;  %v2185_v7 = vmul.f32 0.0625, %v2118_v19 }
 0x7bb   : > { %3559 = vst.msk [vmem:[%s4130_s19 + $0xd8] sm:$0xff] %vm681_vm10, %v2185_v7 }
 0x7bd   : > { %3077 = vmatpush.bf16.msra.mxu3 %v3068_v25 }
 0x7be   : > { %v2998_v33 = vpop.f32.mrf.mxu1 }
 0x7c0   : > { %3692 = vmatmul.msk.bf16.vlgmr.msra.gmra.mxu3 %vm412_vm3, %v4020_v2 }
 0x7c1   : > { %3686 = vmatmul.msk.bf16.gmra.mxu1 %vm412_vm3, %v2909_v27  ;;  %v2148_v27 = vpop.f32.mrf.mxu3 }
 0x7c2   : > { %v2187_v36 = vmul.f32 0.0625, %v2148_v27 }
 0x7c4   : > { %3561 = vst.msk [vmem:[%s4130_s19 + $0xe8] sm:$0xff] %vm681_vm10, %v2187_v36 }
 0x7c6   : > { %v3000_v15 = vpop.f32.mrf.mxu1 }
 0x7c7   : > { %v3083_v51 = vpack.c.bf16 %v3000_v15, %v2998_v33 }
 0x7c9   : > { %v2150_v35 = vpop.f32.mrf.mxu3 }
 0x7ce   : > { %v3003_v41 = vpop.f32.mrf.mxu1 }
 0x7d1   : > { %3687 = vmatmul.msk.bf16.gmra.mxu1 %vm412_vm3, %v2910_v16  ;;  %v2178_v38 = vpop.f32.mrf.mxu3 }
 0x7d2   : > { %v2189_v12 = vmul.f32 0.0625, %v2178_v38 }
 0x7d4   : > { %3563 = vst.msk [vmem:[%s4130_s19 + $0xf8] sm:$0xff] %vm681_vm10, %v2189_v12 }
 0x7d6   : > { %v3005_v39 = vpop.f32.mrf.mxu1 }
 0x7d7   : > { %v3084_v40 = vpack.c.bf16 %v3005_v39, %v3003_v41 }
 0x7d9   : > { %3091 = vmatpush.bf16.msrb.mxu3 %v3084_v40  ;;  %v2180_v11 = vpop.f32.mrf.mxu3 }
 0x7dd   : > { %3092 = vmatpush.bf16.msrb.mxu3 %v3083_v51 }
 0x7de   : > { %v3008_v46 = vpop.f32.mrf.mxu1 }
 0x7e0   : > { %3693 = vmatmul.msk.bf16.vlgmr.msrb.gmra.mxu3 %vm412_vm3, %v4020_v2 }
 0x7e1   : > { %3688 = vmatmul.msk.bf16.gmra.mxu1 %vm412_vm3, %v2919_v52  ;;  %v2576_v43 = vpop.f32.mrf.mxu3 }
 0x7e2   : > { %v2685_v39 = vmul.f32 0.0625, %v2576_v43 }
 0x7e4   : > { %3628 = vst.msk [vmem:[%s4130_s19 + $0x100] sm:$0xff] %vm681_vm10, %v2685_v39 }
 0x7e6   : > { %v3010_v26 = vpop.f32.mrf.mxu1 }
 0x7e7   : > { %v3098_v5 = vpack.c.bf16 %v3010_v26, %v3008_v46 }
 0x7e9   : > { %v2578_v45 = vpop.f32.mrf.mxu3 }
 0x7ee   : > { %v3013_v58 = vpop.f32.mrf.mxu1 }
 0x7f1   : > { %3689 = vmatmul.msk.bf16.gmra.mxu1 %vm412_vm3, %v2920_v57  ;;  %v2591_v50 = vpop.f32.mrf.mxu3 }
 0x7f2   : > { %v2686_v52 = vmul.f32 0.0625, %v2591_v50 }
 0x7f4   : > { %3629 = vst.msk [vmem:[%s4130_s19 + $0x108] sm:$0xff] %vm681_vm10, %v2686_v52 }
 0x7f6   : > { %v3015_v63 = vpop.f32.mrf.mxu1 }
 0x7f7   : > { %v3099_v3 = vpack.c.bf16 %v3015_v63, %v3013_v58 }
 0x7f9   : > { %3106 = vmatpush.bf16.msra.mxu3 %v3099_v3  ;;  %v2593_v51 = vpop.f32.mrf.mxu3 }
 0x7fd   : > { %3107 = vmatpush.bf16.msra.mxu3 %v3098_v5 }
 0x7fe   : > { %v3018_v0 = vpop.f32.mrf.mxu1 }
 0x800   : > { %3694 = vmatmul.msk.bf16.vlgmr.msra.gmra.mxu3 %vm412_vm3, %v4020_v2 }
 0x801   : > { %3690 = vmatmul.msk.bf16.gmra.mxu1 %vm412_vm3, %v2929_v6  ;;  %v2621_v54 = vpop.f32.mrf.mxu3 }
 0x802   : > { %v2688_v26 = vmul.f32 0.0625, %v2621_v54 }
 0x804   : > { %3631 = vst.msk [vmem:[%s4130_s19 + $0x118] sm:$0xff] %vm681_vm10, %v2688_v26 }
 0x806   : > { %v3020_v30 = vpop.f32.mrf.mxu1 }
 0x807   : > { %v3113_v17 = vpack.c.bf16 %v3020_v30, %v3018_v0 }
 0x809   : > { %v2623_v29 = vpop.f32.mrf.mxu3 }
 0x80e   : > { %v3023_v14 = vpop.f32.mrf.mxu1 }
 0x811   : > { %3691 = vmatmul.msk.bf16.gmra.mxu1 %vm412_vm3, %v2930_v13  ;;  %v2651_v57 = vpop.f32.mrf.mxu3 }
 0x812   : > { %v2690_v58 = vmul.f32 0.0625, %v2651_v57 }
 0x814   : > { %3633 = vst.msk [vmem:[%s4130_s19 + $0x128] sm:$0xff] %vm681_vm10, %v2690_v58 }
 0x816   : > { %v3025_v55 = vpop.f32.mrf.mxu1 }
 0x817   : > { %v3114_v48 = vpack.c.bf16 %v3025_v55, %v3023_v14 }
 0x819   : > { %3121 = vmatpush.bf16.msrb.mxu3 %v3114_v48  ;;  %v2653_v60 = vpop.f32.mrf.mxu3 }
 0x81d   : > { %3122 = vmatpush.bf16.msrb.mxu3 %v3113_v17 }
 0x81e   : > { %v3028_v18 = vpop.f32.mrf.mxu1 }
 0x820   : > { %3695 = vmatmul.msk.bf16.vlgmr.msrb.gmra.mxu3 %vm412_vm3, %v4020_v2 }
 0x821   : > { %v2681_v3 = vpop.f32.mrf.mxu3 }
 0x822   : > { %v2692_v4 = vmul.f32 0.0625, %v2681_v3 }
 0x824   : > { %3635 = vst.msk [vmem:[%s4130_s19 + $0x138] sm:$0xff] %vm681_vm10, %v2692_v4 }
 0x826   : > { %v3030_v34 = vpop.f32.mrf.mxu1 }
 0x827   : > { %v3128_v25 = vpack.c.bf16 %v3030_v34, %v3028_v18 }
 0x829   : > { %v2683_v20 = vpop.f32.mrf.mxu3 }
 0x82e   : > { %v3033_v1 = vpop.f32.mrf.mxu1 }
 0x836   : > { %v3035_v22 = vpop.f32.mrf.mxu1 }
 0x837   : > { %v3129_v23 = vpack.c.bf16 %v3035_v22, %v3033_v1 }
 0x839   : > { %3136 = vmatpush.bf16.msra.mxu3 %v3129_v23 }
 0x83d   : > { %3137 = vmatpush.bf16.msra.mxu3 %v3128_v25 }
 0x83e   : > { %v3038_v33 = vpop.f32.mrf.mxu1 }
 0x840   : > { %3696 = vmatmul.msk.bf16.vlgmr.msra.gmra.mxu3 %vm412_vm3, %v4020_v2 }
 0x843   : > { %v3079_v5 = vpop.f32.mrf.mxu3 }
 0x844   : > { %v3188_v6 = vmul.f32 0.0625, %v3079_v5 }
 0x846   : > { %v3040_v37 = vpop.f32.mrf.mxu1  ;;  %3700 = vst.msk [vmem:[%s4130_s19 + $0x140] sm:$0xff] %vm681_vm10, %v3188_v6 }
 0x847   : > { %v3143_v42 = vpack.c.bf16 %v3040_v37, %v3038_v33 }
 0x84b   : > { %v3081_v0 = vpop.f32.mrf.mxu3 }
 0x84e   : > { %v3043_v15 = vpop.f32.mrf.mxu1 }
 0x856   : > { %v3045_v16 = vpop.f32.mrf.mxu1 }
 0x857   : > { %v3144_v41 = vpack.c.bf16 %v3045_v16, %v3043_v15 }
 0x859   : > { %3151 = vmatpush.bf16.msra.mxu2 %v3144_v41 }
 0x85d   : > { %3152 = vmatpush.bf16.msra.mxu2 %v3143_v42 }
 0x85e   : > { %v3048_v44 = vpop.f32.mrf.mxu1 }
 0x860   : > { %3697 = vmatmul.msk.bf16.vlgmr.msra.gmra.mxu2 %vm412_vm3, %v4020_v2 }
 0x863   : > { %v3094_v28 = vpop.f32.mrf.mxu3 }
 0x864   : > { %v3189_v32 = vmul.f32 0.0625, %v3094_v28 }
 0x866   : > { %v3050_v40 = vpop.f32.mrf.mxu1  ;;  %3701 = vst.msk [vmem:[%s4130_s19 + $0x148] sm:$0xff] %vm681_vm10, %v3189_v32 }
 0x867   : > { %v3158_v53 = vpack.c.bf16 %v3050_v40, %v3048_v44 }
 0x86b   : > { %v3096_v8 = vpop.f32.mrf.mxu3 }
 0x86e   : > { %v3053_v24 = vpop.f32.mrf.mxu1 }
 0x876   : > { %v3055_v46 = vpop.f32.mrf.mxu1 }
 0x877   : > { %v3159_v47 = vpack.c.bf16 %v3055_v46, %v3053_v24 }
 0x879   : > { %3166 = vmatpush.bf16.msrb.mxu3 %v3159_v47 }
 0x87d   : > { %3167 = vmatpush.bf16.msrb.mxu3 %v3158_v53 }
 0x87e   : > { %v3058_v56 = vpop.f32.mrf.mxu1 }
 0x880   : > { %3698 = vmatmul.msk.bf16.vlgmr.msrb.gmra.mxu3 %vm412_vm3, %v4020_v2 }
 0x883   : > { %v3109_v9 = vpop.f32.mrf.mxu3 }
 0x884   : > { %v3190_v30 = vmul.f32 0.0625, %v3109_v9 }
 0x886   : > { %v3060_v49 = vpop.f32.mrf.mxu1  ;;  %3702 = vst.msk [vmem:[%s4130_s19 + $0x150] sm:$0xff] %vm681_vm10, %v3190_v30 }
 0x887   : > { %v3173_v63 = vpack.c.bf16 %v3060_v49, %v3058_v56 }
 0x88e   : > { %v3063_v59 = vpop.f32.mrf.mxu1 }
 0x896   : > { %v3065_v61 = vpop.f32.mrf.mxu1 }
 0x897   : > { %v3174_v62 = vpack.c.bf16 %v3065_v61, %v3063_v59 }
 0x899   : > { %3181 = vmatpush.bf16.msrb.mxu2 %v3174_v62 }
 0x89d   : > { %3182 = vmatpush.bf16.msrb.mxu2 %v3173_v63 }
 0x8a0   : > { %3699 = vmatmul.msk.bf16.vlgmr.msrb.gmra.mxu2 %vm412_vm3, %v4020_v2  ;;  %v3111_v2 = vpop.f32.mrf.mxu3 }
 0x8a8   : > { %v3124_v31 = vpop.f32.mrf.mxu3 }
 0x8a9   : > { %v3191_v10 = vmul.f32 0.0625, %v3124_v31 }
 0x8ab   : > { %3703 = vst.msk [vmem:[%s4130_s19 + $0x158] sm:$0xff] %vm681_vm10, %v3191_v10 }
 0x8b0   : > { %v3126_v14 = vpop.f32.mrf.mxu3 }
 0x8c3   : > { %v3139_v17 = vpop.f32.mrf.mxu3 }
 0x8c4   : > { %v3192_v18 = vmul.f32 0.0625, %v3139_v17 }
 0x8c6   : > { %3704 = vst.msk [vmem:[%s4130_s19 + $0x160] sm:$0xff] %vm681_vm10, %v3192_v18 }
 0x8cb   : > { %v3141_v34 = vpop.f32.mrf.mxu3 }
 0x8e3   : > { %v3154_v13 = vpop.f32.mrf.mxu2 }
 0x8e4   : > { %v3193_v55 = vmul.f32 0.0625, %v3154_v13 }
 0x8e6   : > { %3705 = vst.msk [vmem:[%s4130_s19 + $0x168] sm:$0xff] %vm681_vm10, %v3193_v55 }
 0x8eb   : > { %v3156_v48 = vpop.f32.mrf.mxu2 }
 0x903   : > { %v3169_v19 = vpop.f32.mrf.mxu3 }
 0x904   : > { %v3194_v1 = vmul.f32 0.0625, %v3169_v19 }
 0x906   : > { %3706 = vst.msk [vmem:[%s4130_s19 + $0x170] sm:$0xff] %vm681_vm10, %v3194_v1 }
 0x90b   : > { %v3171_v21 = vpop.f32.mrf.mxu3 }
 0x923   : > { %v3184_v7 = vpop.f32.mrf.mxu2 }
 0x924   : > { %v3195_v22 = vmul.f32 0.0625, %v3184_v7 }
 0x926   : > { %3707 = vst.msk [vmem:[%s4130_s19 + $0x178] sm:$0xff] %vm681_vm10, %v3195_v22 }
 0x92b   : > { %v3186_v23 = vpop.f32.mrf.mxu2 }
 0x92c PF: > { %p11_p7 = scmp.ge.s32.totalorder %s3865_s11, 5   ;;  %s4776_s6 = smov %s3821_s7 }
 0x92d   : > { %s4777_s7 = smov %s3825_s8  ;;  %s4778_s8 = smov %s3875_s14 }
 0x92e   : > { %s4779_s9 = smov %s3865_s11  ;;  %13 = sbr.rel (!%p11_p7) target bundleno = 3 (0x3), region = 74 }
 0x933   :  { %3229 = vsyncpa [#allocation3], 1 }
 0x934   :  { %3231 = vsyncpa [#allocation3 + $0x1], 1 }

</bundles_post_ra>
